<compile_context>
chip_gen: v5e
topology: v5e:2x2
jax: 0.10.0
libtpu: 0.0.40
codegen_flags: <defaults>
</compile_context>

<pallas_src>
import functools

import jax
import jax.numpy as jnp
from jax.experimental import pallas as pl
from jax.experimental.pallas import tpu as pltpu


# ----------------------------------------------------------------------------- kernel
def _block35_fused_kernel(x_ref, mask_ref, cmask_ref, wh_ref, bh_ref,
                          w1_ref, b1_ref, w22_ref, b22_ref, w23_ref, b23_ref,
                          wp_ref, bp_ref, o_ref, *, H, W):
    Wp = W + 4                       # padded width  (2 cols each side)
    A = 2 * Wp - 1                   # start of branch2 intermediate region
    Lm = (H + 2) * Wp + 2            # its length (1 extra halo element each end)
    R0 = 3 * Wp                      # start of output region (3 pad rows on top)
    Lo = H * Wp                      # output region length (full padded width)

    x = x_ref[...]                                    # (Mp, 256) f32
    mask = mask_ref[...]                              # (Mp, 1)   f32, 1 inside image

    # fused 1x1 heads: [branch0 | branch1_1 | branch2_1], BN folded, ReLU
    heads = jnp.dot(x.astype(jnp.bfloat16), wh_ref[...],
                    preferred_element_type=jnp.float32)          # (Mp, 96)
    heads = jnp.maximum(heads + bh_ref[...], 0.0) * mask          # zero at spatial pad
    heads_bf = heads.astype(jnp.bfloat16)

    def conv3x3_relu(src_bf, src_start, out_start, out_len, w_ref, b_ref):
        # 3x3 "same" conv as 9 shifted matmuls accumulated in f32.  The source is
        # already zeroed at out-of-image positions, so the shifts implement zero pad.
        acc = None
        for dy in range(3):
            for dx in range(3):
                off = (out_start - src_start) + (dy - 1) * Wp + (dx - 1)
                t = jnp.dot(src_bf[off:off + out_len, :], w_ref[3 * dy + dx],
                            preferred_element_type=jnp.float32)
                acc = t if acc is None else acc + t
        return jnp.maximum(acc + b_ref[...], 0.0)

    # branch1: 1x1 -> 3x3   (cout embedded at channels 32:64 of the 96-wide cat space)
    b1 = conv3x3_relu(heads_bf, 0, R0, Lo, w1_ref, b1_ref)        # (Lo, 96)

    # branch2: 1x1 -> 3x3 (32-wide intermediate) -> 3x3 (cout embedded at 64:96)
    b2m = conv3x3_relu(heads_bf, 0, A, Lm, w22_ref, b22_ref)      # (Lm, 32)
    b2m = (b2m * mask[A:A + Lm, :]).astype(jnp.bfloat16)          # re-zero padding
    b2 = conv3x3_relu(b2m, A, R0, Lo, w23_ref, b23_ref)           # (Lo, 96)

    # concat in the 96-wide channel space (disjoint blocks), then ONE fused 96->256
    # projection; block `scale` is folded into wp/bp.  Residual add + ReLU epilogue.
    cat = heads[R0:R0 + Lo, :] * cmask_ref[...] + b1 + b2          # (Lo, 96) f32
    out = jnp.dot(cat.astype(jnp.bfloat16), wp_ref[...],
                  preferred_element_type=jnp.float32)              # (Lo, 256)
    out = out + bp_ref[...] + x[R0:R0 + Lo, :]
    o_ref[...] = jnp.maximum(out, 0.0).astype(o_ref.dtype)


# ----------------------------------------------------------------------------- wrapper
def _fold_bn(p, eps=1e-3):
    s = p["gamma"] / jnp.sqrt(p["var"] + eps)
    b = p["beta"] - p["mean"] * s
    return s, b


def block35_down(x_nchw, params, scale=1.0):
    N, Cin, H, W = x_nchw.shape
    assert Cin == 256, "Block35_down expects 256 input channels"
    PH, PW = 3, 2
    Hp, Wp = H + 2 * PH, W + 2 * PW
    Mp = Hp * Wp
    Lo = H * Wp

    # ---- data prep (cheap XLA glue): NCHW -> padded, flattened NHWC ----
    x = jnp.transpose(x_nchw, (0, 2, 3, 1))                       # NHWC
    xp = jnp.pad(x, ((0, 0), (PH, PH), (PW, PW), (0, 0)))
    x_flat = xp.reshape(N, Mp, 256)

    ii = jnp.arange(Hp)[:, None]
    jj = jnp.arange(Wp)[None, :]
    mask = ((ii >= PH) & (ii < PH + H) & (jj >= PW) & (jj < PW + W))
    mask = mask.astype(jnp.float32).reshape(Mp, 1)

    # channel mask selecting branch0's slot (channels 0:32) out of the fused heads
    cmask = jnp.concatenate([jnp.ones((32,), jnp.float32),
                             jnp.zeros((64,), jnp.float32)]).reshape(1, 96)

    # ---- weight prep: fold BN scale into weights, bf16 for the MXU ----
    def head_w(p):                                    # 1x1 conv (32,256,1,1)
        s, b = _fold_bn(p)
        w = p["w"].reshape(32, 256).T * s[None, :]    # (256, 32), scale folded
        return w, b

    w0, b0 = head_w(params["branch0"])
    w11, b11 = head_w(params["branch1_1"])
    w21, b21 = head_w(params["branch2_1"])
    Wh = jnp.concatenate([w0, w11, w21], axis=1).astype(jnp.bfloat16)      # (256, 96)
    bh = jnp.concatenate([b0, b11, b21]).reshape(1, 96).astype(jnp.float32)

    def taps3x3(p, cin_total, cin_off, cout_total, cout_off):
        # 3x3 conv (32,32,3,3) OIHW -> (tap, cin, cout), zero-embedded into the
        # requested cin/cout channel spaces so the kernel needs no lane slicing.
        s, b = _fold_bn(p)
        w = p["w"] * s[:, None, None, None]                        # scale per out ch
        w = jnp.transpose(w, (2, 3, 1, 0)).reshape(9, 32, 32)      # (tap, cin, cout)
        wf = jnp.zeros((9, cin_total, cout_total), w.dtype)
        wf = wf.at[:, cin_off:cin_off + 32, cout_off:cout_off + 32].set(w)
        bf = jnp.zeros((cout_total,), b.dtype).at[cout_off:cout_off + 32].set(b)
        return wf.astype(jnp.bfloat16), bf.reshape(1, cout_total).astype(jnp.float32)

    W1, bb1 = taps3x3(params["branch1_2"], 96, 32, 96, 32)
    W22, bb22 = taps3x3(params["branch2_2"], 96, 64, 32, 0)
    W23, bb23 = taps3x3(params["branch2_3"], 32, 0, 96, 64)

    # 96->256 projection, block `scale` folded in
    P = (params["conv2d"]["w"].reshape(256, 96).T * jnp.float32(scale)).astype(jnp.bfloat16)
    bp = (params["conv2d"]["b"] * jnp.float32(scale)).reshape(1, 256).astype(jnp.float32)

    kern = functools.partial(_block35_fused_kernel, H=H, W=W)
    out_flat = pl.pallas_call(
        kern,
        out_shape=jax.ShapeDtypeStruct((N, Lo, 256), jnp.float32),
        grid=(N,),
        in_specs=[
            pl.BlockSpec((None, Mp, 256), lambda n: (n, 0, 0)),    # x (per-image tile)
            pl.BlockSpec((Mp, 1), lambda n: (0, 0)),               # validity mask
            pl.BlockSpec((1, 96), lambda n: (0, 0)),               # branch0 channel mask
            pl.BlockSpec((256, 96), lambda n: (0, 0)),             # fused head weights
            pl.BlockSpec((1, 96), lambda n: (0, 0)),               # fused head bias
            pl.BlockSpec((9, 96, 96), lambda n: (0, 0, 0)),        # branch1_2 taps
            pl.BlockSpec((1, 96), lambda n: (0, 0)),
            pl.BlockSpec((9, 96, 32), lambda n: (0, 0, 0)),        # branch2_2 taps
            pl.BlockSpec((1, 32), lambda n: (0, 0)),
            pl.BlockSpec((9, 32, 96), lambda n: (0, 0, 0)),        # branch2_3 taps
            pl.BlockSpec((1, 96), lambda n: (0, 0)),
            pl.BlockSpec((96, 256), lambda n: (0, 0)),             # fused projection
            pl.BlockSpec((1, 256), lambda n: (0, 0)),              # projection bias
        ],
        out_specs=pl.BlockSpec((None, Lo, 256), lambda n: (n, 0, 0)),
        compiler_params=pltpu.CompilerParams(
            dimension_semantics=("parallel",),
            vmem_limit_bytes=32 * 1024 * 1024),
    )(x_flat, mask, cmask, Wh, bh, W1, bb1, W22, bb22, W23, bb23, P, bp)

    # drop the padded (garbage) columns and return NCHW
    out = out_flat.reshape(N, H, Wp, 256)[:, :, PW:PW + W, :]
    return jnp.transpose(out, (0, 3, 1, 2))


# ----------------------------------------------------------------------------- params
def _init_basic_conv(key, cin, cout, k):
    k1, k2, k3, k4, k5 = jax.random.split(key, 5)
    return {
        "w": 0.05 * jax.random.normal(k1, (cout, cin, k, k), jnp.float32),
        "gamma": jax.random.uniform(k2, (cout,), jnp.float32, 0.5, 1.5),
        "beta": 0.1 * jax.random.normal(k3, (cout,), jnp.float32),
        "mean": 0.1 * jax.random.normal(k4, (cout,), jnp.float32),
        "var": jax.random.uniform(k5, (cout,), jnp.float32, 0.5, 1.5),
    }


def init_params(key):
    keys = jax.random.split(key, 8)
    return {
        "branch0":   _init_basic_conv(keys[0], 256, 32, 1),
        "branch1_1": _init_basic_conv(keys[1], 256, 32, 1),
        "branch1_2": _init_basic_conv(keys[2], 32, 32, 3),
        "branch2_1": _init_basic_conv(keys[3], 256, 32, 1),
        "branch2_2": _init_basic_conv(keys[4], 32, 32, 3),
        "branch2_3": _init_basic_conv(keys[5], 32, 32, 3),
        "conv2d": {
            "w": 0.05 * jax.random.normal(keys[6], (256, 96, 1, 1), jnp.float32),
            "b": 0.05 * jax.random.normal(keys[7], (256,), jnp.float32),
        },
    }


# ----------------------------------------------------------------------------- reference
def _ref_basic_conv(x, p, pad):
    y = jax.lax.conv_general_dilated(
        x, p["w"], (1, 1), [(pad, pad), (pad, pad)],
        dimension_numbers=("NCHW", "OIHW", "NCHW"))
    s, b = _fold_bn(p)
    y = y * s[None, :, None, None] + b[None, :, None, None]
    return jnp.maximum(y, 0.0)


def block35_down_ref(x, params, scale=1.0):
    x0 = _ref_basic_conv(x, params["branch0"], 0)
    x1 = _ref_basic_conv(x, params["branch1_1"], 0)
    x1 = _ref_basic_conv(x1, params["branch1_2"], 1)
    x2 = _ref_basic_conv(x, params["branch2_1"], 0)
    x2 = _ref_basic_conv(x2, params["branch2_2"], 1)
    x2 = _ref_basic_conv(x2, params["branch2_3"], 1)
    cat = jnp.concatenate([x0, x1, x2], axis=1)
    out = jax.lax.conv_general_dilated(
        cat, params["conv2d"]["w"], (1, 1), [(0, 0), (0, 0)],
        dimension_numbers=("NCHW", "OIHW", "NCHW"))
    out = out + params["conv2d"]["b"][None, :, None, None]
    out = out * scale + x
    return jnp.maximum(out, 0.0)


# ----------------------------------------------------------------------------- main
if __name__ == "__main__":
    key = jax.random.PRNGKey(0)
    kx, kp = jax.random.split(key)
    # Module hard-codes 256 input channels; keep spatial/batch small.
    x = jax.random.normal(kx, (2, 256, 8, 8), jnp.float32)
    params = init_params(kp)

    fwd = jax.jit(functools.partial(block35_down, scale=1.0))
    out = jax.block_until_ready(fwd(x, params))

    ref = jax.block_until_ready(block35_down_ref(x, params, scale=1.0))
    assert out.shape == ref.shape and out.dtype == ref.dtype
    assert bool(jnp.allclose(out, ref, atol=2e-2, rtol=2e-2)), "Pallas vs reference mismatch"

    print("KERNEL_OK")
</pallas_src>

<mosaic_0001>
module attributes {stable_mosaic.version = 11 : i64} {
  func.func @_block35_fused_kernel(%arg0: i32, %arg1: memref<1x168x256xf32, #tpu.memory_space<vmem>>, %arg2: memref<168x1xf32, #tpu.memory_space<vmem>>, %arg3: memref<1x96xf32, #tpu.memory_space<vmem>>, %arg4: memref<256x96xbf16, #tpu.memory_space<vmem>>, %arg5: memref<1x96xf32, #tpu.memory_space<vmem>>, %arg6: memref<9x96x96xbf16, #tpu.memory_space<vmem>>, %arg7: memref<1x96xf32, #tpu.memory_space<vmem>>, %arg8: memref<9x96x32xbf16, #tpu.memory_space<vmem>>, %arg9: memref<1x32xf32, #tpu.memory_space<vmem>>, %arg10: memref<9x32x96xbf16, #tpu.memory_space<vmem>>, %arg11: memref<1x96xf32, #tpu.memory_space<vmem>>, %arg12: memref<96x256xbf16, #tpu.memory_space<vmem>>, %arg13: memref<1x256xf32, #tpu.memory_space<vmem>>, %arg14: memref<1x96x256xf32, #tpu.memory_space<vmem>>) attributes {dimension_semantics = [#tpu.dimension_semantics<parallel>], iteration_bounds = array<i64: 2>, scalar_prefetch = 0 : i64, scratch_operands = 0 : i64, tpu.core_type = #tpu.core_type<tc>, window_params = [{transform_indices = @transform_0, window_bounds = array<i64: 1, 168, 256>}, {pipeline_mode = #tpu.pipeline_mode<synchronous>, transform_indices = @transform_1, window_bounds = array<i64: 168, 1>}, {pipeline_mode = #tpu.pipeline_mode<synchronous>, transform_indices = @transform_2, window_bounds = array<i64: 1, 96>}, {pipeline_mode = #tpu.pipeline_mode<synchronous>, transform_indices = @transform_3, window_bounds = array<i64: 256, 96>}, {pipeline_mode = #tpu.pipeline_mode<synchronous>, transform_indices = @transform_4, window_bounds = array<i64: 1, 96>}, {pipeline_mode = #tpu.pipeline_mode<synchronous>, transform_indices = @transform_5, window_bounds = array<i64: 9, 96, 96>}, {pipeline_mode = #tpu.pipeline_mode<synchronous>, transform_indices = @transform_6, window_bounds = array<i64: 1, 96>}, {pipeline_mode = #tpu.pipeline_mode<synchronous>, transform_indices = @transform_7, window_bounds = array<i64: 9, 96, 32>}, {pipeline_mode = #tpu.pipeline_mode<synchronous>, transform_indices = @transform_8, window_bounds = array<i64: 1, 32>}, {pipeline_mode = #tpu.pipeline_mode<synchronous>, transform_indices = @transform_9, window_bounds = array<i64: 9, 32, 96>}, {pipeline_mode = #tpu.pipeline_mode<synchronous>, transform_indices = @transform_10, window_bounds = array<i64: 1, 96>}, {pipeline_mode = #tpu.pipeline_mode<synchronous>, transform_indices = @transform_11, window_bounds = array<i64: 96, 256>}, {pipeline_mode = #tpu.pipeline_mode<synchronous>, transform_indices = @transform_12, window_bounds = array<i64: 1, 256>}, {transform_indices = @transform_13, window_bounds = array<i64: 1, 96, 256>}]} {
    %c0 = arith.constant 0 : index
    %c0_0 = arith.constant 0 : index
    %c0_1 = arith.constant 0 : index
    %0 = vector.load %arg1[%c0, %c0_0, %c0_1] : memref<1x168x256xf32, #tpu.memory_space<vmem>>, vector<1x168x256xf32>
    %1 = vector.shape_cast %0 : vector<1x168x256xf32> to vector<168x256xf32>
    %c0_2 = arith.constant 0 : index
    %c0_3 = arith.constant 0 : index
    %2 = vector.load %arg2[%c0_2, %c0_3] : memref<168x1xf32, #tpu.memory_space<vmem>>, vector<168x1xf32>
    %3 = arith.truncf %1 : vector<168x256xf32> to vector<168x256xbf16>
    %c0_4 = arith.constant 0 : index
    %c0_5 = arith.constant 0 : index
    %4 = vector.load %arg4[%c0_4, %c0_5] : memref<256x96xbf16, #tpu.memory_space<vmem>>, vector<256x96xbf16>
    %cst = arith.constant dense<0.000000e+00> : vector<168x96xf32>
    %5 = tpu.matmul %3, %4, %cst {dimension_numbers = #tpu.dot_dimension_numbers<[1], [0], [0], [1], [0, 0, 1, 1], [], []>} : vector<168x256xbf16>, vector<256x96xbf16>, vector<168x96xf32> -> vector<168x96xf32>
    %c0_6 = arith.constant 0 : index
    %c0_7 = arith.constant 0 : index
    %6 = vector.load %arg5[%c0_6, %c0_7] : memref<1x96xf32, #tpu.memory_space<vmem>>, vector<1x96xf32>
    %7 = vector.broadcast %6 : vector<1x96xf32> to vector<168x96xf32>
    %8 = arith.addf %5, %7 : vector<168x96xf32>
    %cst_8 = arith.constant 0.000000e+00 : f32
    %9 = vector.broadcast %cst_8 : f32 to vector<168x96xf32>
    %10 = arith.maximumf %8, %9 : vector<168x96xf32>
    %11 = vector.broadcast %2 : vector<168x1xf32> to vector<168x96xf32>
    %12 = arith.mulf %10, %11 : vector<168x96xf32>
    %13 = arith.truncf %12 : vector<168x96xf32> to vector<168x96xbf16>
    %14 = vector.extract_strided_slice %13 {offsets = [23, 0], sizes = [96, 96], strides = [1, 1]} : vector<168x96xbf16> to vector<96x96xbf16>
    %c0_9 = arith.constant 0 : index
    %c0_10 = arith.constant 0 : index
    %c0_11 = arith.constant 0 : index
    %15 = vector.load %arg6[%c0_9, %c0_10, %c0_11] : memref<9x96x96xbf16, #tpu.memory_space<vmem>>, vector<1x96x96xbf16>
    %16 = vector.shape_cast %15 : vector<1x96x96xbf16> to vector<96x96xbf16>
    %cst_12 = arith.constant dense<0.000000e+00> : vector<96x96xf32>
    %17 = tpu.matmul %14, %16, %cst_12 {dimension_numbers = #tpu.dot_dimension_numbers<[1], [0], [0], [1], [0, 0, 1, 1], [], []>} : vector<96x96xbf16>, vector<96x96xbf16>, vector<96x96xf32> -> vector<96x96xf32>
    %18 = vector.extract_strided_slice %13 {offsets = [24, 0], sizes = [96, 96], strides = [1, 1]} : vector<168x96xbf16> to vector<96x96xbf16>
    %c1 = arith.constant 1 : index
    %c0_13 = arith.constant 0 : index
    %c0_14 = arith.constant 0 : index
    %19 = vector.load %arg6[%c1, %c0_13, %c0_14] : memref<9x96x96xbf16, #tpu.memory_space<vmem>>, vector<1x96x96xbf16>
    %20 = vector.shape_cast %19 : vector<1x96x96xbf16> to vector<96x96xbf16>
    %cst_15 = arith.constant dense<0.000000e+00> : vector<96x96xf32>
    %21 = tpu.matmul %18, %20, %cst_15 {dimension_numbers = #tpu.dot_dimension_numbers<[1], [0], [0], [1], [0, 0, 1, 1], [], []>} : vector<96x96xbf16>, vector<96x96xbf16>, vector<96x96xf32> -> vector<96x96xf32>
    %22 = arith.addf %17, %21 : vector<96x96xf32>
    %23 = vector.extract_strided_slice %13 {offsets = [25, 0], sizes = [96, 96], strides = [1, 1]} : vector<168x96xbf16> to vector<96x96xbf16>
    %c2 = arith.constant 2 : index
    %c0_16 = arith.constant 0 : index
    %c0_17 = arith.constant 0 : index
    %24 = vector.load %arg6[%c2, %c0_16, %c0_17] : memref<9x96x96xbf16, #tpu.memory_space<vmem>>, vector<1x96x96xbf16>
    %25 = vector.shape_cast %24 : vector<1x96x96xbf16> to vector<96x96xbf16>
    %cst_18 = arith.constant dense<0.000000e+00> : vector<96x96xf32>
    %26 = tpu.matmul %23, %25, %cst_18 {dimension_numbers = #tpu.dot_dimension_numbers<[1], [0], [0], [1], [0, 0, 1, 1], [], []>} : vector<96x96xbf16>, vector<96x96xbf16>, vector<96x96xf32> -> vector<96x96xf32>
    %27 = arith.addf %22, %26 : vector<96x96xf32>
    %28 = vector.extract_strided_slice %13 {offsets = [35, 0], sizes = [96, 96], strides = [1, 1]} : vector<168x96xbf16> to vector<96x96xbf16>
    %c3 = arith.constant 3 : index
    %c0_19 = arith.constant 0 : index
    %c0_20 = arith.constant 0 : index
    %29 = vector.load %arg6[%c3, %c0_19, %c0_20] : memref<9x96x96xbf16, #tpu.memory_space<vmem>>, vector<1x96x96xbf16>
    %30 = vector.shape_cast %29 : vector<1x96x96xbf16> to vector<96x96xbf16>
    %cst_21 = arith.constant dense<0.000000e+00> : vector<96x96xf32>
    %31 = tpu.matmul %28, %30, %cst_21 {dimension_numbers = #tpu.dot_dimension_numbers<[1], [0], [0], [1], [0, 0, 1, 1], [], []>} : vector<96x96xbf16>, vector<96x96xbf16>, vector<96x96xf32> -> vector<96x96xf32>
    %32 = arith.addf %27, %31 : vector<96x96xf32>
    %33 = vector.extract_strided_slice %13 {offsets = [36, 0], sizes = [96, 96], strides = [1, 1]} : vector<168x96xbf16> to vector<96x96xbf16>
    %c4 = arith.constant 4 : index
    %c0_22 = arith.constant 0 : index
    %c0_23 = arith.constant 0 : index
    %34 = vector.load %arg6[%c4, %c0_22, %c0_23] : memref<9x96x96xbf16, #tpu.memory_space<vmem>>, vector<1x96x96xbf16>
    %35 = vector.shape_cast %34 : vector<1x96x96xbf16> to vector<96x96xbf16>
    %cst_24 = arith.constant dense<0.000000e+00> : vector<96x96xf32>
    %36 = tpu.matmul %33, %35, %cst_24 {dimension_numbers = #tpu.dot_dimension_numbers<[1], [0], [0], [1], [0, 0, 1, 1], [], []>} : vector<96x96xbf16>, vector<96x96xbf16>, vector<96x96xf32> -> vector<96x96xf32>
    %37 = arith.addf %32, %36 : vector<96x96xf32>
    %38 = vector.extract_strided_slice %13 {offsets = [37, 0], sizes = [96, 96], strides = [1, 1]} : vector<168x96xbf16> to vector<96x96xbf16>
    %c5 = arith.constant 5 : index
    %c0_25 = arith.constant 0 : index
    %c0_26 = arith.constant 0 : index
    %39 = vector.load %arg6[%c5, %c0_25, %c0_26] : memref<9x96x96xbf16, #tpu.memory_space<vmem>>, vector<1x96x96xbf16>
    %40 = vector.shape_cast %39 : vector<1x96x96xbf16> to vector<96x96xbf16>
    %cst_27 = arith.constant dense<0.000000e+00> : vector<96x96xf32>
    %41 = tpu.matmul %38, %40, %cst_27 {dimension_numbers = #tpu.dot_dimension_numbers<[1], [0], [0], [1], [0, 0, 1, 1], [], []>} : vector<96x96xbf16>, vector<96x96xbf16>, vector<96x96xf32> -> vector<96x96xf32>
    %42 = arith.addf %37, %41 : vector<96x96xf32>
    %43 = vector.extract_strided_slice %13 {offsets = [47, 0], sizes = [96, 96], strides = [1, 1]} : vector<168x96xbf16> to vector<96x96xbf16>
    %c6 = arith.constant 6 : index
    %c0_28 = arith.constant 0 : index
    %c0_29 = arith.constant 0 : index
    %44 = vector.load %arg6[%c6, %c0_28, %c0_29] : memref<9x96x96xbf16, #tpu.memory_space<vmem>>, vector<1x96x96xbf16>
    %45 = vector.shape_cast %44 : vector<1x96x96xbf16> to vector<96x96xbf16>
    %cst_30 = arith.constant dense<0.000000e+00> : vector<96x96xf32>
    %46 = tpu.matmul %43, %45, %cst_30 {dimension_numbers = #tpu.dot_dimension_numbers<[1], [0], [0], [1], [0, 0, 1, 1], [], []>} : vector<96x96xbf16>, vector<96x96xbf16>, vector<96x96xf32> -> vector<96x96xf32>
    %47 = arith.addf %42, %46 : vector<96x96xf32>
    %48 = vector.extract_strided_slice %13 {offsets = [48, 0], sizes = [96, 96], strides = [1, 1]} : vector<168x96xbf16> to vector<96x96xbf16>
    %c7 = arith.constant 7 : index
    %c0_31 = arith.constant 0 : index
    %c0_32 = arith.constant 0 : index
    %49 = vector.load %arg6[%c7, %c0_31, %c0_32] : memref<9x96x96xbf16, #tpu.memory_space<vmem>>, vector<1x96x96xbf16>
    %50 = vector.shape_cast %49 : vector<1x96x96xbf16> to vector<96x96xbf16>
    %cst_33 = arith.constant dense<0.000000e+00> : vector<96x96xf32>
    %51 = tpu.matmul %48, %50, %cst_33 {dimension_numbers = #tpu.dot_dimension_numbers<[1], [0], [0], [1], [0, 0, 1, 1], [], []>} : vector<96x96xbf16>, vector<96x96xbf16>, vector<96x96xf32> -> vector<96x96xf32>
    %52 = arith.addf %47, %51 : vector<96x96xf32>
    %53 = vector.extract_strided_slice %13 {offsets = [49, 0], sizes = [96, 96], strides = [1, 1]} : vector<168x96xbf16> to vector<96x96xbf16>
    %c8 = arith.constant 8 : index
    %c0_34 = arith.constant 0 : index
    %c0_35 = arith.constant 0 : index
    %54 = vector.load %arg6[%c8, %c0_34, %c0_35] : memref<9x96x96xbf16, #tpu.memory_space<vmem>>, vector<1x96x96xbf16>
    %55 = vector.shape_cast %54 : vector<1x96x96xbf16> to vector<96x96xbf16>
    %cst_36 = arith.constant dense<0.000000e+00> : vector<96x96xf32>
    %56 = tpu.matmul %53, %55, %cst_36 {dimension_numbers = #tpu.dot_dimension_numbers<[1], [0], [0], [1], [0, 0, 1, 1], [], []>} : vector<96x96xbf16>, vector<96x96xbf16>, vector<96x96xf32> -> vector<96x96xf32>
    %57 = arith.addf %52, %56 : vector<96x96xf32>
    %c0_37 = arith.constant 0 : index
    %c0_38 = arith.constant 0 : index
    %58 = vector.load %arg7[%c0_37, %c0_38] : memref<1x96xf32, #tpu.memory_space<vmem>>, vector<1x96xf32>
    %59 = vector.broadcast %58 : vector<1x96xf32> to vector<96x96xf32>
    %60 = arith.addf %57, %59 : vector<96x96xf32>
    %cst_39 = arith.constant 0.000000e+00 : f32
    %61 = vector.broadcast %cst_39 : f32 to vector<96x96xf32>
    %62 = arith.maximumf %60, %61 : vector<96x96xf32>
    %63 = vector.extract_strided_slice %13 {offsets = [10, 0], sizes = [122, 96], strides = [1, 1]} : vector<168x96xbf16> to vector<122x96xbf16>
    %c0_40 = arith.constant 0 : index
    %c0_41 = arith.constant 0 : index
    %c0_42 = arith.constant 0 : index
    %64 = vector.load %arg8[%c0_40, %c0_41, %c0_42] : memref<9x96x32xbf16, #tpu.memory_space<vmem>>, vector<1x96x32xbf16>
    %65 = vector.shape_cast %64 : vector<1x96x32xbf16> to vector<96x32xbf16>
    %cst_43 = arith.constant dense<0.000000e+00> : vector<122x32xf32>
    %66 = tpu.matmul %63, %65, %cst_43 {dimension_numbers = #tpu.dot_dimension_numbers<[1], [0], [0], [1], [0, 0, 1, 1], [], []>} : vector<122x96xbf16>, vector<96x32xbf16>, vector<122x32xf32> -> vector<122x32xf32>
    %67 = vector.extract_strided_slice %13 {offsets = [11, 0], sizes = [122, 96], strides = [1, 1]} : vector<168x96xbf16> to vector<122x96xbf16>
    %c1_44 = arith.constant 1 : index
    %c0_45 = arith.constant 0 : index
    %c0_46 = arith.constant 0 : index
    %68 = vector.load %arg8[%c1_44, %c0_45, %c0_46] : memref<9x96x32xbf16, #tpu.memory_space<vmem>>, vector<1x96x32xbf16>
    %69 = vector.shape_cast %68 : vector<1x96x32xbf16> to vector<96x32xbf16>
    %cst_47 = arith.constant dense<0.000000e+00> : vector<122x32xf32>
    %70 = tpu.matmul %67, %69, %cst_47 {dimension_numbers = #tpu.dot_dimension_numbers<[1], [0], [0], [1], [0, 0, 1, 1], [], []>} : vector<122x96xbf16>, vector<96x32xbf16>, vector<122x32xf32> -> vector<122x32xf32>
    %71 = arith.addf %66, %70 : vector<122x32xf32>
    %72 = vector.extract_strided_slice %13 {offsets = [12, 0], sizes = [122, 96], strides = [1, 1]} : vector<168x96xbf16> to vector<122x96xbf16>
    %c2_48 = arith.constant 2 : index
    %c0_49 = arith.constant 0 : index
    %c0_50 = arith.constant 0 : index
    %73 = vector.load %arg8[%c2_48, %c0_49, %c0_50] : memref<9x96x32xbf16, #tpu.memory_space<vmem>>, vector<1x96x32xbf16>
    %74 = vector.shape_cast %73 : vector<1x96x32xbf16> to vector<96x32xbf16>
    %cst_51 = arith.constant dense<0.000000e+00> : vector<122x32xf32>
    %75 = tpu.matmul %72, %74, %cst_51 {dimension_numbers = #tpu.dot_dimension_numbers<[1], [0], [0], [1], [0, 0, 1, 1], [], []>} : vector<122x96xbf16>, vector<96x32xbf16>, vector<122x32xf32> -> vector<122x32xf32>
    %76 = arith.addf %71, %75 : vector<122x32xf32>
    %77 = vector.extract_strided_slice %13 {offsets = [22, 0], sizes = [122, 96], strides = [1, 1]} : vector<168x96xbf16> to vector<122x96xbf16>
    %c3_52 = arith.constant 3 : index
    %c0_53 = arith.constant 0 : index
    %c0_54 = arith.constant 0 : index
    %78 = vector.load %arg8[%c3_52, %c0_53, %c0_54] : memref<9x96x32xbf16, #tpu.memory_space<vmem>>, vector<1x96x32xbf16>
    %79 = vector.shape_cast %78 : vector<1x96x32xbf16> to vector<96x32xbf16>
    %cst_55 = arith.constant dense<0.000000e+00> : vector<122x32xf32>
    %80 = tpu.matmul %77, %79, %cst_55 {dimension_numbers = #tpu.dot_dimension_numbers<[1], [0], [0], [1], [0, 0, 1, 1], [], []>} : vector<122x96xbf16>, vector<96x32xbf16>, vector<122x32xf32> -> vector<122x32xf32>
    %81 = arith.addf %76, %80 : vector<122x32xf32>
    %82 = vector.extract_strided_slice %13 {offsets = [23, 0], sizes = [122, 96], strides = [1, 1]} : vector<168x96xbf16> to vector<122x96xbf16>
    %c4_56 = arith.constant 4 : index
    %c0_57 = arith.constant 0 : index
    %c0_58 = arith.constant 0 : index
    %83 = vector.load %arg8[%c4_56, %c0_57, %c0_58] : memref<9x96x32xbf16, #tpu.memory_space<vmem>>, vector<1x96x32xbf16>
    %84 = vector.shape_cast %83 : vector<1x96x32xbf16> to vector<96x32xbf16>
    %cst_59 = arith.constant dense<0.000000e+00> : vector<122x32xf32>
    %85 = tpu.matmul %82, %84, %cst_59 {dimension_numbers = #tpu.dot_dimension_numbers<[1], [0], [0], [1], [0, 0, 1, 1], [], []>} : vector<122x96xbf16>, vector<96x32xbf16>, vector<122x32xf32> -> vector<122x32xf32>
    %86 = arith.addf %81, %85 : vector<122x32xf32>
    %87 = vector.extract_strided_slice %13 {offsets = [24, 0], sizes = [122, 96], strides = [1, 1]} : vector<168x96xbf16> to vector<122x96xbf16>
    %c5_60 = arith.constant 5 : index
    %c0_61 = arith.constant 0 : index
    %c0_62 = arith.constant 0 : index
    %88 = vector.load %arg8[%c5_60, %c0_61, %c0_62] : memref<9x96x32xbf16, #tpu.memory_space<vmem>>, vector<1x96x32xbf16>
    %89 = vector.shape_cast %88 : vector<1x96x32xbf16> to vector<96x32xbf16>
    %cst_63 = arith.constant dense<0.000000e+00> : vector<122x32xf32>
    %90 = tpu.matmul %87, %89, %cst_63 {dimension_numbers = #tpu.dot_dimension_numbers<[1], [0], [0], [1], [0, 0, 1, 1], [], []>} : vector<122x96xbf16>, vector<96x32xbf16>, vector<122x32xf32> -> vector<122x32xf32>
    %91 = arith.addf %86, %90 : vector<122x32xf32>
    %92 = vector.extract_strided_slice %13 {offsets = [34, 0], sizes = [122, 96], strides = [1, 1]} : vector<168x96xbf16> to vector<122x96xbf16>
    %c6_64 = arith.constant 6 : index
    %c0_65 = arith.constant 0 : index
    %c0_66 = arith.constant 0 : index
    %93 = vector.load %arg8[%c6_64, %c0_65, %c0_66] : memref<9x96x32xbf16, #tpu.memory_space<vmem>>, vector<1x96x32xbf16>
    %94 = vector.shape_cast %93 : vector<1x96x32xbf16> to vector<96x32xbf16>
    %cst_67 = arith.constant dense<0.000000e+00> : vector<122x32xf32>
    %95 = tpu.matmul %92, %94, %cst_67 {dimension_numbers = #tpu.dot_dimension_numbers<[1], [0], [0], [1], [0, 0, 1, 1], [], []>} : vector<122x96xbf16>, vector<96x32xbf16>, vector<122x32xf32> -> vector<122x32xf32>
    %96 = arith.addf %91, %95 : vector<122x32xf32>
    %97 = vector.extract_strided_slice %13 {offsets = [35, 0], sizes = [122, 96], strides = [1, 1]} : vector<168x96xbf16> to vector<122x96xbf16>
    %c7_68 = arith.constant 7 : index
    %c0_69 = arith.constant 0 : index
    %c0_70 = arith.constant 0 : index
    %98 = vector.load %arg8[%c7_68, %c0_69, %c0_70] : memref<9x96x32xbf16, #tpu.memory_space<vmem>>, vector<1x96x32xbf16>
    %99 = vector.shape_cast %98 : vector<1x96x32xbf16> to vector<96x32xbf16>
    %cst_71 = arith.constant dense<0.000000e+00> : vector<122x32xf32>
    %100 = tpu.matmul %97, %99, %cst_71 {dimension_numbers = #tpu.dot_dimension_numbers<[1], [0], [0], [1], [0, 0, 1, 1], [], []>} : vector<122x96xbf16>, vector<96x32xbf16>, vector<122x32xf32> -> vector<122x32xf32>
    %101 = arith.addf %96, %100 : vector<122x32xf32>
    %102 = vector.extract_strided_slice %13 {offsets = [36, 0], sizes = [122, 96], strides = [1, 1]} : vector<168x96xbf16> to vector<122x96xbf16>
    %c8_72 = arith.constant 8 : index
    %c0_73 = arith.constant 0 : index
    %c0_74 = arith.constant 0 : index
    %103 = vector.load %arg8[%c8_72, %c0_73, %c0_74] : memref<9x96x32xbf16, #tpu.memory_space<vmem>>, vector<1x96x32xbf16>
    %104 = vector.shape_cast %103 : vector<1x96x32xbf16> to vector<96x32xbf16>
    %cst_75 = arith.constant dense<0.000000e+00> : vector<122x32xf32>
    %105 = tpu.matmul %102, %104, %cst_75 {dimension_numbers = #tpu.dot_dimension_numbers<[1], [0], [0], [1], [0, 0, 1, 1], [], []>} : vector<122x96xbf16>, vector<96x32xbf16>, vector<122x32xf32> -> vector<122x32xf32>
    %106 = arith.addf %101, %105 : vector<122x32xf32>
    %c0_76 = arith.constant 0 : index
    %c0_77 = arith.constant 0 : index
    %107 = vector.load %arg9[%c0_76, %c0_77] : memref<1x32xf32, #tpu.memory_space<vmem>>, vector<1x32xf32>
    %108 = vector.broadcast %107 : vector<1x32xf32> to vector<122x32xf32>
    %109 = arith.addf %106, %108 : vector<122x32xf32>
    %cst_78 = arith.constant 0.000000e+00 : f32
    %110 = vector.broadcast %cst_78 : f32 to vector<122x32xf32>
    %111 = arith.maximumf %109, %110 : vector<122x32xf32>
    %112 = vector.extract_strided_slice %2 {offsets = [23, 0], sizes = [122, 1], strides = [1, 1]} : vector<168x1xf32> to vector<122x1xf32>
    %113 = vector.broadcast %112 : vector<122x1xf32> to vector<122x32xf32>
    %114 = arith.mulf %111, %113 : vector<122x32xf32>
    %115 = arith.truncf %114 : vector<122x32xf32> to vector<122x32xbf16>
    %116 = vector.extract_strided_slice %115 {offsets = [0, 0], sizes = [96, 32], strides = [1, 1]} : vector<122x32xbf16> to vector<96x32xbf16>
    %c0_79 = arith.constant 0 : index
    %c0_80 = arith.constant 0 : index
    %c0_81 = arith.constant 0 : index
    %117 = vector.load %arg10[%c0_79, %c0_80, %c0_81] : memref<9x32x96xbf16, #tpu.memory_space<vmem>>, vector<1x32x96xbf16>
    %118 = vector.shape_cast %117 : vector<1x32x96xbf16> to vector<32x96xbf16>
    %cst_82 = arith.constant dense<0.000000e+00> : vector<96x96xf32>
    %119 = tpu.matmul %116, %118, %cst_82 {dimension_numbers = #tpu.dot_dimension_numbers<[1], [0], [0], [1], [0, 0, 1, 1], [], []>} : vector<96x32xbf16>, vector<32x96xbf16>, vector<96x96xf32> -> vector<96x96xf32>
    %120 = vector.extract_strided_slice %115 {offsets = [1, 0], sizes = [96, 32], strides = [1, 1]} : vector<122x32xbf16> to vector<96x32xbf16>
    %c1_83 = arith.constant 1 : index
    %c0_84 = arith.constant 0 : index
    %c0_85 = arith.constant 0 : index
    %121 = vector.load %arg10[%c1_83, %c0_84, %c0_85] : memref<9x32x96xbf16, #tpu.memory_space<vmem>>, vector<1x32x96xbf16>
    %122 = vector.shape_cast %121 : vector<1x32x96xbf16> to vector<32x96xbf16>
    %cst_86 = arith.constant dense<0.000000e+00> : vector<96x96xf32>
    %123 = tpu.matmul %120, %122, %cst_86 {dimension_numbers = #tpu.dot_dimension_numbers<[1], [0], [0], [1], [0, 0, 1, 1], [], []>} : vector<96x32xbf16>, vector<32x96xbf16>, vector<96x96xf32> -> vector<96x96xf32>
    %124 = arith.addf %119, %123 : vector<96x96xf32>
    %125 = vector.extract_strided_slice %115 {offsets = [2, 0], sizes = [96, 32], strides = [1, 1]} : vector<122x32xbf16> to vector<96x32xbf16>
    %c2_87 = arith.constant 2 : index
    %c0_88 = arith.constant 0 : index
    %c0_89 = arith.constant 0 : index
    %126 = vector.load %arg10[%c2_87, %c0_88, %c0_89] : memref<9x32x96xbf16, #tpu.memory_space<vmem>>, vector<1x32x96xbf16>
    %127 = vector.shape_cast %126 : vector<1x32x96xbf16> to vector<32x96xbf16>
    %cst_90 = arith.constant dense<0.000000e+00> : vector<96x96xf32>
    %128 = tpu.matmul %125, %127, %cst_90 {dimension_numbers = #tpu.dot_dimension_numbers<[1], [0], [0], [1], [0, 0, 1, 1], [], []>} : vector<96x32xbf16>, vector<32x96xbf16>, vector<96x96xf32> -> vector<96x96xf32>
    %129 = arith.addf %124, %128 : vector<96x96xf32>
    %130 = vector.extract_strided_slice %115 {offsets = [12, 0], sizes = [96, 32], strides = [1, 1]} : vector<122x32xbf16> to vector<96x32xbf16>
    %c3_91 = arith.constant 3 : index
    %c0_92 = arith.constant 0 : index
    %c0_93 = arith.constant 0 : index
    %131 = vector.load %arg10[%c3_91, %c0_92, %c0_93] : memref<9x32x96xbf16, #tpu.memory_space<vmem>>, vector<1x32x96xbf16>
    %132 = vector.shape_cast %131 : vector<1x32x96xbf16> to vector<32x96xbf16>
    %cst_94 = arith.constant dense<0.000000e+00> : vector<96x96xf32>
    %133 = tpu.matmul %130, %132, %cst_94 {dimension_numbers = #tpu.dot_dimension_numbers<[1], [0], [0], [1], [0, 0, 1, 1], [], []>} : vector<96x32xbf16>, vector<32x96xbf16>, vector<96x96xf32> -> vector<96x96xf32>
    %134 = arith.addf %129, %133 : vector<96x96xf32>
    %135 = vector.extract_strided_slice %115 {offsets = [13, 0], sizes = [96, 32], strides = [1, 1]} : vector<122x32xbf16> to vector<96x32xbf16>
    %c4_95 = arith.constant 4 : index
    %c0_96 = arith.constant 0 : index
    %c0_97 = arith.constant 0 : index
    %136 = vector.load %arg10[%c4_95, %c0_96, %c0_97] : memref<9x32x96xbf16, #tpu.memory_space<vmem>>, vector<1x32x96xbf16>
    %137 = vector.shape_cast %136 : vector<1x32x96xbf16> to vector<32x96xbf16>
    %cst_98 = arith.constant dense<0.000000e+00> : vector<96x96xf32>
    %138 = tpu.matmul %135, %137, %cst_98 {dimension_numbers = #tpu.dot_dimension_numbers<[1], [0], [0], [1], [0, 0, 1, 1], [], []>} : vector<96x32xbf16>, vector<32x96xbf16>, vector<96x96xf32> -> vector<96x96xf32>
    %139 = arith.addf %134, %138 : vector<96x96xf32>
    %140 = vector.extract_strided_slice %115 {offsets = [14, 0], sizes = [96, 32], strides = [1, 1]} : vector<122x32xbf16> to vector<96x32xbf16>
    %c5_99 = arith.constant 5 : index
    %c0_100 = arith.constant 0 : index
    %c0_101 = arith.constant 0 : index
    %141 = vector.load %arg10[%c5_99, %c0_100, %c0_101] : memref<9x32x96xbf16, #tpu.memory_space<vmem>>, vector<1x32x96xbf16>
    %142 = vector.shape_cast %141 : vector<1x32x96xbf16> to vector<32x96xbf16>
    %cst_102 = arith.constant dense<0.000000e+00> : vector<96x96xf32>
    %143 = tpu.matmul %140, %142, %cst_102 {dimension_numbers = #tpu.dot_dimension_numbers<[1], [0], [0], [1], [0, 0, 1, 1], [], []>} : vector<96x32xbf16>, vector<32x96xbf16>, vector<96x96xf32> -> vector<96x96xf32>
    %144 = arith.addf %139, %143 : vector<96x96xf32>
    %145 = vector.extract_strided_slice %115 {offsets = [24, 0], sizes = [96, 32], strides = [1, 1]} : vector<122x32xbf16> to vector<96x32xbf16>
    %c6_103 = arith.constant 6 : index
    %c0_104 = arith.constant 0 : index
    %c0_105 = arith.constant 0 : index
    %146 = vector.load %arg10[%c6_103, %c0_104, %c0_105] : memref<9x32x96xbf16, #tpu.memory_space<vmem>>, vector<1x32x96xbf16>
    %147 = vector.shape_cast %146 : vector<1x32x96xbf16> to vector<32x96xbf16>
    %cst_106 = arith.constant dense<0.000000e+00> : vector<96x96xf32>
    %148 = tpu.matmul %145, %147, %cst_106 {dimension_numbers = #tpu.dot_dimension_numbers<[1], [0], [0], [1], [0, 0, 1, 1], [], []>} : vector<96x32xbf16>, vector<32x96xbf16>, vector<96x96xf32> -> vector<96x96xf32>
    %149 = arith.addf %144, %148 : vector<96x96xf32>
    %150 = vector.extract_strided_slice %115 {offsets = [25, 0], sizes = [96, 32], strides = [1, 1]} : vector<122x32xbf16> to vector<96x32xbf16>
    %c7_107 = arith.constant 7 : index
    %c0_108 = arith.constant 0 : index
    %c0_109 = arith.constant 0 : index
    %151 = vector.load %arg10[%c7_107, %c0_108, %c0_109] : memref<9x32x96xbf16, #tpu.memory_space<vmem>>, vector<1x32x96xbf16>
    %152 = vector.shape_cast %151 : vector<1x32x96xbf16> to vector<32x96xbf16>
    %cst_110 = arith.constant dense<0.000000e+00> : vector<96x96xf32>
    %153 = tpu.matmul %150, %152, %cst_110 {dimension_numbers = #tpu.dot_dimension_numbers<[1], [0], [0], [1], [0, 0, 1, 1], [], []>} : vector<96x32xbf16>, vector<32x96xbf16>, vector<96x96xf32> -> vector<96x96xf32>
    %154 = arith.addf %149, %153 : vector<96x96xf32>
    %155 = vector.extract_strided_slice %115 {offsets = [26, 0], sizes = [96, 32], strides = [1, 1]} : vector<122x32xbf16> to vector<96x32xbf16>
    %c8_111 = arith.constant 8 : index
    %c0_112 = arith.constant 0 : index
    %c0_113 = arith.constant 0 : index
    %156 = vector.load %arg10[%c8_111, %c0_112, %c0_113] : memref<9x32x96xbf16, #tpu.memory_space<vmem>>, vector<1x32x96xbf16>
    %157 = vector.shape_cast %156 : vector<1x32x96xbf16> to vector<32x96xbf16>
    %cst_114 = arith.constant dense<0.000000e+00> : vector<96x96xf32>
    %158 = tpu.matmul %155, %157, %cst_114 {dimension_numbers = #tpu.dot_dimension_numbers<[1], [0], [0], [1], [0, 0, 1, 1], [], []>} : vector<96x32xbf16>, vector<32x96xbf16>, vector<96x96xf32> -> vector<96x96xf32>
    %159 = arith.addf %154, %158 : vector<96x96xf32>
    %c0_115 = arith.constant 0 : index
    %c0_116 = arith.constant 0 : index
    %160 = vector.load %arg11[%c0_115, %c0_116] : memref<1x96xf32, #tpu.memory_space<vmem>>, vector<1x96xf32>
    %161 = vector.broadcast %160 : vector<1x96xf32> to vector<96x96xf32>
    %162 = arith.addf %159, %161 : vector<96x96xf32>
    %cst_117 = arith.constant 0.000000e+00 : f32
    %163 = vector.broadcast %cst_117 : f32 to vector<96x96xf32>
    %164 = arith.maximumf %162, %163 : vector<96x96xf32>
    %165 = vector.extract_strided_slice %12 {offsets = [36, 0], sizes = [96, 96], strides = [1, 1]} : vector<168x96xf32> to vector<96x96xf32>
    %c0_118 = arith.constant 0 : index
    %c0_119 = arith.constant 0 : index
    %166 = vector.load %arg3[%c0_118, %c0_119] : memref<1x96xf32, #tpu.memory_space<vmem>>, vector<1x96xf32>
    %167 = vector.broadcast %166 : vector<1x96xf32> to vector<96x96xf32>
    %168 = arith.mulf %165, %167 : vector<96x96xf32>
    %169 = arith.addf %168, %62 : vector<96x96xf32>
    %170 = arith.addf %169, %164 : vector<96x96xf32>
    %171 = arith.truncf %170 : vector<96x96xf32> to vector<96x96xbf16>
    %c0_120 = arith.constant 0 : index
    %c0_121 = arith.constant 0 : index
    %172 = vector.load %arg12[%c0_120, %c0_121] : memref<96x256xbf16, #tpu.memory_space<vmem>>, vector<96x256xbf16>
    %cst_122 = arith.constant dense<0.000000e+00> : vector<96x256xf32>
    %173 = tpu.matmul %171, %172, %cst_122 {dimension_numbers = #tpu.dot_dimension_numbers<[1], [0], [0], [1], [0, 0, 1, 1], [], []>} : vector<96x96xbf16>, vector<96x256xbf16>, vector<96x256xf32> -> vector<96x256xf32>
    %c0_123 = arith.constant 0 : index
    %c0_124 = arith.constant 0 : index
    %174 = vector.load %arg13[%c0_123, %c0_124] : memref<1x256xf32, #tpu.memory_space<vmem>>, vector<1x256xf32>
    %175 = vector.broadcast %174 : vector<1x256xf32> to vector<96x256xf32>
    %176 = arith.addf %173, %175 : vector<96x256xf32>
    %177 = vector.extract_strided_slice %1 {offsets = [36, 0], sizes = [96, 256], strides = [1, 1]} : vector<168x256xf32> to vector<96x256xf32>
    %178 = arith.addf %176, %177 : vector<96x256xf32>
    %cst_125 = arith.constant 0.000000e+00 : f32
    %179 = vector.broadcast %cst_125 : f32 to vector<96x256xf32>
    %180 = arith.maximumf %178, %179 : vector<96x256xf32>
    %c0_126 = arith.constant 0 : index
    %c0_127 = arith.constant 0 : index
    %c0_128 = arith.constant 0 : index
    %181 = vector.load %arg14[%c0_126, %c0_127, %c0_128] : memref<1x96x256xf32, #tpu.memory_space<vmem>>, vector<1x96x256xf32>
    %182 = vector.shape_cast %181 : vector<1x96x256xf32> to vector<96x256xf32>
    %183 = vector.shape_cast %180 : vector<96x256xf32> to vector<1x96x256xf32>
    tpu.vector_store %arg14[%c0_126, %c0_127, %c0_128], %183 {strides = array<i32>} : memref<1x96x256xf32, #tpu.memory_space<vmem>>, vector<1x96x256xf32>,
    return
  }
  func.func @transform_0(%arg0: i32) -> (i32, i32, i32) {
    %c0_i32 = arith.constant 0 : i32
    %c0_i32_0 = arith.constant 0 : i32
    %c0_i32_1 = arith.constant 0 : i32
    return %arg0, %c0_i32, %c0_i32_0 : i32, i32, i32
  }
  func.func @transform_1(%arg0: i32) -> (i32, i32) {
    %c0_i32 = arith.constant 0 : i32
    %c0_i32_0 = arith.constant 0 : i32
    %c0_i32_1 = arith.constant 0 : i32
    return %c0_i32, %c0_i32_0 : i32, i32
  }
  func.func @transform_2(%arg0: i32) -> (i32, i32) {
    %c0_i32 = arith.constant 0 : i32
    %c0_i32_0 = arith.constant 0 : i32
    %c0_i32_1 = arith.constant 0 : i32
    return %c0_i32, %c0_i32_0 : i32, i32
  }
  func.func @transform_3(%arg0: i32) -> (i32, i32) {
    %c0_i32 = arith.constant 0 : i32
    %c0_i32_0 = arith.constant 0 : i32
    %c0_i32_1 = arith.constant 0 : i32
    return %c0_i32, %c0_i32_0 : i32, i32
  }
  func.func @transform_4(%arg0: i32) -> (i32, i32) {
    %c0_i32 = arith.constant 0 : i32
    %c0_i32_0 = arith.constant 0 : i32
    %c0_i32_1 = arith.constant 0 : i32
    return %c0_i32, %c0_i32_0 : i32, i32
  }
  func.func @transform_5(%arg0: i32) -> (i32, i32, i32) {
    %c0_i32 = arith.constant 0 : i32
    %c0_i32_0 = arith.constant 0 : i32
    %c0_i32_1 = arith.constant 0 : i32
    %c0_i32_2 = arith.constant 0 : i32
    return %c0_i32, %c0_i32_0, %c0_i32_1 : i32, i32, i32
  }
  func.func @transform_6(%arg0: i32) -> (i32, i32) {
    %c0_i32 = arith.constant 0 : i32
    %c0_i32_0 = arith.constant 0 : i32
    %c0_i32_1 = arith.constant 0 : i32
    return %c0_i32, %c0_i32_0 : i32, i32
  }
  func.func @transform_7(%arg0: i32) -> (i32, i32, i32) {
    %c0_i32 = arith.constant 0 : i32
    %c0_i32_0 = arith.constant 0 : i32
    %c0_i32_1 = arith.constant 0 : i32
    %c0_i32_2 = arith.constant 0 : i32
    return %c0_i32, %c0_i32_0, %c0_i32_1 : i32, i32, i32
  }
  func.func @transform_8(%arg0: i32) -> (i32, i32) {
    %c0_i32 = arith.constant 0 : i32
    %c0_i32_0 = arith.constant 0 : i32
    %c0_i32_1 = arith.constant 0 : i32
    return %c0_i32, %c0_i32_0 : i32, i32
  }
  func.func @transform_9(%arg0: i32) -> (i32, i32, i32) {
    %c0_i32 = arith.constant 0 : i32
    %c0_i32_0 = arith.constant 0 : i32
    %c0_i32_1 = arith.constant 0 : i32
    %c0_i32_2 = arith.constant 0 : i32
    return %c0_i32, %c0_i32_0, %c0_i32_1 : i32, i32, i32
  }
  func.func @transform_10(%arg0: i32) -> (i32, i32) {
    %c0_i32 = arith.constant 0 : i32
    %c0_i32_0 = arith.constant 0 : i32
    %c0_i32_1 = arith.constant 0 : i32
    return %c0_i32, %c0_i32_0 : i32, i32
  }
  func.func @transform_11(%arg0: i32) -> (i32, i32) {
    %c0_i32 = arith.constant 0 : i32
    %c0_i32_0 = arith.constant 0 : i32
    %c0_i32_1 = arith.constant 0 : i32
    return %c0_i32, %c0_i32_0 : i32, i32
  }
  func.func @transform_12(%arg0: i32) -> (i32, i32) {
    %c0_i32 = arith.constant 0 : i32
    %c0_i32_0 = arith.constant 0 : i32
    %c0_i32_1 = arith.constant 0 : i32
    return %c0_i32, %c0_i32_0 : i32, i32
  }
  func.func @transform_13(%arg0: i32) -> (i32, i32, i32) {
    %c0_i32 = arith.constant 0 : i32
    %c0_i32_0 = arith.constant 0 : i32
    %c0_i32_1 = arith.constant 0 : i32
    return %arg0, %c0_i32, %c0_i32_0 : i32, i32, i32
  }
}

</mosaic_0001>

<bundles_post_ra>
// kernel: block35_down.1
= control target key start
LH: loop header
LB: loop body
LE: loop exit
PB: predicated region body
PF: predicated region fallthrough
CT: control target
= control target key end

     0   :  { %s6601_s25 = smov 0   ;;  %s9152_s0 = inlined_call_operand.vmem [shape: f32[2,168,256], index: 0, kind: input, shape index: {}]   ;;  %s9153_s1 = inlined_call_operand.vmem [shape: f32[168,1], index: 1, kind: input, shape index: {}]   ;;  %s9154_s2 = inlined_call_operand.vmem [shape: f32[1,96], index: 2, kind: input, shape index: {}]   ;;  %s9155_s3 = inlined_call_operand.vmem [shape: bf16[256,96], index: 3, kind: input, shape index: {}]   ;;  %s9156_s4 = inlined_call_operand.vmem [shape: f32[1,96], index: 4, kind: input, shape index: {}]   ;;  %s9157_s5 = inlined_call_operand.vmem [shape: bf16[9,96,96], index: 5, kind: input, shape index: {}]   ;;  %s9158_s6 = inlined_call_operand.vmem [shape: f32[1,96], index: 6, kind: input, shape index: {}]   ;;  %s9159_s7 = inlined_call_operand.vmem [shape: bf16[9,96,32], index: 7, kind: input, shape index: {}]   ;;  %s9160_s8 = inlined_call_operand.vmem [shape: f32[1,32], index: 8, kind: input, shape index: {}]   ;;  %s9161_s9 = inlined_call_operand.vmem [shape: bf16[9,32,96], index: 9, kind: input, shape index: {}]   ;;  %s9162_s10 = inlined_call_operand.vmem [shape: f32[1,96], index: 10, kind: input, shape index: {}]   ;;  %s9163_s11 = inlined_call_operand.vmem [shape: bf16[96,256], index: 11, kind: input, shape index: {}]   ;;  %s9164_s12 = inlined_call_operand.vmem [shape: f32[1,256], index: 12, kind: input, shape index: {}]   ;;  %s9165_s13 = inlined_call_operand.vmem [shape: f32[2,96,256], index: 13, kind: output, shape index: {}]  }
   0x1 LB: > { %s5269_s26 = sadd.s32 4294967295, %s6528_s25   ;;  %p5273_p0 = scmp.ge.s32.totalorder %s6528_s25, 1  ;;  %s6528_s25 = sphi %s6601_s25, %s23_s25  }
   0x2   : > { %p387_p1 = scmp.lt.s32.totalorder %s6528_s25, 3 }
   0x4   : > { %p388_p2 = pnand %p5273_p0, %p387_p1 }
   0x6   : > { %391 = sbr.rel (%p388_p2) target bundleno = 1434 (0x59a), region = 72 }
   0xb   : > { %v6317_v0 = vld [vmem:[%s9155_s3 + $0x38] sm:$0xff]  ;;  %v6530_v2 = vmov 0   ;;  %v6316_v3 = vld [vmem:[%s9155_s3 + $0x30] sm:$0xff]  ;;  %v6315_v6 = vld [vmem:[%s9155_s3 + $0x28] sm:$0xff]  ;;  %p431_p3 = scmp.lt.s32.totalorder %s5269_s26, 1  ;;  %vm3612_vm0 = vcmask 1040384  }
   0xc   : > { %v6325_v1 = vld [vmem:[%s9155_s3 + $0x78] sm:$0xff]  ;;  %6487 = vset.pattern.permute.xlu0 %v6530_v2  ;;  %6488 = vset.pattern.permute.xlu1 %v6530_v2  ;;  %v6324_v4 = vld [vmem:[%s9155_s3 + $0x70] sm:$0xff]  ;;  %v6323_v7 = vld [vmem:[%s9155_s3 + $0x68] sm:$0xff]  ;;  %vm1022_vm1 = vcmask 785408   ;;  %vm2763_vm2 = vcmask 1044480   ;;  %vm1586_vm4 = vcmask 1045504  }
   0xd   : > { %657 = vmatpush.bf16.msra.mxu0 %v6317_v0  ;;  %718 = vmatpush.bf16.msra.mxu1 %v6325_v1  ;;  %v486_v5 = vld [vmem:[%s9153_s1 + $0x18] sm:$0xff]  ;;  %v485_v8 = vld [vmem:[%s9153_s1 + $0x10] sm:$0xff]  ;;  %v6314_v9 = vld [vmem:[%s9155_s3 + $0x20] sm:$0xff]  ;;  %s9456_s26 = smov (!%p431_p3, %s5269_s26), 1  ;;  %vm1089_vm3 = vsmask.f32 4352 }
   0xe   : > { %6489 = vset.pattern.permute.xlu2 %v6530_v2  ;;  %810 = vperm.xlu0 %6487, %v486_v5   ;;  %v487_v10 = vld [vmem:[%s9153_s1 + $0x20] sm:$0xff]  ;;  %v6313_v12 = vld [vmem:[%s9155_s3 + $0x18] sm:$0xff]  ;;  %v488_v15 = vld [vmem:[%s9153_s1 + $0x28] sm:$0xff]  ;;  %s6476_s14 = smul.u32 336, %s9456_s26  ;;  %vm1718_vm5 = vsmask.f32 5376 }
   0xf   : > { %805 = vperm.xlu1 %6488, %v485_v8   ;;  %v6322_v11 = vld [vmem:[%s9155_s3 + $0x60] sm:$0xff]  ;;  %v6321_v13 = vld [vmem:[%s9155_s3 + $0x58] sm:$0xff]  ;;  %v6312_v16 = vld [vmem:[%s9155_s3 + $0x10] sm:$0xff]  ;;  %vm1430_vm6 = vsmask.f32 6400  ;;  %vm2472_vm8 = vcmask 1046528  }
  0x10   : > { %v491_v14 = vld [vmem:[%s9153_s1 + $0x40] sm:$0xff]  ;;  %v6320_v17 = vld [vmem:[%s9155_s3 + $0x50] sm:$0xff]  ;;  %v6311_v18 = vld [vmem:[%s9155_s3 + $0x8] sm:$0xff]  ;;  %s6676_s21 = scalar_lea.vmem %s9152_s0, %s6476_s14  ;;  %vm1261_vm7 = vsmask.f32 7424  ;;  %vm4730_vm9 = vcmask 1043456  }
  0x11   : > { %658 = vmatpush.bf16.msra.mxu0 %v6316_v3  ;;  %719 = vmatpush.bf16.msra.mxu1 %v6324_v4  ;;  %v6319_v19 = vld [vmem:[%s9155_s3 + $0x48] sm:$0xff]  ;;  %v6310_v20 = vld [vmem:[%s9155_s3] sm:$0xff]  ;;  %v494_v24 = vld [vmem:[%s9153_s1 + $0x58] sm:$0xff]  ;;  %vm3800_vm10 = vcmask 261120   ;;  %s6477_s17 = smul.u32 192, %s9456_s26 }
  0x12   : > { %v492_v21 = vld [vmem:[%s9153_s1 + $0x48] sm:$0xff]  ;;  %v6318_v22 = vld [vmem:[%s9155_s3 + $0x40] sm:$0xff]  ;;  %v444_v25 = vld [vmem:[%s6676_s21 + $0x10] sm:$0xff] }
  0x13   : > { %v442_v23 = vld [vmem:[%s6676_s21] sm:$0xff]  ;;  %v443_v26 = vld [vmem:[%s6676_s21 + $0x8] sm:$0xff]  ;;  %v445_v27 = vld [vmem:[%s6676_s21 + $0x18] sm:$0xff]  ;;  %s9061_s20 = scalar_lea.vmem %s9165_s13, %s6477_s17 }
  0x14   : > { %v503_v28 = vpack.c.bf16 %v444_v25, %v442_v23  ;;  %v504_v29 = vpack.c.bf16 %v445_v27, %v443_v26  ;;  %v497_v30 = vld [vmem:[%s9153_s1 + $0x70] sm:$0xff]  ;;  %v495_v31 = vld [vmem:[%s9153_s1 + $0x60] sm:$0xff]  ;;  %v490_v33 = vld [vmem:[%s9153_s1 + $0x38] sm:$0xff] }
  0x15   : > { %659 = vmatpush.bf16.msra.mxu0 %v6315_v6  ;;  %720 = vmatpush.bf16.msra.mxu1 %v6323_v7  ;;  %v489_v32 = vld [vmem:[%s9153_s1 + $0x30] sm:$0xff]  ;;  %v498_v34 = vld [vmem:[%s9153_s1 + $0x78] sm:$0xff]  ;;  %v446_v35 = vld [vmem:[%s6676_s21 + $0x20] sm:$0xff] }
  0x16   : > { %815 = vperm.xlu0 %6487, %v487_v10   ;;  %825 = vperm.xlu2 %6489, %v489_v32   ;;  %v484_v36 = vld [vmem:[%s9153_s1 + $0x8] sm:$0xff]  ;;  %v448_v37 = vld [vmem:[%s6676_s21 + $0x30] sm:$0xff]  ;;  %v449_v39 = vld [vmem:[%s6676_s21 + $0x38] sm:$0xff] }
  0x17   : > { %820 = vperm.xlu1 %6488, %v488_v15   ;;  %v447_v38 = vld [vmem:[%s6676_s21 + $0x28] sm:$0xff]  ;;  %v505_v40 = vpack.c.bf16 %v448_v37, %v446_v35  ;;  %v502_v42 = vld [vmem:[%s9153_s1 + $0x98] sm:$0xff]  ;;  %v493_v43 = vld [vmem:[%s9153_s1 + $0x50] sm:$0xff] }
  0x18   : > { %v506_v41 = vpack.c.bf16 %v449_v39, %v447_v38  ;;  %v500_v44 = vld [vmem:[%s9153_s1 + $0x88] sm:$0xff]  ;;  %v450_v46 = vld [vmem:[%s6676_s21 + $0x40] sm:$0xff]  ;;  %v452_v47 = vld [vmem:[%s6676_s21 + $0x50] sm:$0xff] }
  0x19   : > { %660 = vmatpush.bf16.msra.mxu0 %v6314_v9  ;;  %721 = vmatpush.bf16.msra.mxu1 %v6322_v11  ;;  %v496_v45 = vld [vmem:[%s9153_s1 + $0x68] sm:$0xff]  ;;  %v453_v49 = vld [vmem:[%s6676_s21 + $0x58] sm:$0xff]  ;;  %v507_v50 = vpack.c.bf16 %v452_v47, %v450_v46  ;;  %v499_v52 = vld [vmem:[%s9153_s1 + $0x80] sm:$0xff] }
  0x1a   : > { %v451_v48 = vld [vmem:[%s6676_s21 + $0x48] sm:$0xff]  ;;  %v501_v53 = vld [vmem:[%s9153_s1 + $0x90] sm:$0xff]  ;;  %v454_v54 = vld [vmem:[%s6676_s21 + $0x60] sm:$0xff] }
  0x1b   : > { %v508_v51 = vpack.c.bf16 %v453_v49, %v451_v48  ;;  %v456_v55 = vld [vmem:[%s6676_s21 + $0x70] sm:$0xff]  ;;  %v455_v56 = vld [vmem:[%s6676_s21 + $0x68] sm:$0xff]  ;;  %v457_v57 = vld [vmem:[%s6676_s21 + $0x78] sm:$0xff] }
  0x1c   : > { %v509_v58 = vpack.c.bf16 %v456_v55, %v454_v54  ;;  %v510_v59 = vpack.c.bf16 %v457_v57, %v455_v56  ;;  %v458_v60 = vld [vmem:[%s6676_s21 + $0x80] sm:$0xff]  ;;  %v460_v61 = vld [vmem:[%s6676_s21 + $0x90] sm:$0xff]  ;;  %v459_v62 = vld [vmem:[%s6676_s21 + $0x88] sm:$0xff] }
  0x1d   : > { %661 = vmatpush.bf16.msra.mxu0 %v6313_v12  ;;  %722 = vmatpush.bf16.msra.mxu1 %v6321_v13  ;;  %v461_v63 = vld [vmem:[%s6676_s21 + $0x98] sm:$0xff]  ;;  %v511_v0 = vpack.c.bf16 %v460_v61, %v458_v60  ;;  %v462_v3 = vld [vmem:[%s6676_s21 + $0xa0] sm:$0xff]  ;;  %v464_v4 = vld [vmem:[%s6676_s21 + $0xb0] sm:$0xff] }
  0x1e   : > { %835 = vperm.xlu0 %6487, %v491_v14   ;;  %830 = vperm.xlu2 %6489, %v490_v33   ;;  %v512_v1 = vpack.c.bf16 %v461_v63, %v459_v62  ;;  %v6361_v2 = vld [vmem:[%s9157_s5 + $0x118] sm:$0xff]  ;;  %v463_v5 = vld [vmem:[%s6676_s21 + $0xa8] sm:$0xff]  ;;  %v513_v7 = vpack.c.bf16 %v464_v4, %v462_v3  ;;  %v466_v9 = vld [vmem:[%s6676_s21 + $0xc0] sm:$0xff] }
  0x1f   : > { %840 = vperm.xlu1 %6488, %v492_v21   ;;  %v465_v6 = vld [vmem:[%s6676_s21 + $0xb8] sm:$0xff]  ;;  %v468_v10 = vld [vmem:[%s6676_s21 + $0xd0] sm:$0xff]  ;;  %v467_v11 = vld [vmem:[%s6676_s21 + $0xc8] sm:$0xff] }
  0x20   : > { %v514_v8 = vpack.c.bf16 %v465_v6, %v463_v5  ;;  %v469_v12 = vld [vmem:[%s6676_s21 + $0xd8] sm:$0xff]  ;;  %v515_v14 = vpack.c.bf16 %v468_v10, %v466_v9  ;;  %v471_v21 = vld [vmem:[%s6676_s21 + $0xe8] sm:$0xff]  ;;  %v6360_v23 = vld [vmem:[%s9157_s5 + $0x110] sm:$0xff] }
  0x21   : > { %662 = vmatpush.bf16.msra.mxu0 %v6312_v16  ;;  %723 = vmatpush.bf16.msra.mxu1 %v6320_v17  ;;  %v516_v15 = vpack.c.bf16 %v469_v12, %v467_v11  ;;  %v474_v32 = vld [vmem:[%s6676_s21 + $0x100] sm:$0xff]  ;;  %v476_v33 = vld [vmem:[%s6676_s21 + $0x110] sm:$0xff]  ;;  %v477_v35 = vld [vmem:[%s6676_s21 + $0x118] sm:$0xff] }
  0x22   : > { %v519_v37 = vpack.c.bf16 %v476_v33, %v474_v32  ;;  %v6330_v49 = vld [vmem:[%s9157_s5 + $0x20] sm:$0xff]  ;;  %v480_v56 = vld [vmem:[%s6676_s21 + $0x130] sm:$0xff]  ;;  %v479_v57 = vld [vmem:[%s6676_s21 + $0x128] sm:$0xff] }
  0x23   : > { %v478_v54 = vld [vmem:[%s6676_s21 + $0x120] sm:$0xff]  ;;  %v6329_v62 = vld [vmem:[%s9157_s5 + $0x18] sm:$0xff]  ;;  %v6328_v3 = vld [vmem:[%s9157_s5 + $0x10] sm:$0xff] }
  0x24   : > { %v521_v63 = vpack.c.bf16 %v480_v56, %v478_v54  ;;  %v6847_v4 = vld [vmem:[%s9157_s5 + $0xe8] sm:$0xff]  ;;  %v6326_v12 = vld [vmem:[%s9157_s5] sm:$0xff] }
  0x25   : > { %663 = vmatpush.bf16.msra.mxu0 %v6311_v18  ;;  %724 = vmatpush.bf16.msra.mxu1 %v6319_v19  ;;  %v470_v19 = vld [vmem:[%s6676_s21 + $0xe0] sm:$0xff]  ;;  %v6343_v5 = vld [vmem:[%s9157_s5 + $0x88] sm:$0xff] }
  0x26   : > { %850 = vperm.xlu0 %6487, %v494_v24   ;;  %845 = vperm.xlu2 %6489, %v493_v43   ;;  %v6334_v43 = vld [vmem:[%s9157_s5 + $0x40] sm:$0xff]  ;;  %v6327_v6 = vld [vmem:[%s9157_s5 + $0x8] sm:$0xff] }
  0x27   : > { %855 = vperm.xlu1 %6488, %v495_v31   ;;  %v6336_v31 = vld [vmem:[%s9157_s5 + $0x50] sm:$0xff] }
  0x29   : > { %664 = vmatpush.bf16.msra.mxu0 %v6310_v20  ;;  %725 = vmatpush.bf16.msra.mxu1 %v6318_v22  ;;  %v472_v20 = vld [vmem:[%s6676_s21 + $0xf0] sm:$0xff]  ;;  %v473_v22 = vld [vmem:[%s6676_s21 + $0xf8] sm:$0xff] }
  0x2a   : > { %v517_v24 = vpack.c.bf16 %v472_v20, %v470_v19  ;;  %v518_v25 = vpack.c.bf16 %v473_v22, %v471_v21  ;;  %v482_v21 = vld [vmem:[%s6676_s21 + $0x140] sm:$0xff]  ;;  %v483_v22 = vld [vmem:[%s6676_s21 + $0x148] sm:$0xff] }
  0x2c   : > { %665 = vmatmul.bf16.vlgmr.msra.gmra.mxu0 %v503_v28  ;;  %726 = vmatmul.bf16.vlgmr.msra.gmra.mxu1 %v504_v29  ;;  %v6337_v28 = vld [vmem:[%s9157_s5 + $0x58] sm:$0xff] }
  0x2d   : > { %1802 = vmatpush.bf16.msrb.mxu1 %v6361_v2  ;;  %1043 = vmatpush.bf16.msra.mxu2 %v6337_v28  ;;  %v523_v28 = vpack.c.bf16 %v482_v21, %v482_v21 }
  0x2e   : > { %865 = vperm.xlu0 %6487, %v497_v30   ;;  %860 = vperm.xlu2 %6489, %v496_v45   ;;  %v6333_v45 = vld [vmem:[%s9157_s5 + $0x38] sm:$0xff] }
  0x2f   : > { %870 = vperm.xlu1 %6488, %v498_v34   ;;  %v475_v34 = vld [vmem:[%s6676_s21 + $0x108] sm:$0xff]  ;;  %1656 = vmatpush.bf16.msrb.mxu0 %v6847_v4 }
  0x30   : > { %v520_v38 = vpack.c.bf16 %v477_v35, %v475_v34 }
  0x31   : > { %1803 = vmatpush.bf16.msrb.mxu1 %v6360_v23  ;;  %1044 = vmatpush.bf16.msra.mxu2 %v6336_v31  ;;  %v524_v31 = vpack.c.bf16 %v483_v22, %v483_v22 }
  0x36   : > { %800 = vperm.xlu0 %6487, %v484_v36   ;;  %875 = vperm.xlu2 %6489, %v499_v52   ;;  %v6335_v36 = vld [vmem:[%s9157_s5 + $0x48] sm:$0xff] }
  0x37   : > { %880 = vperm.xlu1 %6488, %v500_v44   ;;  %1045 = vmatpush.bf16.msra.mxu2 %v6335_v36  ;;  %v6331_v44 = vld [vmem:[%s9157_s5 + $0x28] sm:$0xff] }
  0x38   : > { %1208 = vmatpush.bf16.msra.mxu3 %v6331_v44  ;;  %v6892_v36 = vld [vmem:[%s9157_s5 + $0xc8] sm:$0xff] }
  0x3b   : > { %1046 = vmatpush.bf16.msra.mxu2 %v6334_v43  ;;  %v6342_v43 = vld [vmem:[%s9157_s5 + $0x80] sm:$0xff] }
  0x3c   : > { %669 = vmatmul.bf16.gmra.mxu0 %v505_v40  ;;  %730 = vmatmul.bf16.gmra.mxu1 %v506_v41 }
  0x3d   : > { %1209 = vmatpush.bf16.msra.mxu3 %v6330_v49  ;;  %v6908_v49 = vld [vmem:[%s9157_s5 + $0xc0] sm:$0xff] }
  0x3e   : > { %890 = vperm.xlu0 %6487, %v502_v42   ;;  %885 = vperm.xlu2 %6489, %v501_v53   ;;  %v6332_v53 = vld [vmem:[%s9157_s5 + $0x30] sm:$0xff] }
  0x3f   : > { %1047 = vmatpush.bf16.msra.mxu2 %v6333_v45 }
  0x41   : > { %1210 = vmatpush.bf16.msra.mxu3 %v6329_v62  ;;  %v6356_v62 = vld [vmem:[%s9157_s5 + $0xf0] sm:$0xff] }
  0x43   : > { %1048 = vmatpush.bf16.msra.mxu2 %v6332_v53 }
  0x45   : > { %1211 = vmatpush.bf16.msra.mxu3 %v6328_v3 }
  0x47   : > { %1364 = vmatpush.bf16.msrb.mxu2 %v6343_v5  ;;  %v6349_v5 = vld [vmem:[%s9157_s5 + $0xb8] sm:$0xff] }
  0x49   : > { %1212 = vmatpush.bf16.msra.mxu3 %v6327_v6 }
  0x4b   : > { %1365 = vmatpush.bf16.msrb.mxu2 %v6342_v43 }
  0x4c   : > { %674 = vmatmul.bf16.gmra.mxu0 %v507_v50  ;;  %735 = vmatmul.bf16.gmra.mxu1 %v508_v51 }
  0x4d   : > { %1213 = vmatpush.bf16.msra.mxu3 %v6326_v12 }
  0x51   : > { %1524 = vmatpush.bf16.msrb.mxu3 %v6349_v5 }
  0x5c   : > { %679 = vmatmul.bf16.gmra.mxu0 %v509_v58  ;;  %740 = vmatmul.bf16.gmra.mxu1 %v510_v59  ;;  %v481_v58 = vld [vmem:[%s6676_s21 + $0x138] sm:$0xff]  ;;  %v6359_v59 = vld [vmem:[%s9157_s5 + $0x108] sm:$0xff] }
  0x5d   : > { %1804 = vmatpush.bf16.msrb.mxu1 %v6359_v59 }
  0x6c   : > { %684 = vmatmul.bf16.gmra.mxu0 %v511_v0  ;;  %745 = vmatmul.bf16.gmra.mxu1 %v512_v1  ;;  %v522_v0 = vpack.c.bf16 %v481_v58, %v479_v57 }
  0x70   : > { %v6759_v16 = vpop.permute.xlu2 %825 }
  0x71   : > { %9237 = vst [vmem:[#allocation3_spill] sm:$0xff] %v6759_v16 }
  0x78   : > { %v6763_v18 = vpop.permute.xlu2 %830 }
  0x79   : > { %9239 = vst [vmem:[#allocation5_spill] sm:$0xff] %v6763_v18 }
  0x7c   : > { %689 = vmatmul.bf16.gmra.mxu0 %v513_v7  ;;  %750 = vmatmul.bf16.gmra.mxu1 %v514_v8  ;;  %v6859_v7 = vld [vmem:[%s9157_s5 + $0xe0] sm:$0xff] }
  0x7d   : > { %v6864_v8 = vld [vmem:[%s9156_s4] ss:$0 sm:$0xff]  ;;  %1657 = vmatpush.bf16.msrb.mxu0 %v6859_v7 }
  0x80   : > { %v6774_v27 = vpop.permute.xlu2 %845  ;;  %v6877_v20 = vpop.permute.xlu0 %810 }
  0x81   : > { %v6757_v13 = vpop.permute.xlu1 %805  ;;  %9241 = vst [vmem:[#allocation7_spill] sm:$0xff] %v6774_v27 }
  0x82   : > { %9236 = vst [vmem:[#allocation2_spill] sm:$0xff] %v6757_v13 }
  0x83   : > { %9248 = vst [vmem:[#allocation14_spill] sm:$0xff] %v6877_v20 }
  0x88   : > { %v6781_v30 = vpop.permute.xlu2 %860  ;;  %v6902_v44 = vpop.permute.xlu0 %815 }
  0x89   : > { %v6761_v17 = vpop.permute.xlu1 %820  ;;  %9243 = vst [vmem:[#allocation9_spill] sm:$0xff] %v6781_v30 }
  0x8a   : > { %9238 = vst [vmem:[#allocation4_spill] sm:$0xff] %v6761_v17 }
  0x8b   : > { %9249 = vst [vmem:[#allocation15_spill] sm:$0xff] %v6902_v44 }
  0x8c   : > { %694 = vmatmul.bf16.gmra.mxu0 %v515_v14  ;;  %755 = vmatmul.bf16.gmra.mxu1 %v516_v15  ;;  %v6874_v14 = vld [vmem:[%s9157_s5 + $0xd8] sm:$0xff] }
  0x8d   : > { %1658 = vmatpush.bf16.msrb.mxu0 %v6874_v14 }
  0x90   : > { %v6793_v41 = vpop.permute.xlu2 %875 }
  0x91   : > { %v6772_v26 = vpop.permute.xlu1 %840  ;;  %9244 = vst [vmem:[#allocation10_spill] sm:$0xff] %v6793_v41  ;;  %v9166_v50 = vrot.slane %v6793_v41, 7 }
  0x92   : > { %9240 = vst [vmem:[#allocation6_spill] sm:$0xff] %v6772_v26 }
  0x98   : > { %v6810_v48 = vpop.permute.xlu2 %885 }
  0x99   : > { %v6779_v29 = vpop.permute.xlu1 %855  ;;  %v3644_v51 = vrot.slane %v6810_v48, 7 }
  0x9a   : > { %9242 = vst [vmem:[#allocation8_spill] sm:$0xff] %v6779_v29 }
  0x9c   : > { %699 = vmatmul.bf16.gmra.mxu0 %v517_v24  ;;  %760 = vmatmul.bf16.gmra.mxu1 %v518_v25  ;;  %v6885_v24 = vld [vmem:[%s9157_s5 + $0xd0] sm:$0xff] }
  0x9d   : > { %1659 = vmatpush.bf16.msrb.mxu0 %v6885_v24 }
  0xa1   : > { %v6795_v42 = vpop.permute.xlu1 %870  ;;  %1660 = vmatpush.bf16.msrb.mxu0 %v6892_v36 }
  0xa2   : > { %9245 = vst [vmem:[#allocation11_spill] sm:$0xff] %v6795_v42 }
  0xa5   : > { %1661 = vmatpush.bf16.msrb.mxu0 %v6908_v49 }
  0xa9   : > { %v666_v39 = vpop.f32.mrf.mxu0  ;;  %v727_v40 = vpop.f32.mrf.mxu1 }
  0xaa   : > { %v6817_v52 = vpop.permute.xlu1 %880 }
  0xab   : > { %v3642_v55 = vrot.slane %v6817_v52, 7 }
  0xac   : > { %704 = vmatmul.bf16.gmra.mxu0 %v519_v37  ;;  %765 = vmatmul.bf16.gmra.mxu1 %v520_v38  ;;  %v6358_v37 = vld [vmem:[%s9157_s5 + $0x100] sm:$0xff] }
  0xad   : > { %v6833_v60 = vsel %vm3612_vm0, %v9166_v50, %v3642_v55  ;;  %v6836_v61 = vsel %vm3612_vm0, %v3642_v55, %v3644_v51  ;;  %1805 = vmatpush.bf16.msrb.mxu1 %v6358_v37  ;;  %v6357_v51 = vld [vmem:[%s9157_s5 + $0xf8] sm:$0xff] }
  0xae   : > { %9246 = vst [vmem:[#allocation12_spill] sm:$0xff] %v6833_v60 }
  0xaf   : > { %9247 = vst [vmem:[#allocation13_spill] sm:$0xff] %v6836_v61 }
  0xb1   : > { %v6806_v46 = vpop.f32.mrf.mxu0  ;;  %v6808_v47 = vpop.f32.mrf.mxu1  ;;  %1806 = vmatpush.bf16.msrb.mxu1 %v6357_v51 }
  0xb5   : > { %1807 = vmatpush.bf16.msrb.mxu1 %v6356_v62 }
  0xb9   : > { %v670_v1 = vpop.f32.mrf.mxu0  ;;  %v731_v2 = vpop.f32.mrf.mxu1 }
  0xba   : > { %v671_v15 = vadd.f32 %v6864_v8, %v670_v1 }
  0xbc   : > { %709 = vmatmul.bf16.gmra.mxu0 %v521_v63  ;;  %770 = vmatmul.bf16.gmra.mxu1 %v522_v0  ;;  %v732_v23 = vadd.f32 %v731_v2, %v671_v15 }
  0xbe   : > { %v780_v35 = vmax.f32 %v732_v23, 0.0 }
  0xc0   : > { %v894_v45 = vmul.f32 %v6757_v13, %v780_v35 }
  0xc1   : > { %v672_v9 = vpop.f32.mrf.mxu0  ;;  %v733_v10 = vpop.f32.mrf.mxu1 }
  0xc2   : > { %v673_v11 = vadd.f32 %v6864_v8, %v672_v9  ;;  %v913_v59 = vpack.c.bf16 %v894_v45, %v894_v45 }
  0xc4   : > { %v734_v19 = vadd.f32 %v733_v10, %v673_v11  ;;  %v6928_v6 = vunpack.c.l.b16 %v913_v59 }
  0xc6   : > { %v781_v25 = vmax.f32 %v734_v19, 0.0 }
  0xc8   : > { %v895_v38 = vmul.f32 %v6877_v20, %v781_v25 }
  0xc9   : > { %v675_v32 = vpop.f32.mrf.mxu0  ;;  %v736_v33 = vpop.f32.mrf.mxu1 }
  0xca   : > { %v676_v34 = vadd.f32 %v6864_v8, %v675_v32  ;;  %v914_v53 = vpack.c.bf16 %v895_v38, %v895_v38  ;;  %v6341_v32 = vld [vmem:[%s9157_s5 + $0x78] sm:$0xff] }
  0xcb   : > { %1366 = vmatpush.bf16.msrb.mxu2 %v6341_v32  ;;  %v6379_v32 = vld [vmem:[%s9157_s5 + $0x1a8] sm:$0xff] }
  0xcc   : > { %v737_v39 = vadd.f32 %v736_v33, %v676_v34  ;;  %714 = vmatmul.bf16.gmra.mxu0 %v523_v28  ;;  %775 = vmatmul.bf16.gmra.mxu1 %v524_v31  ;;  %v968_v63 = vunpack.c.l.b16 %v914_v53 }
  0xcd   : > { %2222 = vmatpush.bf16.msra.mxu0 %v6379_v32 }
  0xce   : > { %v782_v40 = vmax.f32 %v737_v39, 0.0  ;;  %v1082_v10 = vpack.c.b16 %v968_v63, %v6928_v6 }
  0xd0   : > { %v6914_v54 = vmul.f32 %v6902_v44, %v782_v40  ;;  %v1091_v23 = vshrl.u32 %v1082_v10, 16  ;;  %v1094_v25 = vshll.u32 %v1082_v10, 16  ;;  %v2764_v45 = vrot.slane %v1082_v10, 3  ;;  %v6348_v10 = vld [vmem:[%s9157_s5 + $0xb0] sm:$0xff] }
  0xd1   : > { %v677_v55 = vpop.f32.mrf.mxu0  ;;  %v738_v56 = vpop.f32.mrf.mxu1  ;;  %1525 = vmatpush.bf16.msrb.mxu3 %v6348_v10 }
  0xd2   : > { %9250 = vst [vmem:[#allocation16_spill] sm:$0xff] %v6914_v54  ;;  %v915_v57 = vpack.c.bf16 %v6914_v54, %v6914_v54  ;;  %v678_v58 = vadd.f32 %v6864_v8, %v677_v55  ;;  %v1093_v39 = vrot.slane %v1091_v23, 3  ;;  %v1096_v40 = vrot.slane %v1094_v25, 4 }
  0xd4   : > { %v969_v0 = vunpack.c.l.b16 %v915_v57  ;;  %v739_v1 = vadd.f32 %v738_v56, %v678_v58 }
  0xd6   : > { %v6923_v2 = vpack.c.b16 %v969_v0, %v968_v63  ;;  %v783_v3 = vmax.f32 %v739_v1, 0.0 }
  0xd8   : > { %9251 = vst [vmem:[#allocation17_spill] sm:$0xff] %v6923_v2  ;;  %v6931_v9 = vmul.f32 %v6761_v17, %v783_v3  ;;  %5376 = vmatmul.msk.bf16.vlgmr.msra.gmra.mxu2 %vm1022_vm1, %v6923_v2 }
  0xd9   : > { %v680_v11 = vpop.f32.mrf.mxu0  ;;  %v741_v12 = vpop.f32.mrf.mxu1 }
  0xda   : > { %9252 = vst [vmem:[#allocation18_spill] sm:$0xff] %v6931_v9  ;;  %v916_v15 = vpack.c.bf16 %v6931_v9, %v6931_v9  ;;  %v681_v19 = vadd.f32 %v6864_v8, %v680_v11 }
  0xdc   : > { %v970_v21 = vunpack.c.l.b16 %v916_v15  ;;  %v742_v22 = vadd.f32 %v741_v12, %v681_v19 }
  0xde   : > { %v6939_v28 = vpack.c.b16 %v970_v21, %v969_v0  ;;  %v784_v31 = vmax.f32 %v742_v22, 0.0  ;;  %v1097_v0 = vor.u32 %v1096_v40, %v1093_v39 }
  0xe0   : > { %9253 = vst [vmem:[#allocation19_spill] sm:$0xff] %v6939_v28  ;;  %v6945_v33 = vmul.f32 %v6759_v16, %v784_v31  ;;  %v6948_v34 = vshrl.u32 %v6939_v28, 16  ;;  %v6951_v35 = vshll.u32 %v6939_v28, 16  ;;  %v9167_v43 = vrot.slane %v6939_v28, 3 }
  0xe1   : > { %v682_v37 = vpop.f32.mrf.mxu0  ;;  %v743_v38 = vpop.f32.mrf.mxu1 }
  0xe2   : > { %9254 = vst [vmem:[#allocation20_spill] sm:$0xff] %v6945_v33  ;;  %v917_v51 = vpack.c.bf16 %v6945_v33, %v6945_v33  ;;  %v683_v53 = vadd.f32 %v6864_v8, %v682_v37  ;;  %v1101_v55 = vrot.slane %v6948_v34, 3  ;;  %v1104_v56 = vrot.slane %v6951_v35, 4 }
  0xe3   : > { %v1431_v57 = vrot.slane %v6948_v34, 1  ;;  %v1432_v62 = vrot.slane %v6951_v35, 2  ;;  %v6964_v63 = vsel %vm2763_vm2, %v2764_v45, %v9167_v43 }
  0xe4   : > { %v971_v58 = vunpack.c.l.b16 %v917_v51  ;;  %v744_v59 = vadd.f32 %v743_v38, %v683_v53  ;;  %v1105_v1 = vor.u32 %v1104_v56, %v1101_v55  ;;  %v6340_v55 = vld [vmem:[%s9157_s5 + $0x70] sm:$0xff]  ;;  %v7004_v56 = vpop.permute.xlu0 %835 }
  0xe5   : > { %v6971_v11 = vor.u32 %v1432_v62, %v1431_v57  ;;  %9259 = vst [vmem:[#allocation25_spill] sm:$0xff] %v7004_v56  ;;  %v1587_v57 = vrot.slane %v6939_v28, 2  ;;  %1367 = vmatpush.bf16.msrb.mxu2 %v6340_v55 }
  0xe6   : > { %v6966_v3 = vpack.c.b16 %v971_v58, %v970_v21  ;;  %v785_v5 = vmax.f32 %v744_v59, 0.0  ;;  %v6974_v12 = vsel %vm1089_vm3, %v1097_v0, %v1105_v1  ;;  %v6378_v59 = vld [vmem:[%s9157_s5 + $0x1a0] sm:$0xff] }
  0xe7   : > { %9256 = vst [vmem:[#allocation22_spill] sm:$0xff] %v6974_v12  ;;  %5406 = vmatmul.msk.bf16.vlgmr.msra.gmra.mxu3 %vm1022_vm1, %v6974_v12  ;;  %2223 = vmatpush.bf16.msra.mxu0 %v6378_v59 }
  0xe8   : > { %9255 = vst [vmem:[#allocation21_spill] sm:$0xff] %v6966_v3  ;;  %v6977_v15 = vmul.f32 %v6763_v18, %v785_v5  ;;  %5377 = vmatmul.msk.bf16.gmra.mxu2 %vm1022_vm1, %v6966_v3  ;;  %v6984_v19 = vshll.u32 %v6966_v3, 16  ;;  %v6987_v21 = vshrl.u32 %v6966_v3, 16 }
  0xe9   : > { %v685_v22 = vpop.f32.mrf.mxu0  ;;  %v746_v23 = vpop.f32.mrf.mxu1 }
  0xea   : > { %9257 = vst [vmem:[#allocation23_spill] sm:$0xff] %v6977_v15  ;;  %v918_v25 = vpack.c.bf16 %v6977_v15, %v6977_v15  ;;  %v686_v31 = vadd.f32 %v6864_v8, %v685_v22  ;;  %v1868_v37 = vrot.slane %v6987_v21, 3  ;;  %v1869_v38 = vrot.slane %v6984_v19, 4 }
  0xec   : > { %v972_v39 = vunpack.c.l.b16 %v918_v25  ;;  %v747_v40 = vadd.f32 %v746_v23, %v686_v31  ;;  %v6997_v45 = vor.u32 %v1869_v38, %v1868_v37  ;;  %v1719_v23 = vrot.slane %v6948_v34, 2 }
  0xed   : > { %v1720_v25 = vrot.slane %v6951_v35, 3 }
  0xee   : > { %v6999_v51 = vpack.c.b16 %v972_v39, %v971_v58  ;;  %v786_v53 = vmax.f32 %v747_v40, 0.0 }
  0xef   : > { %v1721_v50 = vor.u32 %v1720_v25, %v1719_v23  ;;  %v6376_v23 = vld [vmem:[%s9157_s5 + $0x190] sm:$0xff] }
  0xf0   : > { %9258 = vst [vmem:[#allocation24_spill] sm:$0xff] %v6999_v51  ;;  %v7011_v62 = vmul.f32 %v7004_v56, %v786_v53  ;;  %v9168_v0 = vrot.slane %v6999_v51, 2  ;;  %v7015_v58 = vshrl.u32 %v6999_v51, 16  ;;  %v7018_v5 = vshll.u32 %v6999_v51, 16  ;;  %v6377_v53 = vld [vmem:[%s9157_s5 + $0x198] sm:$0xff]  ;;  %v6347_v56 = vld [vmem:[%s9157_s5 + $0xa8] sm:$0xff] }
  0xf1   : > { %v687_v10 = vpop.f32.mrf.mxu0  ;;  %v748_v22 = vpop.f32.mrf.mxu1  ;;  %2224 = vmatpush.bf16.msra.mxu0 %v6377_v53  ;;  %1526 = vmatpush.bf16.msrb.mxu3 %v6347_v56 }
  0xf2   : > { %9260 = vst [vmem:[#allocation26_spill] sm:$0xff] %v7011_v62  ;;  %v919_v31 = vpack.c.bf16 %v7011_v62, %v7011_v62  ;;  %v688_v32 = vadd.f32 %v6864_v8, %v687_v10  ;;  %v7028_v37 = vsel %vm1586_vm4, %v1587_v57, %v9168_v0  ;;  %v1110_v38 = vrot.slane %v7015_v58, 3 }
  0xf3   : > { %9261 = vst [vmem:[#allocation27_spill] sm:$0xff] %v7028_v37  ;;  %5532 = vmatmul.msk.bf16.vlgmr.msrb.gmra.mxu0 %vm1022_vm1, %v7028_v37  ;;  %v1113_v34 = vrot.slane %v7018_v5, 4  ;;  %v1722_v35 = vrot.slane %v7015_v58, 2  ;;  %v1723_v40 = vrot.slane %v7018_v5, 3  ;;  %v1434_v57 = vrot.slane %v7015_v58, 1 }
  0xf4   : > { %v973_v55 = vunpack.c.l.b16 %v919_v31  ;;  %v749_v59 = vadd.f32 %v748_v22, %v688_v32  ;;  %v1435_v0 = vrot.slane %v7018_v5, 2 }
  0xf5   : > { %v7040_v10 = vor.u32 %v1113_v34, %v1110_v38  ;;  %v7042_v43 = vor.u32 %v1723_v40, %v1722_v35  ;;  %2225 = vmatpush.bf16.msra.mxu0 %v6376_v23  ;;  %v6375_v35 = vld [vmem:[%s9157_s5 + $0x188] sm:$0xff]  ;;  %v6374_v23 = vld [vmem:[%s9157_s5 + $0x180] sm:$0xff] }
  0xf6   : > { %v7045_v61 = vpack.c.b16 %v973_v55, %v972_v39  ;;  %v787_v60 = vmax.f32 %v749_v59, 0.0  ;;  %v7059_v25 = vor.u32 %v1435_v0, %v1434_v57 }
  0xf7   : > { %v7052_v22 = vsel %vm1089_vm3, %v1105_v1, %v7040_v10  ;;  %v1725_v31 = vsel %vm1718_vm5, %v1721_v50, %v7042_v43 }
  0xf8   : > { %9262 = vst [vmem:[#allocation28_spill] sm:$0xff] %v7045_v61  ;;  %v7062_v39 = vmul.f32 %v6772_v26, %v787_v60  ;;  %5407 = vmatmul.msk.bf16.gmra.mxu3 %vm1022_vm1, %v7052_v22  ;;  %5574 = vmatmul.msk.bf16.vlgmr.msrb.gmra.mxu1 %vm1022_vm1, %v1725_v31  ;;  %v7068_v1 = vshll.u32 %v7045_v61, 16  ;;  %v7071_v50 = vshrl.u32 %v7045_v61, 16  ;;  %v7078_v60 = vsel %vm1430_vm6, %v6971_v11, %v7059_v25  ;;  %v6339_v26 = vld [vmem:[%s9157_s5 + $0x68] sm:$0xff] }
  0xf9   : > { %9263 = vst [vmem:[#allocation29_spill] sm:$0xff] %v7052_v22  ;;  %5378 = vmatmul.msk.bf16.gmra.mxu2 %vm1022_vm1, %v7045_v61  ;;  %v690_v0 = vpop.f32.mrf.mxu0  ;;  %v751_v32 = vpop.f32.mrf.mxu1  ;;  %2226 = vmatpush.bf16.msra.mxu0 %v6375_v35 }
  0xfa   : > { %9264 = vst [vmem:[#allocation30_spill] sm:$0xff] %v7062_v39  ;;  %v920_v38 = vpack.c.bf16 %v7062_v39, %v7062_v39  ;;  %v691_v34 = vadd.f32 %v6864_v8, %v690_v0  ;;  %v1871_v40 = vrot.slane %v7071_v50, 3  ;;  %v1872_v53 = vrot.slane %v7068_v1, 4  ;;  %1368 = vmatpush.bf16.msrb.mxu2 %v6339_v26  ;;  %v6346_v39 = vld [vmem:[%s9157_s5 + $0xa0] sm:$0xff] }
  0xfb   : > { %1527 = vmatpush.bf16.msrb.mxu3 %v6346_v39  ;;  %v6345_v39 = vld [vmem:[%s9157_s5 + $0x98] sm:$0xff] }
  0xfc   : > { %v974_v56 = vunpack.c.l.b16 %v920_v38  ;;  %v752_v59 = vadd.f32 %v751_v32, %v691_v34  ;;  %v1873_v57 = vor.u32 %v1872_v53, %v1871_v40 }
  0xfd   : > { %2227 = vmatpush.bf16.msra.mxu0 %v6374_v23 }
  0xfe   : > { %v7088_v31 = vpack.c.b16 %v974_v56, %v973_v55  ;;  %v788_v11 = vmax.f32 %v752_v59, 0.0  ;;  %v7098_v0 = vsel %vm1089_vm3, %v6997_v45, %v1873_v57  ;;  %v9268_v59 = vrot.slane %v6999_v51, 2 }
  0xff   : > { %9266 = vst [vmem:[#allocation32_spill] sm:$0xff] %v7098_v0  ;;  %1528 = vmatpush.bf16.msrb.mxu3 %v6345_v39 }
 0x100   : > { %9265 = vst [vmem:[#allocation31_spill] sm:$0xff] %v7088_v31  ;;  %v7101_v38 = vmul.f32 %v6774_v27, %v788_v11  ;;  %v1590_v55 = vrot.slane %v7088_v31, 2  ;;  %v7105_v32 = vshrl.u32 %v7088_v31, 16  ;;  %v7108_v34 = vshll.u32 %v7088_v31, 16 }
 0x101   : > { %v692_v35 = vpop.f32.mrf.mxu0  ;;  %v753_v40 = vpop.f32.mrf.mxu1 }
 0x102   : > { %9267 = vst [vmem:[#allocation33_spill] sm:$0xff] %v7101_v38  ;;  %v921_v53 = vpack.c.bf16 %v7101_v38, %v7101_v38  ;;  %v693_v45 = vadd.f32 %v6864_v8, %v692_v35  ;;  %v7116_v11 = vsel %vm1586_vm4, %v9268_v59, %v1590_v55  ;;  %v1119_v27 = vrot.slane %v7105_v32, 3 }
 0x103   : > { %9269 = vst [vmem:[#allocation34_spill] sm:$0xff] %v7116_v11  ;;  %5533 = vmatmul.msk.bf16.gmra.mxu0 %vm1022_vm1, %v7116_v11  ;;  %v1122_v26 = vrot.slane %v7108_v34, 4  ;;  %v1726_v18 = vrot.slane %v7105_v32, 2  ;;  %v1727_v16 = vrot.slane %v7108_v34, 3  ;;  %v1438_v35 = vrot.slane %v7105_v32, 1  ;;  %v7131_v11 = vpop.permute.xlu0 %850 }
 0x104   : > { %v975_v17 = vunpack.c.l.b16 %v921_v53  ;;  %v754_v44 = vadd.f32 %v753_v40, %v693_v45  ;;  %v1439_v59 = vrot.slane %v7108_v34, 2  ;;  %9271 = vst [vmem:[#allocation36_spill] sm:$0xff] %v7131_v11 }
 0x105   : > { %v1123_v13 = vor.u32 %v1122_v26, %v1119_v27  ;;  %v1728_v20 = vor.u32 %v1727_v16, %v1726_v18 }
 0x106   : > { %v7126_v23 = vpack.c.b16 %v975_v17, %v974_v56  ;;  %v789_v38 = vmax.f32 %v754_v44, 0.0  ;;  %v1440_v27 = vor.u32 %v1439_v59, %v1438_v35 }
 0x107   : > { %v7135_v62 = vsel %vm1089_vm3, %v7040_v10, %v1123_v13  ;;  %v1729_v40 = vsel %vm1718_vm5, %v7042_v43, %v1728_v20 }
 0x108   : > { %9270 = vst [vmem:[#allocation35_spill] sm:$0xff] %v7126_v23  ;;  %v7140_v16 = vmul.f32 %v7131_v11, %v789_v38  ;;  %5408 = vmatmul.msk.bf16.gmra.mxu3 %vm1022_vm1, %v7135_v62  ;;  %5575 = vmatmul.msk.bf16.gmra.mxu1 %vm1022_vm1, %v1729_v40  ;;  %v7146_v18 = vshll.u32 %v7126_v23, 16  ;;  %v7149_v44 = vshrl.u32 %v7126_v23, 16  ;;  %v7155_v56 = vsel %vm1430_vm6, %v7059_v25, %v1440_v27  ;;  %v6338_v25 = vld [vmem:[%s9157_s5 + $0x60] sm:$0xff] }
 0x109   : > { %9272 = vst [vmem:[#allocation37_spill] sm:$0xff] %v7135_v62  ;;  %5379 = vmatmul.msk.bf16.gmra.mxu2 %vm1022_vm1, %v7126_v23  ;;  %v695_v10 = vpop.f32.mrf.mxu0  ;;  %v756_v43 = vpop.f32.mrf.mxu1  ;;  %v9203_v23 = vrot.slane %v7108_v34, 1 }
 0x10a   : > { %9273 = vst [vmem:[#allocation38_spill] sm:$0xff] %v7140_v16  ;;  %v922_v38 = vpack.c.bf16 %v7140_v16, %v7140_v16  ;;  %v696_v53 = vadd.f32 %v6864_v8, %v695_v10  ;;  %v1875_v45 = vrot.slane %v7149_v44, 3  ;;  %v1876_v26 = vrot.slane %v7146_v18, 4  ;;  %1369 = vmatpush.bf16.msrb.mxu2 %v6338_v25 }
 0x10c   : > { %v976_v35 = vunpack.c.l.b16 %v922_v38  ;;  %v757_v59 = vadd.f32 %v756_v43, %v696_v53  ;;  %v1877_v40 = vor.u32 %v1876_v26, %v1875_v45 }
 0x10e   : > { %v7162_v11 = vpack.c.b16 %v976_v35, %v975_v17  ;;  %v790_v15 = vmax.f32 %v757_v59, 0.0  ;;  %v7171_v10 = vsel %vm1089_vm3, %v1873_v57, %v1877_v40  ;;  %6464 = vmatpush.bf16.msra.mxu2 %v6847_v4 }
 0x10f   : > { %9275 = vst [vmem:[#allocation40_spill] sm:$0xff] %v7171_v10 }
 0x110   : > { %9274 = vst [vmem:[#allocation39_spill] sm:$0xff] %v7162_v11  ;;  %v7174_v16 = vmul.f32 %v6779_v29, %v790_v15  ;;  %v9190_v43 = vrot.slane %v7162_v11, 2  ;;  %v7178_v17 = vshrl.u32 %v7162_v11, 16  ;;  %v7181_v38 = vshll.u32 %v7162_v11, 16 }
 0x111   : > { %v697_v53 = vpop.f32.mrf.mxu0  ;;  %v758_v45 = vpop.f32.mrf.mxu1 }
 0x112   : > { %9276 = vst [vmem:[#allocation41_spill] sm:$0xff] %v7174_v16  ;;  %v923_v57 = vpack.c.bf16 %v7174_v16, %v7174_v16  ;;  %v698_v15 = vadd.f32 %v6864_v8, %v697_v53  ;;  %v7190_v26 = vsel %vm1586_vm4, %v1590_v55, %v9190_v43  ;;  %v1128_v59 = vrot.slane %v7178_v17, 3  ;;  %6466 = vmatpush.bf16.msra.mxu2 %v6859_v7 }
 0x113   : > { %9277 = vst [vmem:[#allocation42_spill] sm:$0xff] %v7190_v26  ;;  %5534 = vmatmul.msk.bf16.gmra.mxu0 %vm1022_vm1, %v7190_v26  ;;  %v1131_v25 = vrot.slane %v7181_v38, 4  ;;  %v1730_v39 = vrot.slane %v7178_v17, 2  ;;  %v1731_v29 = vrot.slane %v7181_v38, 3  ;;  %v1442_v53 = vrot.slane %v7178_v17, 1 }
 0x114   : > { %v977_v37 = vunpack.c.l.b16 %v923_v57  ;;  %v759_v16 = vadd.f32 %v758_v45, %v698_v15  ;;  %v1443_v55 = vrot.slane %v7181_v38, 2 }
 0x115   : > { %v7199_v33 = vor.u32 %v1131_v25, %v1128_v59  ;;  %v7201_v9 = vor.u32 %v1731_v29, %v1730_v39 }
 0x116   : > { %v7205_v43 = vpack.c.b16 %v977_v37, %v976_v35  ;;  %v791_v26 = vmax.f32 %v759_v16, 0.0  ;;  %v7213_v57 = vor.u32 %v1443_v55, %v1442_v53  ;;  %6468 = vmatpush.bf16.msra.mxu2 %v6874_v14 }
 0x117   : > { %v7209_v54 = vsel %vm1089_vm3, %v1123_v13, %v7199_v33  ;;  %v1733_v45 = vsel %vm1718_vm5, %v1728_v20, %v7201_v9 }
 0x118   : > { %9278 = vst [vmem:[#allocation43_spill] sm:$0xff] %v7205_v43  ;;  %v7216_v15 = vmul.f32 %v6781_v30, %v791_v26  ;;  %5409 = vmatmul.msk.bf16.gmra.mxu3 %vm1022_vm1, %v7209_v54  ;;  %5576 = vmatmul.msk.bf16.gmra.mxu1 %vm1022_vm1, %v1733_v45  ;;  %v7222_v29 = vshll.u32 %v7205_v43, 16  ;;  %v7225_v16 = vshrl.u32 %v7205_v43, 16  ;;  %v7231_v35 = vsel %vm1430_vm6, %v1440_v27, %v7213_v57 }
 0x119   : > { %9279 = vst [vmem:[#allocation44_spill] sm:$0xff] %v7209_v54  ;;  %5380 = vmatmul.msk.bf16.gmra.mxu2 %vm1022_vm1, %v7205_v43  ;;  %v700_v13 = vpop.f32.mrf.mxu0  ;;  %v761_v20 = vpop.f32.mrf.mxu1  ;;  %v2140_v45 = vrot.slane %v7018_v5, 1 }
 0x11a   : > { %9280 = vst [vmem:[#allocation45_spill] sm:$0xff] %v7216_v15  ;;  %v924_v26 = vpack.c.bf16 %v7216_v15, %v7216_v15  ;;  %v701_v59 = vadd.f32 %v6864_v8, %v700_v13  ;;  %v1879_v25 = vrot.slane %v7225_v16, 3  ;;  %v1880_v39 = vrot.slane %v7222_v29, 4  ;;  %v6344_v13 = vld [vmem:[%s9157_s5 + $0x90] sm:$0xff]  ;;  %6470 = vmatpush.bf16.msra.mxu2 %v6885_v24  ;;  %v7249_v15 = vpop.permute.xlu0 %865 }
 0x11b   : > { %9282 = vst [vmem:[#allocation47_spill] sm:$0xff] %v7249_v15  ;;  %1529 = vmatpush.bf16.msrb.mxu3 %v6344_v13 }
 0x11c   : > { %v978_v53 = vunpack.c.l.b16 %v924_v26  ;;  %v762_v55 = vadd.f32 %v761_v20, %v701_v59  ;;  %v7240_v30 = vor.u32 %v1880_v39, %v1879_v25  ;;  %v6391_v25 = vld [vmem:[%s9159_s7 + $0x58] sm:$0xff] }
 0x11d   : > { %2425 = vmatpush.bf16.msra.mxu1 %v6391_v25 }
 0x11e   : > { %v7242_v43 = vpack.c.b16 %v978_v53, %v977_v37  ;;  %v792_v27 = vmax.f32 %v762_v55, 0.0  ;;  %v7253_v20 = vsel %vm1089_vm3, %v1877_v40, %v7240_v30  ;;  %v2141_v37 = vor.u32 %v2140_v45, %v7015_v58  ;;  %6472 = vmatpush.bf16.msra.mxu2 %v6892_v36 }
 0x11f   : > { %9283 = vst [vmem:[#allocation48_spill] sm:$0xff] %v7253_v20  ;;  %6465 = vmatpush.bf16.msra.mxu3 %v6847_v4 }
 0x120   : > { %9281 = vst [vmem:[#allocation46_spill] sm:$0xff] %v7242_v43  ;;  %v7256_v5 = vmul.f32 %v7249_v15, %v792_v27  ;;  %v7260_v26 = vshrl.u32 %v7242_v43, 16  ;;  %v7263_v59 = vshll.u32 %v7242_v43, 16  ;;  %v2143_v45 = vsel %vm1261_vm7, %v2141_v37, %v9203_v23 }
 0x121   : > { %v702_v39 = vpop.f32.mrf.mxu0  ;;  %v763_v55 = vpop.f32.mrf.mxu1 }
 0x122   : > { %9284 = vst [vmem:[#allocation49_spill] sm:$0xff] %v7256_v5  ;;  %v925_v40 = vpack.c.bf16 %v7256_v5, %v7256_v5  ;;  %v703_v58 = vadd.f32 %v6864_v8, %v702_v39  ;;  %v1137_v27 = vrot.slane %v7260_v26, 3  ;;  %v1140_v13 = vrot.slane %v7263_v59, 4  ;;  %v6390_v39 = vld [vmem:[%s9159_s7 + $0x50] sm:$0xff]  ;;  %6474 = vmatpush.bf16.msra.mxu2 %v6908_v49 }
 0x123   : > { %5700 = vmatmul.msk.bf16.vlgmr.msra.gmra.mxu0 %vm1022_vm1, %v2143_v45  ;;  %v1734_v4 = vrot.slane %v7260_v26, 2  ;;  %v1735_v15 = vrot.slane %v7263_v59, 3  ;;  %v1446_v37 = vrot.slane %v7260_v26, 1  ;;  %v1447_v25 = vrot.slane %v7263_v59, 2  ;;  %6467 = vmatpush.bf16.msra.mxu3 %v6859_v7 }
 0x124   : > { %v979_v5 = vunpack.c.l.b16 %v925_v40  ;;  %v764_v61 = vadd.f32 %v763_v55, %v703_v58  ;;  %v7286_v23 = vor.u32 %v1140_v13, %v1137_v27  ;;  %2426 = vmatpush.bf16.msra.mxu1 %v6390_v39 }
 0x125   : > { %v7288_v3 = vor.u32 %v1735_v15, %v1734_v4  ;;  %v7293_v40 = vor.u32 %v1447_v25, %v1446_v37 }
 0x126   : > { %v7291_v45 = vpack.c.b16 %v979_v5, %v978_v53  ;;  %v793_v54 = vmax.f32 %v764_v61, 0.0  ;;  %v1088_v55 = vpack.c.b16 %v979_v5, %v979_v5  ;;  %v7299_v58 = vsel %vm1089_vm3, %v7199_v33, %v7286_v23 }
 0x127   : > { %9286 = vst [vmem:[#allocation51_spill] sm:$0xff] %v7299_v58  ;;  %v1737_v15 = vsel %vm1718_vm5, %v7201_v9, %v7288_v3  ;;  %v7313_v61 = vsel %vm1430_vm6, %v7213_v57, %v7293_v40  ;;  %6469 = vmatpush.bf16.msra.mxu3 %v6874_v14 }
 0x128   : > { %9285 = vst [vmem:[#allocation50_spill] sm:$0xff] %v7291_v45  ;;  %v7305_v7 = vmul.f32 %v6795_v42, %v793_v54  ;;  %5410 = vmatmul.msk.bf16.gmra.mxu3 %vm1022_vm1, %v7299_v58  ;;  %5577 = vmatmul.msk.bf16.gmra.mxu1 %vm1022_vm1, %v1737_v15  ;;  %v6389_v54 = vld [vmem:[%s9159_s7 + $0x48] sm:$0xff]  ;;  %v7322_v9 = vshll.u32 %v7291_v45, 16  ;;  %v7325_v27 = vshrl.u32 %v7291_v45, 16  ;;  %v1144_v4 = vshrl.u32 %v1088_v55, 16 }
 0x129   : > { %5381 = vmatmul.msk.bf16.gmra.mxu2 %vm1022_vm1, %v7291_v45  ;;  %v705_v33 = vpop.f32.mrf.mxu0  ;;  %v766_v53 = vpop.f32.mrf.mxu1  ;;  %v1147_v39 = vshll.u32 %v1088_v55, 16  ;;  %2427 = vmatpush.bf16.msra.mxu1 %v6389_v54  ;;  %v668_v42 = vadd.f32 %v6864_v8, %v6806_v46  ;;  %v6387_v46 = vld [vmem:[%s9159_s7 + $0x38] sm:$0xff] }
 0x12a   : > { %9287 = vst [vmem:[#allocation52_spill] sm:$0xff] %v7305_v7  ;;  %v926_v57 = vpack.c.bf16 %v7305_v7, %v7305_v7  ;;  %v706_v13 = vadd.f32 %v6864_v8, %v705_v33  ;;  %v1883_v15 = vrot.slane %v7325_v27, 3  ;;  %v1884_v14 = vrot.slane %v7322_v9, 4  ;;  %v6388_v7 = vld [vmem:[%s9159_s7 + $0x40] sm:$0xff] }
 0x12b   : > { %6471 = vmatpush.bf16.msra.mxu3 %v6885_v24  ;;  %v9290_v24 = vrot.slane %v7108_v34, 1 }
 0x12c   : > { %v7330_v37 = vunpack.c.l.b16 %v926_v57  ;;  %v767_v25 = vadd.f32 %v766_v53, %v706_v13  ;;  %v7345_v54 = vor.u32 %v1884_v14, %v1883_v15  ;;  %v1146_v57 = vrot.slane %v1144_v4, 3 }
 0x12d   : > { %v1149_v13 = vrot.slane %v1147_v39, 4  ;;  %2428 = vmatpush.bf16.msra.mxu1 %v6388_v7  ;;  %v729_v4 = vadd.f32 %v6808_v47, %v668_v42  ;;  %v9291_v14 = vshll.u32 %v6923_v2, 16 }
 0x12e   : > { %v7342_v55 = vpack.c.b16 %v7330_v37, %v979_v5  ;;  %v794_v33 = vmax.f32 %v767_v25, 0.0  ;;  %v2144_v5 = vor.u32 %v9290_v24, %v7105_v32  ;;  %v7369_v34 = vsel %vm1089_vm3, %v7240_v30, %v7345_v54  ;;  %v6386_v30 = vld [vmem:[%s9159_s7 + $0x30] sm:$0xff] }
 0x12f   : > { %v1266_v53 = vrot.slane %v9291_v14, 1  ;;  %6473 = vmatpush.bf16.msra.mxu3 %v6892_v36  ;;  %9292 = vst [vmem:[#allocation55_spill] sm:$0xff] %v7369_v34  ;;  %v9293_v24 = vrot.slane %v7181_v38, 1  ;;  %v1150_v14 = vor.u32 %v1149_v13, %v1146_v57 }
 0x130   : > { %9288 = vst [vmem:[#allocation53_spill] sm:$0xff] %v7342_v55  ;;  %v7351_v45 = vmul.f32 %v6793_v41, %v794_v33  ;;  %v7357_v25 = vshrl.u32 %v7342_v55, 16  ;;  %v7360_v15 = vshll.u32 %v7342_v55, 16 }
 0x131   : > { %v707_v7 = vpop.f32.mrf.mxu0  ;;  %v768_v39 = vpop.f32.mrf.mxu1  ;;  %v2146_v42 = vsel %vm1261_vm7, %v2144_v5, %v9293_v24  ;;  %2429 = vmatpush.bf16.msra.mxu1 %v6387_v46  ;;  %v9215_v5 = vshrl.u32 %v6923_v2, 16  ;;  %v9216_v24 = vrot.slane %v6984_v19, 1 }
 0x132   : > { %9289 = vst [vmem:[#allocation54_spill] sm:$0xff] %v7351_v45  ;;  %v927_v32 = vpack.c.bf16 %v7351_v45, %v7351_v45  ;;  %v708_v33 = vadd.f32 %v6864_v8, %v707_v7  ;;  %v1738_v47 = vrot.slane %v7357_v25, 2  ;;  %v1739_v36 = vrot.slane %v7360_v15, 3 }
 0x133   : > { %5701 = vmatmul.msk.bf16.gmra.mxu0 %vm1022_vm1, %v2146_v42  ;;  %v1453_v41 = vrot.slane %v7357_v25, 1  ;;  %v1456_v7 = vrot.slane %v7360_v15, 2  ;;  %6475 = vmatpush.bf16.msra.mxu3 %v6908_v49 }
 0x134   : > { %v1427_v45 = vunpack.c.l.b16 %v927_v32  ;;  %v769_v58 = vadd.f32 %v768_v39, %v708_v33  ;;  %v7387_v62 = vor.u32 %v1739_v36, %v1738_v47  ;;  %v1267_v32 = vor.u32 %v1266_v53, %v9215_v5  ;;  %v801_v47 = vpop.permute.xlu0 %800 }
 0x135   : > { %v7389_v57 = vor.u32 %v1456_v7, %v1453_v41  ;;  %v779_v39 = vmax.f32 %v729_v4, 0.0  ;;  %v1151_v33 = vsel %vm1089_vm3, %v7286_v23, %v1150_v14  ;;  %2430 = vmatpush.bf16.msra.mxu1 %v6386_v30  ;;  %v2917_v30 = vrot.slane %v7357_v25, 3 }
 0x136   : > { %v7392_v13 = vpack.c.b16 %v1427_v45, %v1427_v45  ;;  %v7395_v46 = vpack.c.b16 %v1427_v45, %v7330_v37  ;;  %v795_v42 = vmax.f32 %v769_v58, 0.0  ;;  %v1741_v41 = vsel %vm1718_vm5, %v7288_v3, %v7387_v62 }
 0x137   : > { %v7407_v49 = vsel %vm1430_vm6, %v7293_v40, %v7389_v57  ;;  %v1271_v53 = vsel %vm1261_vm7, %v1267_v32, %v9216_v24  ;;  %v2918_v7 = vrot.slane %v7360_v15, 4  ;;  %v893_v32 = vmul.f32 %v801_v47, %v779_v39 }
 0x138   : > { %v909_v58 = vmul.f32 %v6817_v52, %v795_v42  ;;  %5411 = vmatmul.msk.bf16.gmra.mxu3 %vm1022_vm1, %v1151_v33  ;;  %5578 = vmatmul.msk.bf16.gmra.mxu1 %vm1022_vm1, %v1741_v41  ;;  %v1460_v4 = vshrl.u32 %v7392_v13, 16  ;;  %v1463_v3 = vshll.u32 %v7392_v13, 16  ;;  %v9219_v36 = vshrl.u32 %v7395_v46, 16 }
 0x139   : > { %5448 = vmatmul.msk.bf16.vlgmr.msrb.gmra.mxu2 %vm1022_vm1, %v1271_v53  ;;  %v710_v14 = vpop.f32.mrf.mxu0  ;;  %v771_v40 = vpop.f32.mrf.mxu1  ;;  %v2148_v53 = vrot.slane %v7263_v59, 1  ;;  %v9295_v12 = vshll.u32 %v7395_v46, 16  ;;  %v2919_v0 = vor.u32 %v2918_v7, %v2917_v30  ;;  %v9297_v30 = vrot.slane %v7181_v38, 1 }
 0x13a   : > { %v928_v42 = vpack.c.bf16 %v909_v58, %v909_v58  ;;  %v711_v33 = vadd.f32 %v6864_v8, %v710_v14  ;;  %v1462_v41 = vrot.slane %v1460_v4, 1  ;;  %v1465_v5 = vrot.slane %v1463_v3, 2 }
 0x13b   : > { %v1742_v22 = vrot.slane %v1460_v4, 2  ;;  %v1890_v52 = vrot.slane %v9219_v36, 3  ;;  %v1893_v10 = vrot.slane %v9295_v12, 4  ;;  %v1743_v14 = vrot.slane %v1463_v3, 3 }
 0x13c   : > { %v7423_v24 = vunpack.c.l.b16 %v928_v42  ;;  %v772_v34 = vadd.f32 %v771_v40, %v711_v33  ;;  %v1466_v20 = vor.u32 %v1465_v5, %v1462_v41  ;;  %v7441_v4 = vsel %vm1089_vm3, %v7286_v23, %v2919_v0 }
 0x13d   : > { %v1894_v5 = vor.u32 %v1893_v10, %v1890_v52  ;;  %v2147_v7 = vor.u32 %v9297_v30, %v7178_v17  ;;  %v912_v3 = vpack.c.bf16 %v893_v32, %v893_v32  ;;  %v1744_v38 = vor.u32 %v1743_v14, %v1742_v22 }
 0x13e   : > { %9294 = vst [vmem:[#allocation56_spill] sm:$0xff] %v7423_v24  ;;  %v1867_v58 = vpack.c.b16 %v7423_v24, %v7423_v24  ;;  %v7433_v39 = vpack.c.b16 %v7423_v24, %v1427_v45  ;;  %v796_v47 = vmax.f32 %v772_v34, 0.0  ;;  %v7437_v40 = vsel %vm1430_vm6, %v7389_v57, %v1466_v20 }
 0x13f   : > { %v7455_v10 = vsel %vm1089_vm3, %v7345_v54, %v1894_v5  ;;  %v2149_v17 = vsel %vm1261_vm7, %v2147_v7, %v2148_v53  ;;  %v2325_v22 = vunpack.c.l.b16 %v912_v3  ;;  %v1284_v59 = vrot.slane %v7146_v18, 1 }
 0x140   : > { %9296 = vst [vmem:[#allocation57_spill] sm:$0xff] %v7433_v39  ;;  %v910_v12 = vmul.f32 %v6810_v48, %v796_v47  ;;  %v7448_v45 = vshll.u32 %v7433_v39, 16  ;;  %v7451_v34 = vshrl.u32 %v7433_v39, 16  ;;  %v1897_v23 = vshrl.u32 %v1867_v58, 16 }
 0x141   : > { %v712_v20 = vpop.f32.mrf.mxu0  ;;  %v773_v42 = vpop.f32.mrf.mxu1  ;;  %v1900_v52 = vshll.u32 %v1867_v58, 16  ;;  %v1277_v58 = vrot.slane %v7068_v1, 1 }
 0x142   : > { %v929_v48 = vpack.c.bf16 %v910_v12, %v910_v12  ;;  %v713_v33 = vadd.f32 %v6864_v8, %v712_v20  ;;  %v1899_v41 = vrot.slane %v1897_v23, 3  ;;  %v2921_v47 = vrot.slane %v7451_v34, 3 }
 0x143   : > { %5702 = vmatmul.msk.bf16.gmra.mxu0 %vm1022_vm1, %v2149_v17  ;;  %v1902_v32 = vrot.slane %v1900_v52, 4  ;;  %v2922_v30 = vrot.slane %v7448_v45, 4  ;;  %v3326_v20 = vrot.slane %v7451_v34, 1  ;;  %v3327_v7 = vrot.slane %v7448_v45, 2 }
 0x144   : > { %v7464_v54 = vunpack.c.l.b16 %v929_v48  ;;  %v774_v36 = vadd.f32 %v773_v42, %v713_v33  ;;  %v9299_v52 = vrot.slane %v6984_v19, 1  ;;  %v891_v48 = vpop.permute.xlu0 %890  ;;  %v1745_v42 = vsel %vm1718_vm5, %v7387_v62, %v1744_v38 }
 0x145   : > { %v1903_v12 = vor.u32 %v1902_v32, %v1899_v41  ;;  %v2923_v8 = vor.u32 %v2922_v30, %v2921_v47  ;;  %v3328_v32 = vor.u32 %v3327_v7, %v3326_v20  ;;  %v7489_v30 = vpack.c.b16 %v6928_v6, %v2325_v22  ;;  %v6403_v6 = vld [vmem:[%s9159_s7 + $0xb8] sm:$0xff] }
 0x146   : > { %9298 = vst [vmem:[#allocation58_spill] sm:$0xff] %v7464_v54  ;;  %v2139_v14 = vpack.c.b16 %v7464_v54, %v7464_v54  ;;  %v797_v23 = vmax.f32 %v774_v36, 0.0  ;;  %v1274_v17 = vor.u32 %v6987_v21, %v9299_v52  ;;  %v2151_v52 = vrot.slane %v7360_v15, 1  ;;  %2841 = vmatpush.bf16.msrb.mxu0 %v6403_v6 }
 0x147   : > { %v7477_v33 = vsel %vm1089_vm3, %v1894_v5, %v1903_v12  ;;  %v7480_v41 = vsel %vm1089_vm3, %v2919_v0, %v2923_v8  ;;  %v7494_v0 = vsel %vm1430_vm6, %v7389_v57, %v3328_v32 }
 0x148   : > { %v7482_v3 = vshll.u32 %v2139_v14, 16  ;;  %v911_v47 = vmul.f32 %v891_v48, %v797_v23  ;;  %5490 = vmatmul.msk.bf16.vlgmr.msrb.gmra.mxu3 %vm1022_vm1, %v7078_v60  ;;  %5579 = vmatmul.msk.bf16.gmra.mxu1 %vm1022_vm1, %v1745_v42  ;;  %v1278_v36 = vsel %vm1261_vm7, %v1274_v17, %v1277_v58  ;;  %v2328_v14 = vshrl.u32 %v7489_v30, 16 }
 0x149   : > { %5449 = vmatmul.msk.bf16.gmra.mxu2 %vm1022_vm1, %v1278_v36  ;;  %v715_v62 = vpop.f32.mrf.mxu0  ;;  %v776_v5 = vpop.f32.mrf.mxu1  ;;  %v2331_v23 = vshll.u32 %v7489_v30, 16  ;;  %v9301_v17 = vshrl.u32 %v6923_v2, 16  ;;  %v9302_v42 = vshll.u32 %v6923_v2, 16  ;;  %v6402_v36 = vld [vmem:[%s9159_s7 + $0xb0] sm:$0xff] }
 0x14a   : > { %v930_v12 = vpack.c.bf16 %v911_v47, %v911_v47  ;;  %v2925_v20 = vrot.slane %v7482_v3, 4  ;;  %v2330_v15 = vrot.slane %v2328_v14, 1  ;;  %2842 = vmatpush.bf16.msrb.mxu0 %v6402_v36  ;;  %v6401_v14 = vld [vmem:[%s9159_s7 + $0xa8] sm:$0xff] }
 0x14b   : > { %v2335_v48 = vrot.slane %v9301_v17, 1  ;;  %v2336_v47 = vrot.slane %v9302_v42, 2 }
 0x14c   : > { %v3171_v7 = vunpack.c.l.b16 %v930_v12  ;;  %v7503_v22 = vsel %vm1089_vm3, %v2923_v8, %v2925_v20  ;;  %v2150_v8 = vor.u32 %v2148_v53, %v7260_v26  ;;  %v2333_v12 = vrot.slane %v2331_v23, 2 }
 0x14d   : > { %v2337_v26 = vor.u32 %v2336_v47, %v2335_v48  ;;  %v1281_v23 = vor.u32 %v7071_v50, %v1277_v58  ;;  %v6400_v58 = vld [vmem:[%s9159_s7 + $0xa0] sm:$0xff] }
 0x14e   : > { %v7508_v57 = vpack.c.b16 %v3171_v7, %v7464_v54  ;;  %v2152_v6 = vsel %vm1261_vm7, %v2150_v8, %v2151_v52  ;;  %v2334_v38 = vor.u32 %v2333_v12, %v2330_v15  ;;  %2843 = vmatpush.bf16.msrb.mxu0 %v6401_v14  ;;  %v2153_v15 = vor.u32 %v2151_v52, %v7357_v25  ;;  %v6398_v12 = vld [vmem:[%s9159_s7 + $0x90] sm:$0xff] }
 0x14f   : > { %v1285_v48 = vsel %vm1261_vm7, %v1281_v23, %v1284_v59  ;;  %v2164_v14 = vrot.slane %v7482_v3, 1  ;;  %v2343_v23 = vrot.slane %v7071_v50, 1 }
 0x150   : > { %9300 = vst [vmem:[#allocation59_spill] sm:$0xff] %v7508_v57  ;;  %v3331_v62 = vshrl.u32 %v7508_v57, 16  ;;  %v3334_v5 = vshll.u32 %v7508_v57, 16  ;;  %v2338_v36 = vsel %vm1430_vm6, %v2334_v38, %v2337_v26  ;;  %v2156_v38 = vrot.slane %v7448_v45, 1 }
 0x151   : > { %v716_v20 = vpop.f32.mrf.mxu0  ;;  %v777_v7 = vpop.f32.mrf.mxu1 }
 0x152   : > { %v3333_v17 = vrot.slane %v3331_v62, 1  ;;  %v3336_v42 = vrot.slane %v3334_v5, 2  ;;  %2844 = vmatpush.bf16.msrb.mxu0 %v6400_v58  ;;  %v2339_v62 = vrot.slane %v6987_v21, 1  ;;  %v2340_v5 = vrot.slane %v6984_v19, 2 }
 0x153   : > { %5703 = vmatmul.msk.bf16.gmra.mxu0 %vm1022_vm1, %v2152_v6  ;;  %v2157_v20 = vsel %vm1261_vm7, %v2153_v15, %v2156_v38  ;;  %v1288_v21 = vor.u32 %v7149_v44, %v1284_v59  ;;  %v2344_v59 = vrot.slane %v7068_v1, 2 }
 0x154   : > { %v7526_v53 = vor.u32 %v3336_v42, %v3333_v17  ;;  %v2341_v6 = vor.u32 %v2340_v5, %v2339_v62  ;;  %v1291_v17 = vrot.slane %v7222_v29, 1 }
 0x156   : > { %v7534_v8 = vsel %vm1430_vm6, %v3328_v32, %v7526_v53  ;;  %v6399_v32 = vld [vmem:[%s9159_s7 + $0x98] sm:$0xff]  ;;  %v2342_v19 = vsel %vm1430_vm6, %v2337_v26, %v2341_v6  ;;  %v1292_v25 = vsel %vm1261_vm7, %v1288_v21, %v1291_v17  ;;  %v2160_v26 = vor.u32 %v7451_v34, %v2156_v38  ;;  %v6367_v38 = vld [vmem:[%s9157_s5 + $0x148] sm:$0xff] }
 0x157   : > { %2845 = vmatpush.bf16.msrb.mxu0 %v6399_v32  ;;  %v2345_v32 = vor.u32 %v2344_v59, %v2343_v23  ;;  %v1295_v3 = vor.u32 %v7225_v16, %v1291_v17  ;;  %1961 = vmatpush.bf16.msrb.mxu2 %v6367_v38  ;;  %v6366_v17 = vld [vmem:[%s9157_s5 + $0x140] sm:$0xff]  ;;  %v6373_v21 = vld [vmem:[%s9157_s5 + $0x178] sm:$0xff] }
 0x158   : > { %5491 = vmatmul.msk.bf16.gmra.mxu3 %vm1022_vm1, %v7155_v56  ;;  %5742 = vmatmul.msk.bf16.vlgmr.msra.gmra.mxu1 %vm1022_vm1, %v2338_v36  ;;  %v2165_v36 = vsel %vm1261_vm7, %v2160_v26, %v2164_v14 }
 0x159   : > { %5450 = vmatmul.msk.bf16.gmra.mxu2 %vm1022_vm1, %v1285_v48  ;;  %v2346_v50 = vsel %vm1430_vm6, %v2341_v6, %v2345_v32  ;;  %2075 = vmatpush.bf16.msrb.mxu3 %v6373_v21  ;;  %v6363_v21 = vld [vmem:[%s9157_s5 + $0x128] sm:$0xff] }
 0x15b   : > { %v1050_v47 = vpop.f32.mrf.mxu2  ;;  %2846 = vmatpush.bf16.msrb.mxu0 %v6398_v12  ;;  %1962 = vmatpush.bf16.msrb.mxu2 %v6366_v17  ;;  %v6370_v17 = vld [vmem:[%s9157_s5 + $0x160] sm:$0xff] }
 0x163   : > { %v1052_v7 = vpop.f32.mrf.mxu2  ;;  %5704 = vmatmul.msk.bf16.gmra.mxu0 %vm1022_vm1, %v2157_v20 }
 0x168   : > { %5492 = vmatmul.msk.bf16.gmra.mxu3 %vm1022_vm1, %v7231_v35  ;;  %5743 = vmatmul.msk.bf16.gmra.mxu1 %vm1022_vm1, %v2342_v19  ;;  %v2347_v19 = vrot.slane %v7149_v44, 1  ;;  %v6365_v44 = vld [vmem:[%s9157_s5 + $0x138] sm:$0xff] }
 0x169   : > { %5451 = vmatmul.msk.bf16.gmra.mxu2 %vm1022_vm1, %v1292_v25  ;;  %v2348_v25 = vrot.slane %v7146_v18, 2  ;;  %v6372_v18 = vld [vmem:[%s9157_s5 + $0x170] sm:$0xff] }
 0x16a   : > { %v1215_v45 = vpop.f32.mrf.mxu3  ;;  %1963 = vmatpush.bf16.msrb.mxu2 %v6365_v44  ;;  %2076 = vmatpush.bf16.msrb.mxu3 %v6372_v18 }
 0x16b   : > { %v1055_v52 = vpop.f32.mrf.mxu2  ;;  %v7565_v42 = vadd.f32 %v1215_v45, %v1050_v47  ;;  %v1298_v47 = vrot.slane %v7322_v9, 1  ;;  %v2349_v14 = vor.u32 %v2348_v25, %v2347_v19  ;;  %v2767_v19 = vrot.slane %v6999_v51, 3 }
 0x16c   : > { %v2351_v25 = vrot.slane %v7225_v16, 1 }
 0x16d   : > { %v1299_v1 = vsel %vm1261_vm7, %v1295_v3, %v1298_v47 }
 0x170   : > { %v7584_v34 = vpop.f32.mrf.mxu0 }
 0x172   : > { %v1217_v48 = vpop.f32.mrf.mxu3 }
 0x173   : > { %v1057_v58 = vpop.f32.mrf.mxu2  ;;  %5705 = vmatmul.msk.bf16.gmra.mxu0 %vm1022_vm1, %v2165_v36  ;;  %v7573_v62 = vadd.f32 %v1217_v48, %v1052_v7  ;;  %v1260_v7 = vpack.c.b16 %v7330_v37, %v7330_v37  ;;  %v6409_v48 = vld [vmem:[%s9159_s7 + $0xe8] sm:$0xff] }
 0x174   : > { %2974 = vmatpush.bf16.msrb.mxu1 %v6409_v48 }
 0x175   : > { %v7576_v5 = vpop.f32.mrf.mxu1  ;;  %v1304_v45 = vshll.u32 %v1260_v7, 16 }
 0x177   : > { %v1306_v26 = vrot.slane %v1304_v45, 1  ;;  %v6369_v45 = vld [vmem:[%s9157_s5 + $0x158] sm:$0xff] }
 0x178   : > { %5493 = vmatmul.msk.bf16.gmra.mxu3 %vm1022_vm1, %v7313_v61  ;;  %5744 = vmatmul.msk.bf16.gmra.mxu1 %vm1022_vm1, %v2346_v50  ;;  %v6364_v50 = vld [vmem:[%s9157_s5 + $0x130] sm:$0xff] }
 0x179   : > { %5452 = vmatmul.msk.bf16.gmra.mxu2 %vm1022_vm1, %v1299_v1 }
 0x17a   : > { %1964 = vmatpush.bf16.msrb.mxu2 %v6364_v50 }
 0x17b   : > { %v1220_v15 = vpop.f32.mrf.mxu3 }
 0x17c   : > { %v7590_v12 = vadd.f32 %v1220_v15, %v1055_v52  ;;  %v1060_v20 = vpop.f32.mrf.mxu2  ;;  %v7604_v52 = vpop.f32.mrf.mxu0 }
 0x17d   : > { %v7594_v6 = vpop.f32.mrf.mxu1 }
 0x17e   : > { %1965 = vmatpush.bf16.msrb.mxu2 %v6363_v21 }
 0x183   : > { %v1222_v37 = vpop.f32.mrf.mxu3  ;;  %5862 = vmatmul.msk.bf16.vlgmr.msrb.gmra.mxu0 %vm1022_vm1, %v6964_v63  ;;  %v1302_v63 = vor.u32 %v7325_v27, %v1298_v47  ;;  %v6371_v47 = vld [vmem:[%s9157_s5 + $0x168] sm:$0xff] }
 0x184   : > { %v7608_v23 = vadd.f32 %v1222_v37, %v1057_v58  ;;  %v1062_v59 = vpop.f32.mrf.mxu2  ;;  %v2350_v58 = vsel %vm1430_vm6, %v2345_v32, %v2349_v14  ;;  %2077 = vmatpush.bf16.msrb.mxu3 %v6371_v47  ;;  %v7636_v15 = vpop.f32.mrf.mxu0  ;;  %v9303_v37 = vrot.slane %v6939_v28, 3 }
 0x185   : > { %v7613_v36 = vpop.f32.mrf.mxu1  ;;  %v1307_v3 = vsel %vm1261_vm7, %v1302_v63, %v1306_v26  ;;  %v6362_v63 = vld [vmem:[%s9157_s5 + $0x120] sm:$0xff] }
 0x186   : > { %v2768_v26 = vsel %vm2763_vm2, %v9303_v37, %v2767_v19  ;;  %1966 = vmatpush.bf16.msrb.mxu2 %v6362_v63  ;;  %v2355_v37 = vrot.slane %v7325_v27, 1 }
 0x188   : > { %5494 = vmatmul.msk.bf16.gmra.mxu3 %vm1022_vm1, %v7407_v49  ;;  %5745 = vmatmul.msk.bf16.gmra.mxu1 %vm1022_vm1, %v2350_v58 }
 0x189   : > { %5453 = vmatmul.msk.bf16.gmra.mxu2 %vm1022_vm1, %v1307_v3  ;;  %2078 = vmatpush.bf16.msrb.mxu3 %v6370_v17  ;;  %v6368_v3 = vld [vmem:[%s9157_s5 + $0x150] sm:$0xff]  ;;  %v6385_v17 = vld [vmem:[%s9159_s7 + $0x28] sm:$0xff] }
 0x18b   : > { %v1225_v32 = vpop.f32.mrf.mxu3 }
 0x18c   : > { %v7634_v1 = vadd.f32 %v1225_v32, %v1060_v20  ;;  %v1065_v38 = vpop.f32.mrf.mxu2  ;;  %v2352_v20 = vrot.slane %v7222_v29, 2  ;;  %v1594_v29 = vrot.slane %v7242_v43, 2  ;;  %v7667_v50 = vpop.f32.mrf.mxu0 }
 0x18d   : > { %v7638_v7 = vpop.f32.mrf.mxu1  ;;  %2079 = vmatpush.bf16.msrb.mxu3 %v6369_v45  ;;  %v2769_v45 = vrot.slane %v7088_v31, 3 }
 0x18e   : > { %v2353_v18 = vor.u32 %v2352_v20, %v2351_v25 }
 0x18f   : > { %v2770_v63 = vsel %vm2763_vm2, %v2767_v19, %v2769_v45 }
 0x190   : > { %v2354_v47 = vsel %vm1430_vm6, %v2349_v14, %v2353_v18 }
 0x191   : > { %2080 = vmatpush.bf16.msrb.mxu3 %v6368_v3  ;;  %v1598_v3 = vrot.slane %v7392_v13, 2 }
 0x193   : > { %v1227_v44 = vpop.f32.mrf.mxu3  ;;  %5863 = vmatmul.msk.bf16.gmra.mxu0 %vm1022_vm1, %v2768_v26  ;;  %v2356_v26 = vrot.slane %v7322_v9, 2  ;;  %v6397_v9 = vld [vmem:[%s9159_s7 + $0x88] sm:$0xff] }
 0x194   : > { %v7656_v48 = vadd.f32 %v1227_v44, %v1062_v59  ;;  %v1067_v16 = vpop.f32.mrf.mxu2  ;;  %v9304_v59 = vrot.slane %v7162_v11, 2  ;;  %v7693_v44 = vpop.f32.mrf.mxu0 }
 0x195   : > { %v7662_v58 = vpop.f32.mrf.mxu1 }
 0x196   : > { %v7676_v32 = vsel %vm1586_vm4, %v9304_v59, %v1594_v29 }
 0x197   : > { %9305 = vst [vmem:[#allocation60_spill] sm:$0xff] %v7676_v32 }
 0x198   : > { %5495 = vmatmul.msk.bf16.gmra.mxu3 %vm1022_vm1, %v7437_v40  ;;  %5746 = vmatmul.msk.bf16.gmra.mxu1 %vm1022_vm1, %v2354_v47  ;;  %v6408_v40 = vld [vmem:[%s9159_s7 + $0xe0] sm:$0xff]  ;;  %v2357_v47 = vor.u32 %v2356_v26, %v2355_v37 }
 0x199   : > { %5535 = vmatmul.msk.bf16.vlgmr.msra.gmra.mxu2 %vm1022_vm1, %v7676_v32  ;;  %2975 = vmatpush.bf16.msrb.mxu1 %v6408_v40 }
 0x19a   : > { %2550 = vmatpush.bf16.msra.mxu2 %v6385_v17  ;;  %v2358_v19 = vsel %vm1430_vm6, %v2353_v18, %v2357_v47  ;;  %v6407_v18 = vld [vmem:[%s9159_s7 + $0xd8] sm:$0xff] }
 0x19b   : > { %v1230_v21 = vpop.f32.mrf.mxu3 }
 0x19c   : > { %v7683_v14 = vadd.f32 %v1230_v21, %v1065_v38  ;;  %v1070_v25 = vpop.f32.mrf.mxu2  ;;  %v7701_v21 = vrot.slane %v7342_v55, 2  ;;  %v7725_v37 = vpop.f32.mrf.mxu0 }
 0x19d   : > { %v7688_v20 = vpop.f32.mrf.mxu1  ;;  %2976 = vmatpush.bf16.msrb.mxu1 %v6407_v18  ;;  %v6405_v18 = vld [vmem:[%s9159_s7 + $0xc8] sm:$0xff] }
 0x19e   : > { %9306 = vst [vmem:[#allocation61_spill] sm:$0xff] %v7701_v21  ;;  %v1599_v27 = vsel %vm1586_vm4, %v7701_v21, %v1598_v3  ;;  %v7715_v13 = vsel %vm1586_vm4, %v1594_v29, %v7701_v21  ;;  %v2771_v3 = vrot.slane %v7162_v11, 3 }
 0x19f   : > { %9307 = vst [vmem:[#allocation62_spill] sm:$0xff] %v7715_v13 }
 0x1a3   : > { %v1232_v38 = vpop.f32.mrf.mxu3  ;;  %5864 = vmatmul.msk.bf16.gmra.mxu0 %vm1022_vm1, %v2770_v63 }
 0x1a4   : > { %v7698_v59 = vadd.f32 %v1232_v38, %v1067_v16  ;;  %v1072_v17 = vpop.f32.mrf.mxu2  ;;  %v6384_v16 = vld [vmem:[%s9159_s7 + $0x20] sm:$0xff] }
 0x1a5   : > { %v7703_v40 = vpop.f32.mrf.mxu1  ;;  %2551 = vmatpush.bf16.msra.mxu2 %v6384_v16  ;;  %v9309_v16 = vshll.u32 %v7395_v46, 16 }
 0x1a8   : > { %5537 = vmatmul.msk.bf16.vlgmr.msra.gmra.mxu3 %vm1022_vm1, %v1599_v27  ;;  %5747 = vmatmul.msk.bf16.gmra.mxu1 %vm1022_vm1, %v2358_v19  ;;  %v6406_v27 = vld [vmem:[%s9159_s7 + $0xd0] sm:$0xff]  ;;  %v9308_v19 = vshrl.u32 %v7395_v46, 16 }
 0x1a9   : > { %5536 = vmatmul.msk.bf16.gmra.mxu2 %vm1022_vm1, %v7715_v13  ;;  %2687 = vmatpush.bf16.msra.mxu3 %v6397_v9  ;;  %v6396_v9 = vld [vmem:[%s9159_s7 + $0x80] sm:$0xff] }
 0x1aa   : > { %v2359_v24 = vrot.slane %v9308_v19, 1  ;;  %2977 = vmatpush.bf16.msrb.mxu1 %v6406_v27  ;;  %v7749_v19 = vpop.f32.mrf.mxu0 }
 0x1ab   : > { %v1235_v26 = vpop.f32.mrf.mxu3 }
 0x1ac   : > { %v7727_v63 = vadd.f32 %v1235_v26, %v1070_v25  ;;  %v1075_v29 = vpop.f32.mrf.mxu2  ;;  %v2360_v25 = vrot.slane %v9309_v16, 2  ;;  %v2772_v26 = vsel %vm2763_vm2, %v2769_v45, %v2771_v3 }
 0x1ad   : > { %v7729_v38 = vpop.f32.mrf.mxu1  ;;  %2688 = vmatpush.bf16.msra.mxu3 %v6396_v9  ;;  %v6404_v9 = vld [vmem:[%s9159_s7 + $0xc0] sm:$0xff] }
 0x1ae   : > { %v2361_v57 = vor.u32 %v2360_v25, %v2359_v24  ;;  %2978 = vmatpush.bf16.msrb.mxu1 %v6405_v18  ;;  %v9310_v24 = vld [vmem:[#allocation32_spill] sm:$0xff]  ;;  %v2773_v18 = vrot.slane %v7242_v43, 3 }
 0x1b0   : > { %v2362_v27 = vsel %vm1430_vm6, %v2357_v47, %v2361_v57 }
 0x1b2   : > { %2979 = vmatpush.bf16.msrb.mxu1 %v6404_v9  ;;  %v7774_v9 = vpop.f32.mrf.mxu0 }
 0x1b3   : > { %v1237_v54 = vpop.f32.mrf.mxu3  ;;  %5865 = vmatmul.msk.bf16.gmra.mxu0 %vm1022_vm1, %v2772_v26  ;;  %v6395_v26 = vld [vmem:[%s9159_s7 + $0x78] sm:$0xff] }
 0x1b4   : > { %v7747_v21 = vadd.f32 %v1237_v54, %v1072_v17  ;;  %v1077_v13 = vpop.f32.mrf.mxu2  ;;  %v6383_v54 = vld [vmem:[%s9159_s7 + $0x18] sm:$0xff]  ;;  %2689 = vmatpush.bf16.msra.mxu3 %v6395_v26  ;;  %v9312_v26 = vld [vmem:[#allocation40_spill] sm:$0xff] }
 0x1b5   : > { %v7751_v28 = vpop.f32.mrf.mxu1  ;;  %2552 = vmatpush.bf16.msra.mxu2 %v6383_v54 }
 0x1b8   : > { %5658 = vmatmul.msk.bf16.vlgmr.msrb.gmra.mxu3 %vm1022_vm1, %v6999_v51  ;;  %5748 = vmatmul.msk.bf16.gmra.mxu1 %vm1022_vm1, %v2362_v27  ;;  %v2774_v27 = vsel %vm2763_vm2, %v2771_v3, %v2773_v18 }
 0x1b9   : > { %5616 = vmatmul.msk.bf16.vlgmr.msrb.gmra.mxu2 %vm1022_vm1, %v9310_v24 }
 0x1bb   : > { %v1240_v45 = vpop.f32.mrf.mxu3 }
 0x1bc   : > { %v7765_v17 = vadd.f32 %v1240_v45, %v1075_v29  ;;  %v1371_v16 = vpop.f32.mrf.mxu2 }
 0x1bd   : > { %v1401_v47 = vadd.f32 %v1371_v16, %v7565_v42  ;;  %v7768_v25 = vpop.f32.mrf.mxu1  ;;  %v7786_v16 = vpop.f32.mrf.mxu0 }
 0x1c3   : > { %v1242_v24 = vpop.f32.mrf.mxu3  ;;  %5866 = vmatmul.msk.bf16.gmra.mxu0 %vm1022_vm1, %v2774_v27 }
 0x1c4   : > { %v7778_v29 = vadd.f32 %v1242_v24, %v1077_v13  ;;  %v1373_v54 = vpop.f32.mrf.mxu2  ;;  %v6382_v13 = vld [vmem:[%s9159_s7 + $0x10] sm:$0xff] }
 0x1c5   : > { %v1402_v42 = vadd.f32 %v1373_v54, %v7573_v62  ;;  %v7781_v45 = vpop.f32.mrf.mxu1  ;;  %2553 = vmatpush.bf16.msra.mxu2 %v6382_v13  ;;  %v7809_v13 = vpop.f32.mrf.mxu0 }
 0x1c6   : > { %9311 = vst [vmem:[#allocation32_spill] sm:$0xff] %v7781_v45 }
 0x1c8   : > { %5659 = vmatmul.msk.bf16.gmra.mxu3 %vm1022_vm1, %v7088_v31  ;;  %5749 = vmatmul.msk.bf16.gmra.mxu1 %vm1022_vm1, %v2361_v57  ;;  %v2775_v57 = vrot.slane %v7342_v55, 3  ;;  %v6394_v31 = vld [vmem:[%s9159_s7 + $0x70] sm:$0xff] }
 0x1c9   : > { %5617 = vmatmul.msk.bf16.gmra.mxu2 %vm1022_vm1, %v9312_v26  ;;  %v6427_v26 = vld [vmem:[%s9159_s7 + $0x178] sm:$0xff]  ;;  %2690 = vmatpush.bf16.msra.mxu3 %v6394_v31  ;;  %v6425_v31 = vld [vmem:[%s9159_s7 + $0x168] sm:$0xff] }
 0x1ca   : > { %3386 = vmatpush.bf16.msra.mxu0 %v6427_v26  ;;  %v9316_v26 = vld [vmem:[#allocation48_spill] sm:$0xff] }
 0x1cb   : > { %v1531_v3 = vpop.f32.mrf.mxu3 }
 0x1cc   : > { %v7793_v27 = vadd.f32 %v1531_v3, %v1401_v47  ;;  %v1376_v62 = vpop.f32.mrf.mxu2  ;;  %v6426_v47 = vld [vmem:[%s9159_s7 + $0x170] sm:$0xff] }
 0x1cd   : > { %v1403_v24 = vadd.f32 %v1376_v62, %v7590_v12  ;;  %v7796_v54 = vpop.f32.mrf.mxu1  ;;  %v2776_v12 = vsel %vm2763_vm2, %v2773_v18, %v2775_v57  ;;  %v9315_v18 = vld [vmem:[#allocation22_spill] sm:$0xff] }
 0x1ce   : > { %9313 = vst [vmem:[#allocation40_spill] sm:$0xff] %v7796_v54  ;;  %3387 = vmatpush.bf16.msra.mxu0 %v6426_v47 }
 0x1d2   : > { %3388 = vmatpush.bf16.msra.mxu0 %v6425_v31 }
 0x1d3   : > { %v1533_v3 = vpop.f32.mrf.mxu3  ;;  %5867 = vmatmul.msk.bf16.gmra.mxu0 %vm1022_vm1, %v2776_v12 }
 0x1d4   : > { %v7812_v62 = vadd.f32 %v1533_v3, %v1402_v42  ;;  %v1378_v51 = vpop.f32.mrf.mxu2  ;;  %v6393_v3 = vld [vmem:[%s9159_s7 + $0x68] sm:$0xff] }
 0x1d5   : > { %v1404_v54 = vadd.f32 %v1378_v51, %v7608_v23  ;;  %v7815_v45 = vpop.f32.mrf.mxu1  ;;  %v6381_v51 = vld [vmem:[%s9159_s7 + $0x8] sm:$0xff]  ;;  %v6424_v23 = vld [vmem:[%s9159_s7 + $0x160] sm:$0xff]  ;;  %2691 = vmatpush.bf16.msra.mxu3 %v6393_v3 }
 0x1d6   : > { %9314 = vst [vmem:[#allocation63_spill] sm:$0xff] %v7815_v45  ;;  %2554 = vmatpush.bf16.msra.mxu2 %v6381_v51  ;;  %3389 = vmatpush.bf16.msra.mxu0 %v6424_v23  ;;  %v2777_v51 = vrot.slane %v7433_v39, 3 }
 0x1d8   : > { %5660 = vmatmul.msk.bf16.gmra.mxu3 %vm1022_vm1, %v7162_v11  ;;  %5906 = vmatmul.msk.bf16.vlgmr.msrb.gmra.mxu1 %vm1022_vm1, %v9315_v18  ;;  %v7837_v18 = vpop.f32.mrf.mxu0  ;;  %v6423_v11 = vld [vmem:[%s9159_s7 + $0x158] sm:$0xff] }
 0x1d9   : > { %5618 = vmatmul.msk.bf16.gmra.mxu2 %vm1022_vm1, %v9316_v26 }
 0x1da   : > { %3390 = vmatpush.bf16.msra.mxu0 %v6423_v11  ;;  %v9319_v11 = vld [vmem:[#allocation29_spill] sm:$0xff] }
 0x1db   : > { %v1536_v42 = vpop.f32.mrf.mxu3 }
 0x1dc   : > { %v7832_v47 = vadd.f32 %v1536_v42, %v1403_v24  ;;  %v1381_v12 = vpop.f32.mrf.mxu2  ;;  %v6422_v24 = vld [vmem:[%s9159_s7 + $0x150] sm:$0xff]  ;;  %v2778_v42 = vsel %vm2763_vm2, %v2775_v57, %v2777_v51  ;;  %v9320_v57 = vld [vmem:[#allocation55_spill] sm:$0xff] }
 0x1dd   : > { %v1405_v31 = vadd.f32 %v1381_v12, %v7634_v1  ;;  %v7840_v26 = vpop.f32.mrf.mxu1 }
 0x1de   : > { %9317 = vst [vmem:[#allocation22_spill] sm:$0xff] %v7840_v26  ;;  %3391 = vmatpush.bf16.msra.mxu0 %v6422_v24  ;;  %v6392_v24 = vld [vmem:[%s9159_s7 + $0x60] sm:$0xff] }
 0x1df   : > { %2692 = vmatpush.bf16.msra.mxu3 %v6392_v24  ;;  %v6421_v24 = vld [vmem:[%s9159_s7 + $0x148] sm:$0xff] }
 0x1e0   : > { %v7856_v32 = vpop.f32.mrf.mxu0 }
 0x1e3   : > { %v1538_v45 = vpop.f32.mrf.mxu3  ;;  %5868 = vmatmul.msk.bf16.gmra.mxu0 %vm1022_vm1, %v2778_v42  ;;  %3250 = vmatpush.bf16.msrb.mxu3 %v6421_v24  ;;  %v6414_v24 = vld [vmem:[%s9159_s7 + $0x110] sm:$0xff] }
 0x1e4   : > { %v7851_v1 = vadd.f32 %v1538_v45, %v1404_v54  ;;  %v1383_v23 = vpop.f32.mrf.mxu2  ;;  %v6380_v45 = vld [vmem:[%s9159_s7] sm:$0xff] }
 0x1e5   : > { %v1406_v12 = vadd.f32 %v1383_v23, %v7656_v48  ;;  %v7854_v26 = vpop.f32.mrf.mxu1  ;;  %2555 = vmatpush.bf16.msra.mxu2 %v6380_v45 }
 0x1e6   : > { %9318 = vst [vmem:[#allocation48_spill] sm:$0xff] %v7854_v26  ;;  %v9323_v26 = vld [vmem:[#allocation37_spill] sm:$0xff] }
 0x1e8   : > { %5661 = vmatmul.msk.bf16.gmra.mxu3 %vm1022_vm1, %v7242_v43  ;;  %5907 = vmatmul.msk.bf16.gmra.mxu1 %vm1022_vm1, %v9319_v11  ;;  %v7875_v11 = vpop.f32.mrf.mxu0 }
 0x1e9   : > { %5619 = vmatmul.msk.bf16.gmra.mxu2 %vm1022_vm1, %v9320_v57 }
 0x1eb   : > { %v1541_v54 = vpop.f32.mrf.mxu3 }
 0x1ec   : > { %v7867_v48 = vadd.f32 %v1541_v54, %v1405_v31  ;;  %v1386_v3 = vpop.f32.mrf.mxu2 }
 0x1ed   : > { %v1407_v42 = vadd.f32 %v1386_v3, %v7683_v14  ;;  %v7873_v23 = vpop.f32.mrf.mxu1  ;;  %v6415_v14 = vld [vmem:[%s9159_s7 + $0x118] sm:$0xff] }
 0x1ee   : > { %9321 = vst [vmem:[#allocation29_spill] sm:$0xff] %v7873_v23  ;;  %3094 = vmatpush.bf16.msrb.mxu2 %v6415_v14 }
 0x1f2   : > { %3095 = vmatpush.bf16.msrb.mxu2 %v6414_v24 }
 0x1f3   : > { %v1543_v57 = vpop.f32.mrf.mxu3  ;;  %5869 = vmatmul.msk.bf16.gmra.mxu0 %vm1022_vm1, %v2777_v51  ;;  %v7892_v51 = vpop.f32.mrf.mxu0 }
 0x1f4   : > { %v7878_v43 = vadd.f32 %v1543_v57, %v1406_v12  ;;  %v1388_v45 = vpop.f32.mrf.mxu2 }
 0x1f5   : > { %v1408_v31 = vadd.f32 %v1388_v45, %v7698_v59  ;;  %v7881_v54 = vpop.f32.mrf.mxu1 }
 0x1f6   : > { %9322 = vst [vmem:[#allocation55_spill] sm:$0xff] %v7881_v54 }
 0x1f8   : > { %5662 = vmatmul.msk.bf16.gmra.mxu3 %vm1022_vm1, %v7342_v55  ;;  %5908 = vmatmul.msk.bf16.gmra.mxu1 %vm1022_vm1, %v9323_v26 }
 0x1f9   : > { %5620 = vmatmul.msk.bf16.gmra.mxu2 %vm1022_vm1, %v7455_v10 }
 0x1fb   : > { %v1546_v12 = vpop.f32.mrf.mxu3  ;;  %v7902_v54 = vpop.f32.mrf.mxu0 }
 0x1fc   : > { %v1567_v59 = vadd.f32 %v1546_v12, %v1407_v42  ;;  %v1391_v3 = vpop.f32.mrf.mxu2  ;;  %v6433_v12 = vld [vmem:[%s9159_s7 + $0x1a8] sm:$0xff] }
 0x1fd   : > { %v1409_v57 = vadd.f32 %v1391_v3, %v7727_v63  ;;  %v7898_v26 = vpop.f32.mrf.mxu1  ;;  %3513 = vmatpush.bf16.msra.mxu1 %v6433_v12  ;;  %v9326_v63 = vld [vmem:[#allocation44_spill] sm:$0xff]  ;;  %v6420_v12 = vld [vmem:[%s9159_s7 + $0x140] sm:$0xff] }
 0x1fe   : > { %9324 = vst [vmem:[#allocation37_spill] sm:$0xff] %v7898_v26  ;;  %3251 = vmatpush.bf16.msrb.mxu3 %v6420_v12 }
 0x203   : > { %v1548_v10 = vpop.f32.mrf.mxu3  ;;  %6038 = vmatmul.msk.bf16.vlgmr.msra.gmra.mxu0 %vm1022_vm1, %v7078_v60 }
 0x204   : > { %v1568_v45 = vadd.f32 %v1548_v10, %v1408_v31  ;;  %v1393_v55 = vpop.f32.mrf.mxu2  ;;  %v7922_v10 = vpop.f32.mrf.mxu0 }
 0x205   : > { %v1410_v42 = vadd.f32 %v1393_v55, %v7747_v21  ;;  %v7905_v14 = vpop.f32.mrf.mxu1 }
 0x206   : > { %9325 = vst [vmem:[#allocation64_spill] sm:$0xff] %v7905_v14  ;;  %v2473_v14 = vrot.slane %v7489_v30, 1 }
 0x208   : > { %5663 = vmatmul.msk.bf16.gmra.mxu3 %vm1022_vm1, %v7433_v39  ;;  %5909 = vmatmul.msk.bf16.gmra.mxu1 %vm1022_vm1, %v9326_v63 }
 0x209   : > { %5621 = vmatmul.msk.bf16.gmra.mxu2 %vm1022_vm1, %v7477_v33 }
 0x20b   : > { %v1551_v60 = vpop.f32.mrf.mxu3 }
 0x20c   : > { %v1569_v31 = vadd.f32 %v1551_v60, %v1409_v57  ;;  %v1396_v3 = vpop.f32.mrf.mxu2  ;;  %v2474_v60 = vrot.slane %v6923_v2, 1 }
 0x20d   : > { %v1411_v55 = vadd.f32 %v1396_v3, %v7765_v17  ;;  %v7917_v21 = vpop.f32.mrf.mxu1  ;;  %v2611_v17 = vrot.slane %v6923_v2, 2 }
 0x20e   : > { %9327 = vst [vmem:[#allocation44_spill] sm:$0xff] %v7917_v21  ;;  %v2610_v21 = vrot.slane %v7489_v30, 2 }
 0x210   : > { %v2612_v12 = vsel %vm1586_vm4, %v2610_v21, %v2611_v17 }
 0x213   : > { %v1553_v33 = vpop.f32.mrf.mxu3  ;;  %6039 = vmatmul.msk.bf16.gmra.mxu0 %vm1022_vm1, %v7155_v56  ;;  %v9329_v56 = vld [vmem:[#allocation51_spill] sm:$0xff] }
 0x214   : > { %v1570_v57 = vadd.f32 %v1553_v33, %v1410_v42  ;;  %v1398_v63 = vpop.f32.mrf.mxu2  ;;  %v2475_v42 = vsel %vm2472_vm8, %v2473_v14, %v2474_v60  ;;  %v7941_v33 = vpop.f32.mrf.mxu0  ;;  %v9332_v14 = vld [vmem:[#allocation21_spill] sm:$0xff] }
 0x215   : > { %v1412_v3 = vadd.f32 %v1398_v63, %v7778_v29  ;;  %v7933_v24 = vpop.f32.mrf.mxu1  ;;  %9330 = vst [vmem:[#allocation51_spill] sm:$0xff] %v7941_v33  ;;  %v6432_v63 = vld [vmem:[%s9159_s7 + $0x1a0] sm:$0xff]  ;;  %v2476_v2 = vrot.slane %v9332_v14, 1 }
 0x216   : > { %9328 = vst [vmem:[#allocation65_spill] sm:$0xff] %v7933_v24  ;;  %3514 = vmatpush.bf16.msra.mxu1 %v6432_v63 }
 0x218   : > { %5818 = vmatmul.msk.bf16.vlgmr.msra.gmra.mxu3 %vm1022_vm1, %v2612_v12  ;;  %5910 = vmatmul.msk.bf16.gmra.mxu1 %vm1022_vm1, %v9329_v56 }
 0x219   : > { %5774 = vmatmul.msk.bf16.vlgmr.msra.gmra.mxu2 %vm1022_vm1, %v2475_v42  ;;  %v2613_v42 = vrot.slane %v9332_v14, 2 }
 0x21b   : > { %v1556_v29 = vpop.f32.mrf.mxu3 }
 0x21c   : > { %v1571_v24 = vadd.f32 %v1556_v29, %v1411_v55  ;;  %v1678_v30 = vpop.f32.mrf.mxu2  ;;  %v7951_v12 = vpop.f32.mrf.mxu0  ;;  %v2477_v55 = vsel %vm2472_vm8, %v2474_v60, %v2476_v2 }
 0x21d   : > { %v7947_v26 = vadd.f32 %v1678_v30, %v1567_v59  ;;  %v7949_v21 = vpop.f32.mrf.mxu1  ;;  %v2614_v59 = vsel %vm1586_vm4, %v2611_v17, %v2613_v42  ;;  %v6419_v17 = vld [vmem:[%s9159_s7 + $0x138] sm:$0xff] }
 0x21e   : > { %9331 = vst [vmem:[#allocation66_spill] sm:$0xff] %v7949_v21  ;;  %3252 = vmatpush.bf16.msrb.mxu3 %v6419_v17 }
 0x223   : > { %v1558_v56 = vpop.f32.mrf.mxu3  ;;  %6040 = vmatmul.msk.bf16.gmra.mxu0 %vm1022_vm1, %v7231_v35 }
 0x224   : > { %v1572_v23 = vadd.f32 %v1558_v56, %v1412_v3  ;;  %v1680_v39 = vpop.f32.mrf.mxu2  ;;  %v7969_v30 = vpop.f32.mrf.mxu0  ;;  %v6430_v56 = vld [vmem:[%s9159_s7 + $0x190] sm:$0xff] }
 0x225   : > { %v7957_v33 = vadd.f32 %v1680_v39, %v1568_v45  ;;  %v7965_v35 = vpop.f32.mrf.mxu1  ;;  %v6431_v45 = vld [vmem:[%s9159_s7 + $0x198] sm:$0xff] }
 0x226   : > { %3515 = vmatpush.bf16.msra.mxu1 %v6431_v45 }
 0x228   : > { %5819 = vmatmul.msk.bf16.gmra.mxu3 %vm1022_vm1, %v2614_v59  ;;  %5911 = vmatmul.msk.bf16.gmra.mxu1 %vm1022_vm1, %v7441_v4  ;;  %v6413_v4 = vld [vmem:[%s9159_s7 + $0x108] sm:$0xff] }
 0x229   : > { %5775 = vmatmul.msk.bf16.gmra.mxu2 %vm1022_vm1, %v2477_v55 }
 0x22a   : > { %3096 = vmatpush.bf16.msrb.mxu2 %v6413_v4  ;;  %3516 = vmatpush.bf16.msra.mxu1 %v6430_v56 }
 0x22b   : > { %v1688_v29 = vpop.f32.mrf.mxu3 }
 0x22c   : > { %v7967_v3 = vadd.f32 %v1688_v29, %v1571_v24  ;;  %v1683_v63 = vpop.f32.mrf.mxu2  ;;  %v9333_v24 = vld [vmem:[#allocation28_spill] sm:$0xff]  ;;  %v7997_v21 = vpop.f32.mrf.mxu0 }
 0x22d   : > { %v7971_v39 = vadd.f32 %v1683_v63, %v1569_v31  ;;  %v2615_v31 = vrot.slane %v9333_v24, 2  ;;  %v7988_v59 = vpop.f32.mrf.mxu1  ;;  %v2478_v63 = vrot.slane %v9333_v24, 1  ;;  %9335 = vst [vmem:[#allocation28_spill] sm:$0xff] %v7997_v21 }
 0x22e   : > { %9334 = vst [vmem:[#allocation21_spill] sm:$0xff] %v7988_v59  ;;  %v6429_v59 = vld [vmem:[%s9159_s7 + $0x188] sm:$0xff] }
 0x22f   : > { %v2616_v4 = vsel %vm1586_vm4, %v2613_v42, %v2615_v31  ;;  %3517 = vmatpush.bf16.msra.mxu1 %v6429_v59 }
 0x233   : > { %v1690_v60 = vpop.f32.mrf.mxu3  ;;  %6041 = vmatmul.msk.bf16.gmra.mxu0 %vm1022_vm1, %v7313_v61  ;;  %v1693_v61 = vadd.f32 %v7584_v34, %v7793_v27  ;;  %v6428_v27 = vld [vmem:[%s9159_s7 + $0x180] sm:$0xff] }
 0x234   : > { %v7990_v55 = vadd.f32 %v1690_v60, %v1572_v23  ;;  %v1685_v29 = vpop.f32.mrf.mxu2  ;;  %v2479_v23 = vsel %vm2472_vm8, %v2476_v2, %v2478_v63  ;;  %3518 = vmatpush.bf16.msra.mxu1 %v6428_v27  ;;  %v8019_v2 = vld [vmem:[%s9158_s6] ss:$0 sm:$0xff]  ;;  %v8021_v59 = vpop.f32.mrf.mxu0 }
 0x235   : > { %v7993_v45 = vadd.f32 %v1685_v29, %v1570_v57  ;;  %v1839_v34 = vadd.f32 %v7576_v5, %v1693_v61  ;;  %v8012_v60 = vpop.f32.mrf.mxu1  ;;  %9336 = vst [vmem:[#allocation67_spill] sm:$0xff] %v8021_v59  ;;  %v6412_v29 = vld [vmem:[%s9159_s7 + $0x100] sm:$0xff]  ;;  %v6418_v61 = vld [vmem:[%s9159_s7 + $0x130] sm:$0xff] }
 0x236   : > { %3097 = vmatpush.bf16.msrb.mxu2 %v6412_v29  ;;  %3253 = vmatpush.bf16.msrb.mxu3 %v6418_v61 }
 0x238   : > { %5820 = vmatmul.msk.bf16.gmra.mxu3 %vm1022_vm1, %v2616_v4  ;;  %5912 = vmatmul.msk.bf16.gmra.mxu1 %vm1022_vm1, %v7480_v41  ;;  %v1694_v41 = vadd.f32 %v7604_v52, %v7812_v62  ;;  %v8033_v52 = vld [vmem:[%s9154_s2] ss:$0 sm:$0xff] }
 0x239   : > { %5776 = vmatmul.msk.bf16.gmra.mxu2 %vm1022_vm1, %v2479_v23 }
 0x23a   : > { %v1840_v23 = vadd.f32 %v7594_v6, %v1694_v41 }
 0x23b   : > { %v2082_v57 = vpop.f32.mrf.mxu3 }
 0x23c   : > { %v1968_v42 = vpop.f32.mrf.mxu2 }
 0x23d   : > { %v1998_v17 = vadd.f32 %v1968_v42, %v1839_v34 }
 0x23f   : > { %v2112_v56 = vadd.f32 %v2082_v57, %v1998_v17 }
 0x241   : > { %v2259_v5 = vadd.f32 %v7749_v19, %v2112_v56  ;;  %v9337_v19 = vld [vmem:[#allocation35_spill] sm:$0xff]  ;;  %v9338_v56 = vld [vmem:[#allocation16_spill] sm:$0xff] }
 0x242   : > { %v2617_v57 = vrot.slane %v9337_v19, 2  ;;  %v2480_v27 = vrot.slane %v9337_v19, 1  ;;  %v4705_v59 = vmul.f32 %v8033_v52, %v9338_v56 }
 0x243   : > { %v2275_v62 = vadd.f32 %v8019_v2, %v2259_v5  ;;  %v2084_v4 = vpop.f32.mrf.mxu3  ;;  %6042 = vmatmul.msk.bf16.gmra.mxu0 %vm1022_vm1, %v7407_v49  ;;  %v1695_v5 = vadd.f32 %v7636_v15, %v7832_v47  ;;  %v8046_v49 = vpop.f32.mrf.mxu1 }
 0x244   : > { %v1970_v34 = vpop.f32.mrf.mxu2  ;;  %v2618_v41 = vsel %vm1586_vm4, %v2615_v31, %v2617_v57  ;;  %v2481_v29 = vsel %vm2472_vm8, %v2478_v63, %v2480_v27  ;;  %v8056_v15 = vpop.f32.mrf.mxu0 }
 0x245   : > { %v2287_v42 = vmax.f32 %v2275_v62, 0.0  ;;  %v1999_v17 = vadd.f32 %v1970_v34, %v1840_v23 }
 0x247   : > { %v4731_v21 = vrot.slane %v2287_v42, 4  ;;  %v2113_v6 = vadd.f32 %v2084_v4, %v1999_v17  ;;  %v1841_v4 = vadd.f32 %v7613_v36, %v1695_v5  ;;  %v9340_v17 = vld [vmem:[#allocation18_spill] sm:$0xff] }
 0x248   : > { %5821 = vmatmul.msk.bf16.gmra.mxu3 %vm1022_vm1, %v2618_v41  ;;  %5913 = vmatmul.msk.bf16.gmra.mxu1 %vm1022_vm1, %v7503_v22  ;;  %v1696_v22 = vadd.f32 %v7667_v50, %v7851_v1  ;;  %v9342_v50 = vld [vmem:[#allocation43_spill] sm:$0xff] }
 0x249   : > { %v2260_v61 = vadd.f32 %v7774_v9, %v2113_v6  ;;  %5777 = vmatmul.msk.bf16.gmra.mxu2 %vm1022_vm1, %v2481_v29  ;;  %v8054_v62 = vadd.f32 %v4731_v21, %v4705_v59  ;;  %v4706_v59 = vmul.f32 %v8033_v52, %v9340_v17  ;;  %v2619_v1 = vrot.slane %v9342_v50, 2 }
 0x24b   : > { %9339 = vst [vmem:[#allocation35_spill] sm:$0xff] %v8054_v62  ;;  %v2276_v47 = vadd.f32 %v8019_v2, %v2260_v61  ;;  %v2087_v31 = vpop.f32.mrf.mxu3  ;;  %v8066_v41 = vpop.f32.mrf.mxu1  ;;  %v1842_v61 = vadd.f32 %v7638_v7, %v1696_v22  ;;  %v9343_v7 = vld [vmem:[#allocation20_spill] sm:$0xff] }
 0x24c   : > { %v1973_v23 = vpop.f32.mrf.mxu2  ;;  %v4707_v22 = vmul.f32 %v8033_v52, %v9343_v7 }
 0x24d   : > { %v2288_v34 = vmax.f32 %v2276_v47, 0.0  ;;  %v2000_v42 = vadd.f32 %v1973_v23, %v1841_v4  ;;  %v1697_v23 = vadd.f32 %v7693_v44, %v7867_v48  ;;  %v6411_v44 = vld [vmem:[%s9159_s7 + $0xf8] sm:$0xff]  ;;  %v6417_v48 = vld [vmem:[%s9159_s7 + $0x128] sm:$0xff] }
 0x24e   : > { %3098 = vmatpush.bf16.msrb.mxu2 %v6411_v44  ;;  %3254 = vmatpush.bf16.msrb.mxu3 %v6417_v48 }
 0x24f   : > { %v4732_v63 = vrot.slane %v2288_v34, 4  ;;  %v2114_v9 = vadd.f32 %v2087_v31, %v2000_v42  ;;  %v2482_v31 = vrot.slane %v9342_v50, 1 }
 0x251   : > { %v4733_v56 = vsel %vm4730_vm9, %v4731_v21, %v4732_v63  ;;  %v2261_v6 = vadd.f32 %v7786_v16, %v2114_v9  ;;  %v8076_v21 = vpop.f32.mrf.mxu0  ;;  %v2620_v9 = vsel %vm1586_vm4, %v2617_v57, %v2619_v1  ;;  %v2483_v17 = vsel %vm2472_vm8, %v2480_v27, %v2482_v31 }
 0x252   : > { %v8068_v29 = vadd.f32 %v4733_v56, %v4706_v59  ;;  %v1843_v27 = vadd.f32 %v7662_v58, %v1697_v23 }
 0x253   : > { %v2277_v36 = vadd.f32 %v8019_v2, %v2261_v6  ;;  %v2089_v5 = vpop.f32.mrf.mxu3  ;;  %6043 = vmatmul.msk.bf16.gmra.mxu0 %vm1022_vm1, %v7494_v0  ;;  %v9344_v0 = vld [vmem:[#allocation27_spill] sm:$0xff] }
 0x254   : > { %9341 = vst [vmem:[#allocation16_spill] sm:$0xff] %v8068_v29  ;;  %v1975_v47 = vpop.f32.mrf.mxu2 }
 0x255   : > { %v2289_v16 = vmax.f32 %v2277_v36, 0.0  ;;  %v2001_v4 = vadd.f32 %v1975_v47, %v1842_v61  ;;  %v1698_v47 = vadd.f32 %v7725_v37, %v7878_v43  ;;  %v9349_v43 = vld [vmem:[#allocation50_spill] sm:$0xff] }
 0x256   : > { %v2621_v37 = vrot.slane %v9349_v43, 2  ;;  %v2484_v44 = vrot.slane %v9349_v43, 1 }
 0x257   : > { %v4734_v34 = vrot.slane %v2289_v16, 4  ;;  %v2115_v42 = vadd.f32 %v2089_v5, %v2001_v4 }
 0x258   : > { %5822 = vmatmul.msk.bf16.gmra.mxu3 %vm1022_vm1, %v2620_v9  ;;  %6082 = vmatmul.msk.bf16.vlgmr.msra.gmra.mxu1 %vm1022_vm1, %v9344_v0  ;;  %v9347_v9 = vld [vmem:[#allocation23_spill] sm:$0xff] }
 0x259   : > { %v4735_v59 = vsel %vm4730_vm9, %v4732_v63, %v4734_v34  ;;  %v2262_v56 = vadd.f32 %v7809_v13, %v2115_v42  ;;  %5778 = vmatmul.msk.bf16.gmra.mxu2 %vm1022_vm1, %v2483_v17  ;;  %v8100_v13 = vpop.f32.mrf.mxu1  ;;  %v8104_v16 = vpop.f32.mrf.mxu0  ;;  %v4708_v7 = vmul.f32 %v8033_v52, %v9347_v9 }
 0x25a   : > { %v8096_v57 = vadd.f32 %v4735_v59, %v4707_v22  ;;  %9346 = vst [vmem:[#allocation43_spill] sm:$0xff] %v8100_v13  ;;  %v1844_v59 = vadd.f32 %v7688_v20, %v1698_v47  ;;  %v9351_v20 = vld [vmem:[#allocation34_spill] sm:$0xff] }
 0x25b   : > { %v2278_v6 = vadd.f32 %v8019_v2, %v2262_v56  ;;  %v2092_v36 = vpop.f32.mrf.mxu3 }
 0x25c   : > { %9345 = vst [vmem:[#allocation18_spill] sm:$0xff] %v8096_v57  ;;  %v1978_v63 = vpop.f32.mrf.mxu2 }
 0x25d   : > { %v2290_v5 = vmax.f32 %v2278_v6, 0.0  ;;  %v2002_v61 = vadd.f32 %v1978_v63, %v1843_v27  ;;  %v2622_v27 = vsel %vm1586_vm4, %v2619_v1, %v2621_v37  ;;  %v9350_v63 = vld [vmem:[#allocation26_spill] sm:$0xff] }
 0x25f   : > { %v4736_v4 = vrot.slane %v2290_v5, 4  ;;  %v2116_v42 = vadd.f32 %v2092_v36, %v2002_v61  ;;  %v4709_v5 = vmul.f32 %v8033_v52, %v9350_v63 }
 0x261   : > { %v4737_v22 = vsel %vm4730_vm9, %v4734_v34, %v4736_v4  ;;  %v2263_v58 = vadd.f32 %v7837_v18, %v2116_v42  ;;  %v8118_v34 = vpop.f32.mrf.mxu1  ;;  %v8127_v61 = vpop.f32.mrf.mxu0 }
 0x262   : > { %v8110_v23 = vadd.f32 %v4737_v22, %v4708_v7  ;;  %v1845_v22 = vadd.f32 %v7703_v40, %v7947_v26  ;;  %v6416_v40 = vld [vmem:[%s9159_s7 + $0x120] sm:$0xff] }
 0x263   : > { %v2279_v0 = vadd.f32 %v8019_v2, %v2263_v58  ;;  %v2094_v17 = vpop.f32.mrf.mxu3  ;;  %6044 = vmatmul.msk.bf16.gmra.mxu0 %vm1022_vm1, %v7534_v8  ;;  %v2485_v8 = vsel %vm2472_vm8, %v2482_v31, %v2484_v44  ;;  %3255 = vmatpush.bf16.msrb.mxu3 %v6416_v40 }
 0x264   : > { %9348 = vst [vmem:[#allocation20_spill] sm:$0xff] %v8110_v23  ;;  %v1980_v56 = vpop.f32.mrf.mxu2 }
 0x265   : > { %v2291_v48 = vmax.f32 %v2279_v0, 0.0  ;;  %v2003_v6 = vadd.f32 %v1980_v56, %v1844_v59  ;;  %v9353_v56 = vld [vmem:[#allocation30_spill] sm:$0xff] }
 0x267   : > { %v4738_v18 = vrot.slane %v2291_v48, 4  ;;  %v2117_v36 = vadd.f32 %v2094_v17, %v2003_v6 }
 0x268   : > { %5823 = vmatmul.msk.bf16.gmra.mxu3 %vm1022_vm1, %v2622_v27  ;;  %6083 = vmatmul.msk.bf16.gmra.mxu1 %vm1022_vm1, %v9351_v20 }
 0x269   : > { %v4739_v47 = vsel %vm4730_vm9, %v4736_v4, %v4738_v18  ;;  %v2264_v42 = vadd.f32 %v7856_v32, %v2117_v36  ;;  %5779 = vmatmul.msk.bf16.gmra.mxu2 %vm1022_vm1, %v2485_v8  ;;  %v4710_v4 = vmul.f32 %v8033_v52, %v9353_v56  ;;  %v8139_v48 = vpop.f32.mrf.mxu1  ;;  %v6410_v36 = vld [vmem:[%s9159_s7 + $0xf0] sm:$0xff]  ;;  %v8151_v27 = vpop.f32.mrf.mxu0  ;;  %v2486_v8 = vrot.slane %v7395_v46, 1 }
 0x26a   : > { %v8132_v9 = vadd.f32 %v4739_v47, %v4709_v5  ;;  %3099 = vmatpush.bf16.msrb.mxu2 %v6410_v36 }
 0x26b   : > { %v2280_v1 = vadd.f32 %v8019_v2, %v2264_v42  ;;  %v2097_v7 = vpop.f32.mrf.mxu3 }
 0x26c   : > { %9352 = vst [vmem:[#allocation27_spill] sm:$0xff] %v8132_v9  ;;  %v1983_v58 = vpop.f32.mrf.mxu2 }
 0x26d   : > { %v2292_v0 = vmax.f32 %v2280_v1, 0.0  ;;  %v2004_v17 = vadd.f32 %v1983_v58, %v1845_v22  ;;  %v9355_v58 = vld [vmem:[#allocation33_spill] sm:$0xff] }
 0x26f   : > { %v4740_v31 = vrot.slane %v2292_v0, 4  ;;  %v2118_v59 = vadd.f32 %v2097_v7, %v2004_v17  ;;  %v4711_v0 = vmul.f32 %v8033_v52, %v9355_v58 }
 0x271   : > { %v4741_v32 = vsel %vm4730_vm9, %v4738_v18, %v4740_v31  ;;  %v2265_v6 = vadd.f32 %v7875_v11, %v2118_v59  ;;  %v1846_v18 = vadd.f32 %v7729_v38, %v7957_v33  ;;  %v2623_v11 = vrot.slane %v7395_v46, 2  ;;  %v9356_v38 = vld [vmem:[#allocation42_spill] sm:$0xff]  ;;  %v8170_v59 = vpop.f32.mrf.mxu1 }
 0x272   : > { %v8149_v26 = vadd.f32 %v4741_v32, %v4710_v4  ;;  %v1847_v32 = vadd.f32 %v7751_v28, %v7971_v39  ;;  %v1848_v28 = vadd.f32 %v7768_v25, %v7993_v45 }
 0x273   : > { %v2281_v63 = vadd.f32 %v8019_v2, %v2265_v6  ;;  %v2099_v5 = vpop.f32.mrf.mxu3  ;;  %6045 = vmatmul.msk.bf16.gmra.mxu0 %vm1022_vm1, %v7526_v53  ;;  %v2624_v22 = vsel %vm1586_vm4, %v2621_v37, %v2623_v11  ;;  %v2487_v53 = vsel %vm2472_vm8, %v2484_v44, %v2486_v8 }
 0x274   : > { %9354 = vst [vmem:[#allocation23_spill] sm:$0xff] %v8149_v26  ;;  %v1985_v20 = vpop.f32.mrf.mxu2 }
 0x275   : > { %v2293_v47 = vmax.f32 %v2281_v63, 0.0  ;;  %v2005_v42 = vadd.f32 %v1985_v20, %v1846_v18 }
 0x277   : > { %v4742_v1 = vrot.slane %v2293_v47, 4  ;;  %v2119_v7 = vadd.f32 %v2099_v5, %v2005_v42 }
 0x278   : > { %5824 = vmatmul.msk.bf16.gmra.mxu3 %vm1022_vm1, %v2624_v22  ;;  %6084 = vmatmul.msk.bf16.gmra.mxu1 %vm1022_vm1, %v9356_v38 }
 0x279   : > { %v4743_v33 = vsel %vm4730_vm9, %v4740_v31, %v4742_v1  ;;  %v2266_v17 = vadd.f32 %v7892_v51, %v2119_v7  ;;  %5780 = vmatmul.msk.bf16.gmra.mxu2 %vm1022_vm1, %v2487_v53  ;;  %v9358_v31 = vld [vmem:[#allocation38_spill] sm:$0xff]  ;;  %v8186_v39 = vpop.f32.mrf.mxu1  ;;  %v9360_v53 = vld [vmem:[#allocation41_spill] sm:$0xff] }
 0x27a   : > { %v8172_v56 = vadd.f32 %v4743_v33, %v4711_v0  ;;  %v4712_v51 = vmul.f32 %v8033_v52, %v9358_v31 }
 0x27b   : > { %v2282_v37 = vadd.f32 %v8019_v2, %v2266_v17  ;;  %v2102_v4 = vpop.f32.mrf.mxu3 }
 0x27c   : > { %9357 = vst [vmem:[#allocation50_spill] sm:$0xff] %v8172_v56  ;;  %v1988_v6 = vpop.f32.mrf.mxu2 }
 0x27d   : > { %v2294_v36 = vmax.f32 %v2282_v37, 0.0  ;;  %v2006_v40 = vadd.f32 %v1988_v6, %v1847_v32 }
 0x27f   : > { %v4744_v44 = vrot.slane %v2294_v36, 4  ;;  %v2120_v63 = vadd.f32 %v2102_v4, %v2006_v40  ;;  %v9363_v4 = vld [vmem:[#allocation32_spill] sm:$0xff] }
 0x280   : > { %v1849_v32 = vadd.f32 %v9363_v4, %v7967_v3  ;;  %v9367_v3 = vld [vmem:[#allocation40_spill] sm:$0xff] }
 0x281   : > { %v4745_v5 = vsel %vm4730_vm9, %v4742_v1, %v4744_v44  ;;  %v2267_v18 = vadd.f32 %v7902_v54, %v2120_v63  ;;  %v4713_v1 = vmul.f32 %v8033_v52, %v9360_v53  ;;  %v9361_v54 = vld [vmem:[#allocation60_spill] sm:$0xff]  ;;  %v8201_v40 = vpop.f32.mrf.mxu1 }
 0x282   : > { %v8181_v20 = vadd.f32 %v4745_v5, %v4712_v51  ;;  %v9365_v51 = vld [vmem:[#allocation51_spill] sm:$0xff] }
 0x283   : > { %v2283_v47 = vadd.f32 %v8019_v2, %v2267_v18  ;;  %v2104_v42 = vpop.f32.mrf.mxu3 }
 0x284   : > { %9359 = vst [vmem:[#allocation26_spill] sm:$0xff] %v8181_v20  ;;  %v1990_v7 = vpop.f32.mrf.mxu2 }
 0x285   : > { %v2295_v22 = vmax.f32 %v2283_v47, 0.0  ;;  %v2007_v58 = vadd.f32 %v1990_v7, %v1848_v28  ;;  %v1850_v28 = vadd.f32 %v9367_v3, %v7990_v55  ;;  %v9368_v7 = vld [vmem:[#allocation24_spill] sm:$0xff] }
 0x287   : > { %v4746_v0 = vrot.slane %v2295_v22, 4  ;;  %v2121_v38 = vadd.f32 %v2104_v42, %v2007_v58  ;;  %v3174_v22 = vrot.slane %v9368_v7, 1 }
 0x288   : > { %5825 = vmatmul.msk.bf16.gmra.mxu3 %vm1022_vm1, %v2623_v11  ;;  %6085 = vmatmul.msk.bf16.gmra.mxu1 %vm1022_vm1, %v9361_v54 }
 0x289   : > { %v4747_v33 = vsel %vm4730_vm9, %v4744_v44, %v4746_v0  ;;  %v2268_v17 = vadd.f32 %v7922_v10, %v2121_v38  ;;  %5781 = vmatmul.msk.bf16.gmra.mxu2 %vm1022_vm1, %v2486_v8  ;;  %v9364_v44 = vld [vmem:[#allocation45_spill] sm:$0xff]  ;;  %v8217_v4 = vpop.f32.mrf.mxu1 }
 0x28a   : > { %v8196_v25 = vadd.f32 %v4747_v33, %v4713_v1  ;;  %v4714_v10 = vmul.f32 %v8033_v52, %v9364_v44  ;;  %v9369_v1 = vld [vmem:[#allocation19_spill] sm:$0xff] }
 0x28b   : > { %v2284_v45 = vadd.f32 %v8019_v2, %v2268_v17  ;;  %v2107_v37 = vpop.f32.mrf.mxu3  ;;  %v3173_v54 = vrot.slane %v9369_v1, 1  ;;  %v9379_v1 = vld [vmem:[#allocation31_spill] sm:$0xff] }
 0x28c   : > { %9362 = vst [vmem:[#allocation34_spill] sm:$0xff] %v8196_v25  ;;  %v1993_v6 = vpop.f32.mrf.mxu2 }
 0x28d   : > { %v2296_v36 = vmax.f32 %v2284_v45, 0.0  ;;  %v2008_v11 = vadd.f32 %v1993_v6, %v1849_v32  ;;  %v9370_v45 = vld [vmem:[#allocation49_spill] sm:$0xff]  ;;  %v9371_v32 = vld [vmem:[#allocation62_spill] sm:$0xff] }
 0x28f   : > { %v4748_v63 = vrot.slane %v2296_v36, 4  ;;  %v2122_v31 = vadd.f32 %v2107_v37, %v2008_v11  ;;  %v4715_v37 = vmul.f32 %v8033_v52, %v9370_v45  ;;  %v9372_v36 = vld [vmem:[#allocation17_spill] sm:$0xff] }
 0x291   : > { %v4749_v8 = vsel %vm4730_vm9, %v4746_v0, %v4748_v63  ;;  %v2269_v5 = vadd.f32 %v9365_v51, %v2122_v31  ;;  %v3175_v0 = vsel %vm2472_vm8, %v3173_v54, %v3174_v22  ;;  %v9374_v51 = vld [vmem:[#allocation63_spill] sm:$0xff]  ;;  %v3176_v54 = vrot.slane %v9379_v1, 1 }
 0x292   : > { %v8207_v18 = vadd.f32 %v4749_v8, %v4714_v10 }
 0x293   : > { %v2285_v47 = vadd.f32 %v8019_v2, %v2269_v5  ;;  %v2109_v42 = vpop.f32.mrf.mxu3 }
 0x294   : > { %9366 = vst [vmem:[#allocation30_spill] sm:$0xff] %v8207_v18  ;;  %v1995_v58 = vpop.f32.mrf.mxu2 }
 0x295   : > { %v2297_v38 = vmax.f32 %v2285_v47, 0.0  ;;  %v2009_v53 = vadd.f32 %v1995_v58, %v1850_v28  ;;  %v9375_v47 = vld [vmem:[#allocation54_spill] sm:$0xff] }
 0x297   : > { %v4750_v33 = vrot.slane %v2297_v38, 4  ;;  %v2123_v17 = vadd.f32 %v2109_v42, %v2009_v53  ;;  %v4717_v42 = vmul.f32 %v8033_v52, %v9375_v47  ;;  %v8239_v38 = vpop.f32.mrf.mxu1 }
 0x298   : > { %5994 = vmatmul.msk.bf16.vlgmr.msrb.gmra.mxu3 %vm1022_vm1, %v3175_v0  ;;  %6086 = vmatmul.msk.bf16.gmra.mxu1 %vm1022_vm1, %v9371_v32 }
 0x299   : > { %v4751_v55 = vsel %vm4730_vm9, %v4748_v63, %v4750_v33  ;;  %v2270_v6 = vadd.f32 %v7951_v12, %v2123_v17  ;;  %5950 = vmatmul.msk.bf16.vlgmr.msrb.gmra.mxu2 %vm1022_vm1, %v9372_v36  ;;  %v9376_v63 = vld [vmem:[#allocation52_spill] sm:$0xff]  ;;  %v9380_v17 = vld [vmem:[#allocation57_spill] sm:$0xff] }
 0x29a   : > { %v8226_v11 = vadd.f32 %v4751_v55, %v4715_v37  ;;  %v4716_v12 = vmul.f32 %v8033_v52, %v9376_v63  ;;  %v3462_v0 = vrot.slane %v9380_v17, 2  ;;  %v9381_v37 = vld [vmem:[#allocation22_spill] sm:$0xff]  ;;  %v3177_v52 = vsel %vm2472_vm8, %v3174_v22, %v3176_v54  ;;  %v6437_v22 = vld [vmem:[%s9161_s9 + $0x18] sm:$0xff] }
 0x29b   : > { %v2286_v31 = vadd.f32 %v8019_v2, %v2270_v6  ;;  %v2694_v44 = vpop.f32.mrf.mxu3  ;;  %v9382_v6 = vld [vmem:[#allocation61_spill] sm:$0xff]  ;;  %3825 = vmatpush.bf16.msra.mxu2 %v6437_v22 }
 0x29c   : > { %9373 = vst [vmem:[#allocation33_spill] sm:$0xff] %v8226_v11  ;;  %v2557_v10 = vpop.f32.mrf.mxu2 }
 0x29d   : > { %v2298_v8 = vmax.f32 %v2286_v31, 0.0  ;;  %v2558_v5 = vadd.f32 %v2557_v10, %v9374_v51  ;;  %v9383_v10 = vld [vmem:[#allocation48_spill] sm:$0xff] }
 0x29f   : > { %v4752_v3 = vrot.slane %v2298_v8, 4  ;;  %v8232_v28 = vadd.f32 %v2694_v44, %v2558_v5  ;;  %v8255_v31 = vpop.f32.mrf.mxu1  ;;  %v6435_v5 = vld [vmem:[%s9161_s9 + $0x8] sm:$0xff] }
 0x2a0   : > { %3888 = vmatpush.bf16.msra.mxu3 %v6435_v5  ;;  %v9388_v5 = vld [vmem:[#allocation46_spill] sm:$0xff] }
 0x2a1   : > { %v4753_v7 = vsel %vm4730_vm9, %v4750_v33, %v4752_v3  ;;  %v8237_v58 = vadd.f32 %v4752_v3, %v4717_v42  ;;  %v3463_v33 = vsel %vm1586_vm4, %v9382_v6, %v3462_v0  ;;  %v9385_v3 = vld [vmem:[#allocation59_spill] sm:$0xff] }
 0x2a2   : > { %v8241_v2 = vadd.f32 %v4753_v7, %v4716_v12  ;;  %v3464_v63 = vrot.slane %v9385_v3, 2  ;;  %v8268_v12 = vpop.f32.mrf.mxu0 }
 0x2a3   : > { %9377 = vst [vmem:[#allocation42_spill] sm:$0xff] %v8237_v58  ;;  %v2696_v53 = vpop.f32.mrf.mxu3 }
 0x2a4   : > { %9378 = vst [vmem:[#allocation38_spill] sm:$0xff] %v8241_v2  ;;  %v2559_v45 = vpop.f32.mrf.mxu2 }
 0x2a5   : > { %v2560_v32 = vadd.f32 %v2559_v45, %v9381_v37 }
 0x2a7   : > { %v8246_v55 = vadd.f32 %v2696_v53, %v2560_v32  ;;  %v9386_v53 = vld [vmem:[#allocation29_spill] sm:$0xff]  ;;  %v8271_v45 = vpop.f32.mrf.mxu1 }
 0x2a8   : > { %5995 = vmatmul.msk.bf16.gmra.mxu3 %vm1022_vm1, %v3177_v52  ;;  %6087 = vmatmul.msk.bf16.gmra.mxu1 %vm1022_vm1, %v3463_v33  ;;  %v3465_v52 = vsel %vm1586_vm4, %v3462_v0, %v3464_v63  ;;  %v3180_v0 = vrot.slane %v9388_v5, 1  ;;  %v9391_v5 = vld [vmem:[#allocation53_spill] sm:$0xff] }
 0x2a9   : > { %5951 = vmatmul.msk.bf16.gmra.mxu2 %vm1022_vm1, %v9332_v14  ;;  %v9384_v14 = vld [vmem:[#allocation39_spill] sm:$0xff] }
 0x2aa   : > { %v3178_v42 = vrot.slane %v9384_v14, 1  ;;  %v9389_v14 = vld [vmem:[#allocation37_spill] sm:$0xff] }
 0x2ab   : > { %v2699_v36 = vpop.f32.mrf.mxu3 }
 0x2ac   : > { %v2562_v44 = vpop.f32.mrf.mxu2  ;;  %v3179_v32 = vsel %vm2472_vm8, %v3176_v54, %v3178_v42 }
 0x2ad   : > { %v2563_v8 = vadd.f32 %v2562_v44, %v9383_v10  ;;  %v8282_v10 = vpop.f32.mrf.mxu0 }
 0x2af   : > { %v8258_v51 = vadd.f32 %v2699_v36, %v2563_v8  ;;  %v9387_v36 = vld [vmem:[#allocation55_spill] sm:$0xff]  ;;  %v8286_v22 = vpop.f32.mrf.mxu1 }
 0x2b3   : > { %v2701_v47 = vpop.f32.mrf.mxu3 }
 0x2b4   : > { %v2564_v7 = vpop.f32.mrf.mxu2 }
 0x2b5   : > { %v2565_v1 = vadd.f32 %v2564_v7, %v9386_v53 }
 0x2b7   : > { %v8273_v37 = vadd.f32 %v2701_v47, %v2565_v1  ;;  %v8293_v1 = vpop.f32.mrf.mxu0 }
 0x2b8   : > { %5996 = vmatmul.msk.bf16.gmra.mxu3 %vm1022_vm1, %v3179_v32  ;;  %6088 = vmatmul.msk.bf16.gmra.mxu1 %vm1022_vm1, %v3465_v52  ;;  %v8299_v32 = vpop.f32.mrf.mxu1 }
 0x2b9   : > { %5952 = vmatmul.msk.bf16.gmra.mxu2 %vm1022_vm1, %v9333_v24  ;;  %v3181_v24 = vsel %vm2472_vm8, %v3178_v42, %v3180_v0 }
 0x2bb   : > { %v2704_v6 = vpop.f32.mrf.mxu3 }
 0x2bc   : > { %v2567_v33 = vpop.f32.mrf.mxu2 }
 0x2bd   : > { %v2568_v44 = vadd.f32 %v2567_v33, %v9387_v36  ;;  %v9390_v33 = vld [vmem:[#allocation64_spill] sm:$0xff] }
 0x2bf   : > { %v8284_v8 = vadd.f32 %v2704_v6, %v2568_v44 }
 0x2c3   : > { %v2706_v54 = vpop.f32.mrf.mxu3 }
 0x2c4   : > { %v2569_v47 = vpop.f32.mrf.mxu2 }
 0x2c5   : > { %v2570_v7 = vadd.f32 %v2569_v47, %v9389_v14  ;;  %v3182_v47 = vrot.slane %v9391_v5, 1  ;;  %v8307_v14 = vpop.f32.mrf.mxu1 }
 0x2c7   : > { %v8290_v53 = vadd.f32 %v2706_v54, %v2570_v7  ;;  %v8304_v54 = vpop.f32.mrf.mxu0 }
 0x2c8   : > { %5997 = vmatmul.msk.bf16.gmra.mxu3 %vm1022_vm1, %v3181_v24  ;;  %6089 = vmatmul.msk.bf16.gmra.mxu1 %vm1022_vm1, %v3464_v63  ;;  %v9392_v63 = vld [vmem:[#allocation44_spill] sm:$0xff] }
 0x2c9   : > { %5953 = vmatmul.msk.bf16.gmra.mxu2 %vm1022_vm1, %v9337_v19  ;;  %v3183_v19 = vsel %vm2472_vm8, %v3180_v0, %v3182_v47 }
 0x2cb   : > { %v2709_v52 = vpop.f32.mrf.mxu3 }
 0x2cc   : > { %v2572_v6 = vpop.f32.mrf.mxu2 }
 0x2cd   : > { %v2573_v36 = vadd.f32 %v2572_v6, %v9390_v33  ;;  %v8319_v58 = vpop.f32.mrf.mxu1 }
 0x2ce   : > { %9394 = vst [vmem:[#allocation41_spill] sm:$0xff] %v8319_v58 }
 0x2cf   : > { %v8302_v44 = vadd.f32 %v2709_v52, %v2573_v36  ;;  %v8316_v6 = vpop.f32.mrf.mxu0  ;;  %v9393_v36 = vld [vmem:[#allocation65_spill] sm:$0xff] }
 0x2d3   : > { %v2711_v42 = vpop.f32.mrf.mxu3 }
 0x2d4   : > { %v2574_v7 = vpop.f32.mrf.mxu2 }
 0x2d5   : > { %v2575_v24 = vadd.f32 %v2574_v7, %v9392_v63 }
 0x2d7   : > { %v8310_v2 = vadd.f32 %v2711_v42, %v2575_v24  ;;  %v3184_v42 = vrot.slane %v9380_v17, 1  ;;  %v8328_v63 = vpop.f32.mrf.mxu0  ;;  %v8331_v24 = vpop.f32.mrf.mxu1  ;;  %v6436_v17 = vld [vmem:[%s9161_s9 + $0x10] sm:$0xff] }
 0x2d8   : > { %5998 = vmatmul.msk.bf16.gmra.mxu3 %vm1022_vm1, %v3183_v19  ;;  %9395 = vst [vmem:[#allocation60_spill] sm:$0xff] %v8328_v63  ;;  %3826 = vmatpush.bf16.msra.mxu2 %v6436_v17 }
 0x2d9   : > { %5954 = vmatmul.msk.bf16.gmra.mxu2 %vm1022_vm1, %v9342_v50  ;;  %v3185_v50 = vsel %vm2472_vm8, %v3182_v47, %v3184_v42  ;;  %9396 = vst [vmem:[#allocation32_spill] sm:$0xff] %v8331_v24  ;;  %v6434_v47 = vld [vmem:[%s9161_s9] sm:$0xff] }
 0x2da   : > { %3889 = vmatpush.bf16.msra.mxu3 %v6434_v47 }
 0x2db   : > { %v2714_v52 = vpop.f32.mrf.mxu3 }
 0x2dc   : > { %v2577_v33 = vpop.f32.mrf.mxu2 }
 0x2dd   : > { %v2578_v5 = vadd.f32 %v2577_v33, %v9393_v36 }
 0x2df   : > { %v8321_v11 = vadd.f32 %v2714_v52, %v2578_v5  ;;  %v8345_v5 = vpop.f32.mrf.mxu0 }
 0x2e0   : > { %9397 = vst [vmem:[#allocation45_spill] sm:$0xff] %v8345_v5  ;;  %v9409_v5 = vld [vmem:[#allocation14_spill] sm:$0xff] }
 0x2e3   : > { %v8323_v7 = vpop.f32.mrf.mxu3 }
 0x2e4   : > { %v8326_v0 = vpop.f32.mrf.mxu2 }
 0x2e8   : > { %5999 = vmatmul.msk.bf16.gmra.mxu3 %vm1022_vm1, %v3185_v50  ;;  %v8347_v50 = vpop.f32.mrf.mxu1 }
 0x2e9   : > { %5955 = vmatmul.msk.bf16.gmra.mxu2 %vm1022_vm1, %v9349_v43  ;;  %9398 = vst [vmem:[#allocation51_spill] sm:$0xff] %v8347_v50 }
 0x2eb   : > { %v2719_v19 = vpop.f32.mrf.mxu3 }
 0x2ec   : > { %v2582_v52 = vpop.f32.mrf.mxu2 }
 0x2ed   : > { %v2583_v33 = vadd.f32 %v2582_v52, %v7965_v35  ;;  %v3186_v35 = vrot.slane %v9385_v3, 1 }
 0x2ef   : > { %v8337_v36 = vadd.f32 %v2719_v19, %v2583_v33  ;;  %v3187_v52 = vsel %vm2472_vm8, %v3184_v42, %v3186_v35  ;;  %v8358_v33 = vpop.f32.mrf.mxu0 }
 0x2f0   : > { %9399 = vst [vmem:[#allocation40_spill] sm:$0xff] %v8358_v33  ;;  %v8360_v17 = vpop.f32.mrf.mxu1  ;;  %v9408_v33 = vld [vmem:[#allocation28_spill] sm:$0xff] }
 0x2f1   : > { %9400 = vst [vmem:[#allocation24_spill] sm:$0xff] %v8360_v17 }
 0x2f3   : > { %v8349_v43 = vpop.f32.mrf.mxu3 }
 0x2f4   : > { %v8352_v19 = vpop.f32.mrf.mxu2 }
 0x2f7   : > { %v3393_v56 = vpop.f32.mrf.mxu0 }
 0x2f8   : > { %6000 = vmatmul.msk.bf16.gmra.mxu3 %vm1022_vm1, %v3187_v52  ;;  %v3520_v42 = vpop.f32.mrf.mxu1  ;;  %v9402_v52 = vld [vmem:[#allocation58_spill] sm:$0xff] }
 0x2f9   : > { %5956 = vmatmul.msk.bf16.gmra.mxu2 %vm1022_vm1, %v7395_v46  ;;  %v9403_v46 = vld [vmem:[#allocation56_spill] sm:$0xff] }
 0x2fa   : > { %v9404_v9 = vpack.c.b16 %v9402_v52, %v9403_v46  ;;  %v6439_v52 = vld [vmem:[%s9161_s9 + $0x28] sm:$0xff] }
 0x2fb   : > { %v2724_v18 = vpop.f32.mrf.mxu3  ;;  %3975 = vmatpush.bf16.msrb.mxu0 %v6439_v52 }
 0x2fc   : > { %v2587_v47 = vpop.f32.mrf.mxu2 }
 0x2fd   : > { %v2588_v25 = vadd.f32 %v2587_v47, %v8012_v60 }
 0x2ff   : > { %v8363_v20 = vadd.f32 %v2724_v18, %v2588_v25  ;;  %v3395_v60 = vpop.f32.mrf.mxu0 }
 0x300   : > { %v3522_v18 = vpop.f32.mrf.mxu1 }
 0x303   : > { %v8365_v3 = vpop.f32.mrf.mxu3 }
 0x304   : > { %9401 = vst [vmem:[#allocation19_spill] sm:$0xff] %v8365_v3  ;;  %v8367_v26 = vpop.f32.mrf.mxu2 }
 0x308   : > { %6001 = vmatmul.msk.bf16.gmra.mxu3 %vm1022_vm1, %v3186_v35  ;;  %v2888_v35 = vadd.f32 %v7969_v30, %v8232_v28  ;;  %v3525_v46 = vpop.f32.mrf.mxu1  ;;  %v8392_v30 = vld [vmem:[%s9160_s8] ss:$0 sm:$0xff] }
 0x309   : > { %5957 = vmatmul.msk.bf16.gmra.mxu2 %vm1022_vm1, %v9404_v9  ;;  %v3398_v9 = vpop.f32.mrf.mxu0 }
 0x30b   : > { %v2729_v23 = vpop.f32.mrf.mxu3 }
 0x30c   : > { %v2592_v57 = vpop.f32.mrf.mxu2 }
 0x30d   : > { %v2593_v29 = vadd.f32 %v2592_v57, %v8066_v41  ;;  %v3021_v41 = vadd.f32 %v8118_v34, %v2888_v35  ;;  %v9410_v34 = vld [vmem:[#allocation2_spill] sm:$0xff] }
 0x30e   : > { %v3613_v35 = vrot.slane %v9410_v34, 7 }
 0x30f   : > { %v8375_v25 = vadd.f32 %v2729_v23, %v2593_v29 }
 0x311   : > { %9405 = vst [vmem:[#allocation49_spill] sm:$0xff] %v8375_v25  ;;  %v3400_v28 = vpop.f32.mrf.mxu0  ;;  %v3614_v25 = vrot.slane %v9409_v5, 7 }
 0x313   : > { %v8377_v47 = vpop.f32.mrf.mxu3  ;;  %v3615_v24 = vsel %vm3612_vm0, %v3613_v35, %v3614_v25 }
 0x314   : > { %9406 = vst [vmem:[#allocation62_spill] sm:$0xff] %v8377_v47  ;;  %v8379_v62 = vpop.f32.mrf.mxu2  ;;  %v2889_v47 = vadd.f32 %v9408_v33, %v8246_v55 }
 0x315   : > { %9407 = vst [vmem:[#allocation17_spill] sm:$0xff] %v8379_v62 }
 0x316   : > { %v3022_v52 = vadd.f32 %v8139_v48, %v2889_v47  ;;  %v9412_v47 = vld [vmem:[#allocation15_spill] sm:$0xff] }
 0x317   : > { %v3616_v34 = vrot.slane %v9412_v47, 7 }
 0x319   : > { %v3403_v58 = vpop.f32.mrf.mxu0 }
 0x31b   : > { %v3257_v17 = vpop.f32.mrf.mxu3 }
 0x31c   : > { %v3101_v29 = vpop.f32.mrf.mxu2 }
 0x31d   : > { %v3141_v57 = vadd.f32 %v3101_v29, %v3021_v41  ;;  %v3527_v41 = vpop.f32.mrf.mxu1 }
 0x31f   : > { %v3297_v23 = vadd.f32 %v3257_v17, %v3141_v57  ;;  %v9411_v57 = vld [vmem:[#allocation67_spill] sm:$0xff] }
 0x321   : > { %v3433_v62 = vadd.f32 %v3393_v56, %v3297_v23  ;;  %v2890_v23 = vadd.f32 %v9411_v57, %v8258_v51  ;;  %v2891_v51 = vadd.f32 %v8056_v15, %v8273_v37 }
 0x323   : > { %v3560_v13 = vadd.f32 %v3520_v42, %v3433_v62  ;;  %v3259_v50 = vpop.f32.mrf.mxu3  ;;  %v3023_v5 = vadd.f32 %v8170_v59, %v2890_v23 }
 0x324   : > { %v3103_v17 = vpop.f32.mrf.mxu2 }
 0x325   : > { %v3580_v29 = vadd.f32 %v8392_v30, %v3560_v13  ;;  %v3142_v55 = vadd.f32 %v3103_v17, %v3022_v52  ;;  %v3530_v17 = vpop.f32.mrf.mxu1 }
 0x327   : > { %v3596_v56 = vmax.f32 %v3580_v29, 0.0  ;;  %v3298_v33 = vadd.f32 %v3259_v50, %v3142_v55 }
 0x329   : > { %v3662_v62 = vmul.f32 %v3615_v24, %v3596_v56  ;;  %v3434_v42 = vadd.f32 %v3395_v60, %v3298_v33  ;;  %v6438_v24 = vld [vmem:[%s9161_s9 + $0x20] sm:$0xff]  ;;  %v3617_v60 = vsel %vm3612_vm0, %v3614_v25, %v3616_v34  ;;  %v9413_v33 = vld [vmem:[#allocation4_spill] sm:$0xff] }
 0x32a   : > { %3976 = vmatpush.bf16.msrb.mxu0 %v6438_v24  ;;  %v3618_v57 = vrot.slane %v9413_v33, 7 }
 0x32b   : > { %v3561_v63 = vadd.f32 %v3522_v18, %v3434_v42  ;;  %v3262_v48 = vpop.f32.mrf.mxu3  ;;  %v3678_v59 = vpack.c.bf16 %v3662_v62, %v3662_v62 }
 0x32c   : > { %v3106_v3 = vpop.f32.mrf.mxu2  ;;  %v3619_v47 = vsel %vm3612_vm0, %v3616_v34, %v3618_v57 }
 0x32d   : > { %v3581_v13 = vadd.f32 %v8392_v30, %v3561_v63  ;;  %v3143_v52 = vadd.f32 %v3106_v3, %v3023_v5  ;;  %v3024_v3 = vadd.f32 %v8186_v39, %v2891_v51  ;;  %v3716_v42 = vunpack.c.l.b16 %v3678_v59  ;;  %v3405_v5 = vpop.f32.mrf.mxu0  ;;  %v3532_v39 = vpop.f32.mrf.mxu1 }
 0x32f   : > { %v3597_v50 = vmax.f32 %v3581_v13, 0.0  ;;  %v3299_v29 = vadd.f32 %v3262_v48, %v3143_v52 }
 0x331   : > { %v3663_v18 = vmul.f32 %v3617_v60, %v3597_v50  ;;  %v3435_v35 = vadd.f32 %v3398_v9, %v3299_v29  ;;  %v9414_v60 = vld [vmem:[#allocation3_spill] sm:$0xff] }
 0x332   : > { %v3620_v59 = vrot.slane %v9414_v60, 7 }
 0x333   : > { %v3679_v55 = vpack.c.bf16 %v3663_v18, %v3663_v18  ;;  %v3562_v56 = vadd.f32 %v3525_v46, %v3435_v35  ;;  %v3264_v63 = vpop.f32.mrf.mxu3  ;;  %v2892_v46 = vadd.f32 %v8076_v21, %v8284_v8  ;;  %v6445_v8 = vld [vmem:[%s9161_s9 + $0x58] sm:$0xff] }
 0x334   : > { %v3108_v23 = vpop.f32.mrf.mxu2  ;;  %4330 = vmatpush.bf16.msrb.mxu1 %v6445_v8  ;;  %v3621_v33 = vsel %vm3612_vm0, %v3618_v57, %v3620_v59 }
 0x335   : > { %v3717_v15 = vunpack.c.l.b16 %v3679_v55  ;;  %v3582_v37 = vadd.f32 %v8392_v30, %v3562_v56  ;;  %v3144_v48 = vadd.f32 %v3108_v23, %v3024_v3  ;;  %v3025_v51 = vadd.f32 %v8201_v40, %v2892_v46  ;;  %v6443_v40 = vld [vmem:[%s9161_s9 + $0x48] sm:$0xff]  ;;  %v6444_v3 = vld [vmem:[%s9161_s9 + $0x50] sm:$0xff]  ;;  %v3408_v23 = vpop.f32.mrf.mxu0 }
 0x336   : > { %v2893_v56 = vadd.f32 %v8104_v16, %v8290_v53  ;;  %4231 = vmatpush.bf16.msrb.mxu3 %v6443_v40 }
 0x337   : > { %v8413_v25 = vpack.c.b16 %v3717_v15, %v3716_v42  ;;  %v3598_v62 = vmax.f32 %v3582_v37, 0.0  ;;  %v3300_v9 = vadd.f32 %v3264_v63, %v3144_v48  ;;  %v3535_v48 = vpop.f32.mrf.mxu1 }
 0x338   : > { %v3026_v16 = vadd.f32 %v8217_v4, %v2893_v56  ;;  %4331 = vmatpush.bf16.msrb.mxu1 %v6444_v3 }
 0x339   : > { %v3436_v13 = vadd.f32 %v3400_v28, %v3300_v9  ;;  %6116 = vmatmul.msk.bf16.vlgmr.msra.gmra.mxu3 %vm3800_vm10, %v8413_v25  ;;  %v3664_v52 = vmul.f32 %v3619_v47, %v3598_v62  ;;  %v6441_v28 = vld [vmem:[%s9161_s9 + $0x38] sm:$0xff]  ;;  %v3739_v62 = vshll.u32 %v8413_v25, 16  ;;  %v3926_v4 = vrot.slane %v8413_v25, 1 }
 0x33a   : > { %4083 = vmatpush.bf16.msrb.mxu2 %v6441_v28 }
 0x33b   : > { %v3563_v50 = vadd.f32 %v3527_v41, %v3436_v13  ;;  %v3267_v29 = vpop.f32.mrf.mxu3  ;;  %v3680_v24 = vpack.c.bf16 %v3664_v52, %v3664_v52 }
 0x33c   : > { %v3111_v18 = vpop.f32.mrf.mxu2 }
 0x33d   : > { %v3583_v35 = vadd.f32 %v8392_v30, %v3563_v50  ;;  %v3145_v55 = vadd.f32 %v3111_v18, %v3025_v51  ;;  %v3718_v21 = vunpack.c.l.b16 %v3680_v24  ;;  %v9415_v50 = vld [vmem:[#allocation5_spill] sm:$0xff]  ;;  %v3737_v18 = vshrl.u32 %v8413_v25, 16 }
 0x33e   : > { %v3622_v57 = vrot.slane %v9415_v50, 7 }
 0x33f   : > { %v3599_v41 = vmax.f32 %v3583_v35, 0.0  ;;  %v3301_v34 = vadd.f32 %v3267_v29, %v3145_v55  ;;  %v8434_v63 = vpack.c.b16 %v3718_v21, %v3717_v15  ;;  %v3741_v29 = vrot.slane %v3739_v62, 1  ;;  %v3537_v3 = vpop.f32.mrf.mxu1 }
 0x341   : > { %v3437_v42 = vadd.f32 %v3403_v58, %v3301_v34  ;;  %v3665_v37 = vmul.f32 %v3621_v33, %v3599_v41  ;;  %v2894_v58 = vadd.f32 %v8127_v61, %v8302_v44  ;;  %v3410_v44 = vpop.f32.mrf.mxu0 }
 0x343   : > { %v3564_v9 = vadd.f32 %v3530_v17, %v3437_v42  ;;  %v3269_v46 = vpop.f32.mrf.mxu3  ;;  %v3681_v53 = vpack.c.bf16 %v3665_v37, %v3665_v37  ;;  %v3623_v17 = vsel %vm3612_vm0, %v3620_v59, %v3622_v57  ;;  %v3027_v28 = vadd.f32 %v8239_v38, %v2894_v58 }
 0x344   : > { %v3113_v15 = vpop.f32.mrf.mxu2 }
 0x345   : > { %v3584_v47 = vadd.f32 %v8392_v30, %v3564_v9  ;;  %v3146_v13 = vadd.f32 %v3113_v15, %v3026_v16  ;;  %v3719_v52 = vunpack.c.l.b16 %v3681_v53  ;;  %v2895_v16 = vadd.f32 %v8151_v27, %v8310_v2 }
 0x347   : > { %v3600_v51 = vmax.f32 %v3584_v47, 0.0  ;;  %v3302_v24 = vadd.f32 %v3269_v46, %v3146_v13  ;;  %v8446_v60 = vpack.c.b16 %v3719_v52, %v3718_v21  ;;  %v3742_v21 = vor.u32 %v3741_v29, %v3737_v18 }
 0x348   : > { %v4281_v47 = vrot.slane %v8434_v63, 3 }
 0x349   : > { %v3666_v35 = vmul.f32 %v3623_v17, %v3600_v51  ;;  %v3438_v55 = vadd.f32 %v3405_v5, %v3302_v24  ;;  %6117 = vmatmul.msk.bf16.gmra.mxu3 %vm3800_vm10, %v8446_v60  ;;  %v3927_v8 = vrot.slane %v8446_v60, 1  ;;  %v3744_v61 = vshll.u32 %v8446_v60, 16  ;;  %v9416_v5 = vld [vmem:[#allocation25_spill] sm:$0xff]  ;;  %v3413_v27 = vpop.f32.mrf.mxu0 }
 0x34a   : > { %v3624_v56 = vrot.slane %v9416_v5, 7  ;;  %v3028_v24 = vadd.f32 %v8255_v31, %v2895_v16 }
 0x34b   : > { %v3682_v40 = vpack.c.bf16 %v3666_v35, %v3666_v35  ;;  %v3565_v41 = vadd.f32 %v3532_v39, %v3438_v55  ;;  %v3272_v59 = vpop.f32.mrf.mxu3  ;;  %v3928_v25 = vsel %vm2472_vm8, %v3926_v4, %v3927_v8  ;;  %v3746_v34 = vrot.slane %v3744_v61, 1  ;;  %v9417_v4 = vld [vmem:[#allocation6_spill] sm:$0xff] }
 0x34c   : > { %v3116_v33 = vpop.f32.mrf.mxu2  ;;  %6134 = vmatmul.msk.bf16.vlgmr.msrb.gmra.mxu0 %vm3800_vm10, %v3928_v25  ;;  %v3625_v53 = vsel %vm3612_vm0, %v3622_v57, %v3624_v56  ;;  %v3626_v18 = vrot.slane %v9417_v4, 7  ;;  %v9418_v61 = vld [vmem:[#allocation66_spill] sm:$0xff] }
 0x34d   : > { %v3720_v42 = vunpack.c.l.b16 %v3682_v40  ;;  %v3585_v37 = vadd.f32 %v8392_v30, %v3565_v41  ;;  %v3147_v62 = vadd.f32 %v3116_v33, %v3027_v28  ;;  %v3747_v38 = vsel %vm1261_vm7, %v3742_v21, %v3746_v34  ;;  %v3540_v28 = vpop.f32.mrf.mxu1 }
 0x34e   : > { %6102 = vmatmul.msk.bf16.vlgmr.msra.gmra.mxu2 %vm3800_vm10, %v3747_v38  ;;  %v2580_v31 = vadd.f32 %v8326_v0, %v9418_v61  ;;  %v2896_v21 = vadd.f32 %v8268_v12, %v8321_v11  ;;  %v3627_v5 = vsel %vm3612_vm0, %v3624_v56, %v3626_v18  ;;  %v3748_v33 = vshrl.u32 %v8446_v60, 16 }
 0x34f   : > { %v3601_v39 = vmax.f32 %v3585_v37, 0.0  ;;  %v8464_v9 = vpack.c.b16 %v3720_v42, %v3719_v52  ;;  %v3303_v46 = vadd.f32 %v3272_v59, %v3147_v62 }
 0x350   : > { %v2743_v12 = vadd.f32 %v8323_v7, %v2580_v31  ;;  %v3029_v38 = vadd.f32 %v8271_v45, %v2896_v21  ;;  %v9420_v21 = vld [vmem:[#allocation36_spill] sm:$0xff] }
 0x351   : > { %v3439_v15 = vadd.f32 %v3408_v23, %v3303_v46  ;;  %v4282_v13 = vrot.slane %v8464_v9, 3  ;;  %v3667_v50 = vmul.f32 %v3625_v53, %v3601_v39  ;;  %v4145_v58 = vshll.u32 %v8464_v9, 16 }
 0x352   : > { %v4142_v23 = vshrl.u32 %v8464_v9, 16  ;;  %v3750_v39 = vor.u32 %v3748_v33, %v3746_v34  ;;  %v9419_v34 = vld [vmem:[#allocation7_spill] sm:$0xff] }
 0x353   : > { %v3566_v29 = vadd.f32 %v3535_v48, %v3439_v15  ;;  %v3274_v51 = vpop.f32.mrf.mxu3  ;;  %v4283_v52 = vsel %vm2763_vm2, %v4281_v47, %v4282_v13  ;;  %v3683_v17 = vpack.c.bf16 %v3667_v50, %v3667_v50  ;;  %v4467_v57 = vrot.slane %v4145_v58, 1 }
 0x354   : > { %v3118_v2 = vpop.f32.mrf.mxu2  ;;  %6188 = vmatmul.msk.bf16.vlgmr.msrb.gmra.mxu1 %vm3800_vm10, %v4283_v52  ;;  %v3628_v50 = vrot.slane %v9419_v34, 7 }
 0x355   : > { %v3586_v35 = vadd.f32 %v8392_v30, %v3566_v29  ;;  %v3148_v48 = vadd.f32 %v3118_v2, %v3028_v24  ;;  %v3721_v55 = vunpack.c.l.b16 %v3683_v17  ;;  %v4468_v40 = vor.u32 %v4467_v57, %v4142_v23  ;;  %v3542_v52 = vpop.f32.mrf.mxu1 }
 0x356   : > { %v3629_v24 = vsel %vm3612_vm0, %v3626_v18, %v3628_v50 }
 0x357   : > { %v3602_v41 = vmax.f32 %v3586_v35, 0.0  ;;  %v3304_v59 = vadd.f32 %v3274_v51, %v3148_v48  ;;  %v8486_v25 = vpack.c.b16 %v3721_v55, %v3720_v42 }
 0x359   : > { %v3668_v37 = vmul.f32 %v3627_v5, %v3602_v41  ;;  %v3440_v62 = vadd.f32 %v3410_v44, %v3304_v59  ;;  %6118 = vmatmul.msk.bf16.gmra.mxu3 %vm3800_vm10, %v8486_v25  ;;  %v3929_v0 = vrot.slane %v8486_v25, 1  ;;  %v3752_v11 = vshll.u32 %v8486_v25, 16 }
 0x35b   : > { %v3684_v42 = vpack.c.bf16 %v3668_v37, %v3668_v37  ;;  %v3567_v46 = vadd.f32 %v3537_v3, %v3440_v62  ;;  %v3277_v16 = vpop.f32.mrf.mxu3  ;;  %v3930_v44 = vsel %vm2472_vm8, %v3927_v8, %v3929_v0  ;;  %v3754_v56 = vrot.slane %v3752_v11, 1  ;;  %v3415_v3 = vpop.f32.mrf.mxu0 }
 0x35c   : > { %v3121_v53 = vpop.f32.mrf.mxu2  ;;  %6135 = vmatmul.msk.bf16.gmra.mxu0 %vm3800_vm10, %v3930_v44  ;;  %v2897_v8 = vadd.f32 %v8282_v10, %v2743_v12  ;;  %v3630_v10 = vrot.slane %v9420_v21, 7 }
 0x35d   : > { %v3722_v15 = vunpack.c.l.b16 %v3684_v42  ;;  %v3587_v47 = vadd.f32 %v8392_v30, %v3567_v46  ;;  %v3149_v7 = vadd.f32 %v3121_v53, %v3029_v38  ;;  %v3755_v45 = vsel %vm1261_vm7, %v3750_v39, %v3754_v56  ;;  %v3545_v44 = vpop.f32.mrf.mxu1 }
 0x35e   : > { %6103 = vmatmul.msk.bf16.gmra.mxu2 %vm3800_vm10, %v3755_v45  ;;  %v3030_v61 = vadd.f32 %v8286_v22, %v2897_v8  ;;  %v9421_v22 = vld [vmem:[#allocation21_spill] sm:$0xff]  ;;  %v3631_v39 = vsel %vm3612_vm0, %v3628_v50, %v3630_v10  ;;  %v3756_v46 = vshrl.u32 %v8486_v25, 16  ;;  %v6442_v25 = vld [vmem:[%s9161_s9 + $0x40] sm:$0xff] }
 0x35f   : > { %v3603_v29 = vmax.f32 %v3587_v47, 0.0  ;;  %v8506_v51 = vpack.c.b16 %v3722_v15, %v3721_v55  ;;  %v3305_v60 = vadd.f32 %v3277_v16, %v3149_v7  ;;  %v2585_v33 = vadd.f32 %v8352_v19, %v9421_v22  ;;  %4232 = vmatpush.bf16.msrb.mxu3 %v6442_v25 }
 0x361   : > { %v3441_v17 = vadd.f32 %v3413_v27, %v3305_v60  ;;  %v4284_v4 = vrot.slane %v8506_v51, 3  ;;  %v3669_v2 = vmul.f32 %v3629_v24, %v3603_v29  ;;  %v4154_v57 = vshll.u32 %v8506_v51, 16  ;;  %v6440_v24 = vld [vmem:[%s9161_s9 + $0x30] sm:$0xff] }
 0x362   : > { %v4151_v18 = vshrl.u32 %v8506_v51, 16  ;;  %4084 = vmatpush.bf16.msrb.mxu2 %v6440_v24 }
 0x363   : > { %v3568_v35 = vadd.f32 %v3540_v28, %v3441_v17  ;;  %v3279_v48 = vpop.f32.mrf.mxu3  ;;  %v4285_v55 = vsel %vm2763_vm2, %v4282_v13, %v4284_v4  ;;  %v3685_v31 = vpack.c.bf16 %v3669_v2, %v3669_v2  ;;  %v4469_v27 = vrot.slane %v4154_v57, 1  ;;  %v3418_v42 = vpop.f32.mrf.mxu0 }
 0x364   : > { %v3123_v41 = vpop.f32.mrf.mxu2  ;;  %6189 = vmatmul.msk.bf16.gmra.mxu1 %vm3800_vm10, %v4285_v55  ;;  %v2898_v13 = vadd.f32 %v8293_v1, %v8337_v36 }
 0x365   : > { %v3588_v28 = vadd.f32 %v8392_v30, %v3568_v35  ;;  %v3150_v59 = vadd.f32 %v3123_v41, %v3030_v61  ;;  %v3723_v5 = vunpack.c.l.b16 %v3685_v31  ;;  %v8527_v37 = vsel %vm1261_vm7, %v4468_v40, %v4469_v27 }
 0x366   : > { %v4471_v62 = vor.u32 %v4469_v27, %v4151_v18  ;;  %v2745_v40 = vadd.f32 %v8349_v43, %v2585_v33  ;;  %v3031_v53 = vadd.f32 %v8299_v32, %v2898_v13  ;;  %v9423_v13 = vld [vmem:[#allocation9_spill] sm:$0xff] }
 0x367   : > { %v3604_v11 = vmax.f32 %v3588_v28, 0.0  ;;  %v3306_v12 = vadd.f32 %v3279_v48, %v3150_v59  ;;  %v8531_v38 = vpack.c.b16 %v3723_v5, %v3722_v15  ;;  %v3758_v15 = vor.u32 %v3756_v46, %v3754_v56 }
 0x368   : > { %v2899_v2 = vadd.f32 %v8304_v54, %v2745_v40 }
 0x369   : > { %v3670_v16 = vmul.f32 %v3631_v39, %v3604_v11  ;;  %v3442_v19 = vadd.f32 %v3415_v3, %v3306_v12  ;;  %6119 = vmatmul.msk.bf16.gmra.mxu3 %vm3800_vm10, %v8531_v38  ;;  %v3931_v1 = vrot.slane %v8531_v38, 1  ;;  %v3760_v36 = vshll.u32 %v8531_v38, 16  ;;  %v9422_v3 = vld [vmem:[#allocation8_spill] sm:$0xff] }
 0x36a   : > { %v3632_v29 = vrot.slane %v9422_v3, 7  ;;  %v3032_v28 = vadd.f32 %v8307_v14, %v2899_v2  ;;  %v3634_v11 = vrot.slane %v9423_v13, 7 }
 0x36b   : > { %v3686_v47 = vpack.c.bf16 %v3670_v16, %v3670_v16  ;;  %v3569_v7 = vadd.f32 %v3542_v52, %v3442_v19  ;;  %v3282_v45 = vpop.f32.mrf.mxu3  ;;  %v3932_v34 = vsel %vm2472_vm8, %v3929_v0, %v3931_v1  ;;  %v3762_v50 = vrot.slane %v3760_v36, 1  ;;  %v3420_v31 = vpop.f32.mrf.mxu0 }
 0x36c   : > { %v3126_v60 = vpop.f32.mrf.mxu2  ;;  %6136 = vmatmul.msk.bf16.gmra.mxu0 %vm3800_vm10, %v3932_v34  ;;  %v3633_v35 = vsel %vm3612_vm0, %v3630_v10, %v3632_v29 }
 0x36d   : > { %v3724_v43 = vunpack.c.l.b16 %v3686_v47  ;;  %v3589_v8 = vadd.f32 %v8392_v30, %v3569_v7  ;;  %v3151_v32 = vadd.f32 %v3126_v60, %v3031_v53  ;;  %v3763_v56 = vsel %vm1261_vm7, %v3758_v15, %v3762_v50 }
 0x36e   : > { %6104 = vmatmul.msk.bf16.gmra.mxu2 %vm3800_vm10, %v3763_v56  ;;  %v3764_v53 = vshrl.u32 %v8531_v38, 16 }
 0x36f   : > { %v3605_v0 = vmax.f32 %v3589_v8, 0.0  ;;  %v8557_v52 = vpack.c.b16 %v3724_v43, %v3723_v5  ;;  %v3307_v17 = vadd.f32 %v3282_v45, %v3151_v32  ;;  %v3547_v5 = vpop.f32.mrf.mxu1  ;;  %v9426_v8 = vld [vmem:[#allocation47_spill] sm:$0xff] }
 0x370   : > { %v3766_v45 = vor.u32 %v3764_v53, %v3762_v50  ;;  %v3636_v32 = vrot.slane %v9426_v8, 7 }
 0x371   : > { %v3443_v48 = vadd.f32 %v3418_v42, %v3307_v17  ;;  %v4286_v61 = vrot.slane %v8557_v52, 3  ;;  %v3671_v55 = vmul.f32 %v3633_v35, %v3605_v0  ;;  %v4163_v21 = vshll.u32 %v8557_v52, 16 }
 0x372   : > { %v4160_v10 = vshrl.u32 %v8557_v52, 16  ;;  %v2590_v42 = vadd.f32 %v8367_v26, %v8046_v49 }
 0x373   : > { %v3570_v41 = vadd.f32 %v3545_v44, %v3443_v48  ;;  %v3284_v27 = vpop.f32.mrf.mxu3  ;;  %v4287_v59 = vsel %vm2763_vm2, %v4284_v4, %v4286_v61  ;;  %v3687_v54 = vpack.c.bf16 %v3671_v55, %v3671_v55  ;;  %v4472_v33 = vrot.slane %v4163_v21, 1  ;;  %v3423_v56 = vpop.f32.mrf.mxu0  ;;  %v9427_v48 = vld [vmem:[#allocation60_spill] sm:$0xff] }
 0x374   : > { %v3128_v22 = vpop.f32.mrf.mxu2  ;;  %6190 = vmatmul.msk.bf16.gmra.mxu1 %vm3800_vm10, %v4287_v59  ;;  %v2900_v4 = vadd.f32 %v8316_v6, %v8363_v20  ;;  %v3635_v44 = vsel %vm3612_vm0, %v3632_v29, %v3634_v11  ;;  %v9424_v20 = vld [vmem:[#allocation19_spill] sm:$0xff] }
 0x375   : > { %v3590_v12 = vadd.f32 %v8392_v30, %v3570_v41  ;;  %v3152_v39 = vadd.f32 %v3128_v22, %v3032_v28  ;;  %v3725_v14 = vunpack.c.l.b16 %v3687_v54  ;;  %v8578_v46 = vsel %vm1261_vm7, %v4471_v62, %v4472_v33  ;;  %v9425_v62 = vld [vmem:[#allocation41_spill] sm:$0xff] }
 0x376   : > { %v4474_v16 = vor.u32 %v4472_v33, %v4160_v10  ;;  %v2747_v6 = vadd.f32 %v9424_v20, %v2590_v42  ;;  %v3033_v7 = vadd.f32 %v9425_v62, %v2900_v4 }
 0x377   : > { %v3606_v19 = vmax.f32 %v3590_v12, 0.0  ;;  %v3308_v36 = vadd.f32 %v3284_v27, %v3152_v39  ;;  %v8582_v40 = vpack.c.b16 %v3725_v14, %v3724_v43  ;;  %v3550_v2 = vpop.f32.mrf.mxu1  ;;  %v9429_v12 = vld [vmem:[#allocation11_spill] sm:$0xff] }
 0x378   : > { %v2901_v55 = vadd.f32 %v9427_v48, %v2747_v6  ;;  %v3638_v39 = vrot.slane %v9429_v12, 7  ;;  %v4134_v48 = vshrl.u32 %v8434_v63, 16  ;;  %v9433_v12 = vld [vmem:[#allocation10_spill] sm:$0xff] }
 0x379   : > { %v3672_v15 = vmul.f32 %v3635_v44, %v3606_v19  ;;  %v3444_v47 = vadd.f32 %v3420_v31, %v3308_v36  ;;  %6120 = vmatmul.msk.bf16.gmra.mxu3 %vm3800_vm10, %v8582_v40  ;;  %v3933_v49 = vrot.slane %v8582_v40, 1  ;;  %v3768_v26 = vshll.u32 %v8582_v40, 16 }
 0x37a   : > { %v3637_v31 = vsel %vm3612_vm0, %v3634_v11, %v3636_v32  ;;  %v6447_v11 = vld [vmem:[%s9161_s9 + $0x68] sm:$0xff] }
 0x37b   : > { %v3688_v34 = vpack.c.bf16 %v3672_v15, %v3672_v15  ;;  %v3571_v3 = vadd.f32 %v3547_v5, %v3444_v47  ;;  %v3287_v60 = vpop.f32.mrf.mxu3  ;;  %v3934_v29 = vsel %vm2472_vm8, %v3931_v1, %v3933_v49  ;;  %v3770_v43 = vrot.slane %v3768_v26, 1  ;;  %v9428_v5 = vld [vmem:[#allocation32_spill] sm:$0xff]  ;;  %v3425_v53 = vpop.f32.mrf.mxu0  ;;  %v9430_v15 = vld [vmem:[#allocation49_spill] sm:$0xff]  ;;  %4414 = vmatpush.bf16.msra.mxu0 %v6447_v11 }
 0x37c   : > { %v3131_v24 = vpop.f32.mrf.mxu2  ;;  %6137 = vmatmul.msk.bf16.gmra.mxu0 %vm3800_vm10, %v3934_v29  ;;  %v3034_v22 = vadd.f32 %v9428_v5, %v2901_v55  ;;  %v9431_v47 = vld [vmem:[#allocation45_spill] sm:$0xff] }
 0x37d   : > { %v3726_v25 = vunpack.c.l.b16 %v3688_v34  ;;  %v3591_v0 = vadd.f32 %v8392_v30, %v3571_v3  ;;  %v3153_v50 = vadd.f32 %v3131_v24, %v3033_v7  ;;  %v3771_v17 = vsel %vm1261_vm7, %v3766_v45, %v3770_v43 }
 0x37e   : > { %6105 = vmatmul.msk.bf16.gmra.mxu2 %vm3800_vm10, %v3771_v17  ;;  %v2902_v26 = vadd.f32 %v9431_v47, %v9430_v15  ;;  %v3639_v34 = vsel %vm3612_vm0, %v3636_v32, %v3638_v39 }
 0x37f   : > { %v3607_v35 = vmax.f32 %v3591_v0, 0.0  ;;  %v8602_v38 = vpack.c.b16 %v3726_v25, %v3725_v14  ;;  %v3309_v1 = vadd.f32 %v3287_v60, %v3153_v50  ;;  %v3552_v3 = vpop.f32.mrf.mxu1  ;;  %v3772_v60 = vshrl.u32 %v8582_v40, 16  ;;  %v9432_v0 = vld [vmem:[#allocation51_spill] sm:$0xff] }
 0x380   : > { %v3035_v50 = vadd.f32 %v9432_v0, %v2902_v26  ;;  %v4137_v40 = vshll.u32 %v8434_v63, 16 }
 0x381   : > { %v3445_v41 = vadd.f32 %v3423_v56, %v3309_v1  ;;  %v4288_v27 = vrot.slane %v8602_v38, 3  ;;  %v3673_v28 = vmul.f32 %v3637_v31, %v3607_v35  ;;  %v4172_v59 = vshll.u32 %v8602_v38, 16 }
 0x382   : > { %v4169_v4 = vshrl.u32 %v8602_v38, 16  ;;  %v3774_v17 = vor.u32 %v3772_v60, %v3770_v43 }
 0x383   : > { %v3572_v54 = vadd.f32 %v3550_v2, %v3445_v41  ;;  %v4289_v33 = vsel %vm2763_vm2, %v4286_v61, %v4288_v27  ;;  %v3689_v13 = vpack.c.bf16 %v3673_v28, %v3673_v28  ;;  %v3289_v14 = vpop.f32.mrf.mxu3  ;;  %v4475_v19 = vrot.slane %v4172_v59, 1  ;;  %v3428_v11 = vpop.f32.mrf.mxu0 }
 0x384   : > { %v3133_v42 = vpop.f32.mrf.mxu2  ;;  %6191 = vmatmul.msk.bf16.gmra.mxu1 %vm3800_vm10, %v4289_v33 }
 0x385   : > { %v3592_v36 = vadd.f32 %v8392_v30, %v3572_v54  ;;  %v3154_v44 = vadd.f32 %v3133_v42, %v3034_v22  ;;  %v3727_v61 = vunpack.c.l.b16 %v3689_v13  ;;  %v8624_v20 = vsel %vm1261_vm7, %v4474_v16, %v4475_v19  ;;  %v6446_v16 = vld [vmem:[%s9161_s9 + $0x60] sm:$0xff]  ;;  %v6451_v54 = vld [vmem:[%s9161_s9 + $0x88] sm:$0xff] }
 0x386   : > { %v8628_v6 = vor.u32 %v4475_v19, %v4169_v4  ;;  %4415 = vmatpush.bf16.msra.mxu0 %v6446_v16  ;;  %v4136_v19 = vrot.slane %v4134_v48, 2  ;;  %4628 = vmatpush.bf16.msra.mxu3 %v6451_v54  ;;  %v4035_v54 = vrot.slane %v8464_v9, 2 }
 0x387   : > { %v3608_v62 = vmax.f32 %v3592_v36, 0.0  ;;  %v3310_v7 = vadd.f32 %v3289_v14, %v3154_v44  ;;  %v3734_v45 = vpack.c.b16 %v3727_v61, %v3726_v25  ;;  %v9434_v14 = vrot.slane %v9433_v12, 7  ;;  %v3555_v26 = vpop.f32.mrf.mxu1 }
 0x388   : > { %v4144_v36 = vrot.slane %v4142_v23, 2  ;;  %v4147_v44 = vrot.slane %v4145_v58, 3 }
 0x389   : > { %v3674_v29 = vmul.f32 %v3639_v34, %v3608_v62  ;;  %v3446_v8 = vadd.f32 %v3425_v53, %v3310_v7  ;;  %6121 = vmatmul.msk.bf16.gmra.mxu3 %vm3800_vm10, %v3734_v45  ;;  %v3935_v56 = vrot.slane %v3734_v45, 1  ;;  %v3776_v24 = vshll.u32 %v3734_v45, 16 }
 0x38a   : > { %v3641_v42 = vsel %vm3612_vm0, %v3638_v39, %v9434_v14  ;;  %v4139_v62 = vrot.slane %v4137_v40, 3  ;;  %v3780_v7 = vshrl.u32 %v3734_v45, 16 }
 0x38b   : > { %v3690_v2 = vpack.c.bf16 %v3674_v29, %v3674_v29  ;;  %v3573_v25 = vadd.f32 %v3552_v3, %v3446_v8  ;;  %v3936_v32 = vsel %vm2472_vm8, %v3933_v49, %v3935_v56  ;;  %v3778_v35 = vrot.slane %v3776_v24, 1  ;;  %v3292_v43 = vpop.f32.mrf.mxu3  ;;  %v6449_v49 = vld [vmem:[%s9161_s9 + $0x78] sm:$0xff] }
 0x38c   : > { %v3136_v1 = vpop.f32.mrf.mxu2  ;;  %6138 = vmatmul.msk.bf16.gmra.mxu0 %vm3800_vm10, %v3936_v32  ;;  %4529 = vmatpush.bf16.msra.mxu2 %v6449_v49  ;;  %v4148_v29 = vor.u32 %v4147_v44, %v4144_v36  ;;  %v4140_v0 = vor.u32 %v4139_v62, %v4136_v19  ;;  %v4171_v19 = vrot.slane %v4169_v4, 2  ;;  %v4174_v36 = vrot.slane %v4172_v59, 3  ;;  %v8726_v44 = vpop.f32.mrf.mxu0 }
 0x38d   : > { %v3728_v55 = vunpack.c.l.b16 %v3690_v2  ;;  %v3593_v31 = vadd.f32 %v8392_v30, %v3573_v25  ;;  %v3155_v41 = vadd.f32 %v3136_v1, %v3035_v50  ;;  %v3779_v28 = vsel %vm1261_vm7, %v3774_v17, %v3778_v35 }
 0x38e   : > { %6106 = vmatmul.msk.bf16.gmra.mxu2 %vm3800_vm10, %v3779_v28  ;;  %v3782_v8 = vor.u32 %v3780_v7, %v3778_v35  ;;  %v4039_v62 = vrot.slane %v8557_v52, 2 }
 0x38f   : > { %v3609_v5 = vmax.f32 %v3593_v31, 0.0  ;;  %v8652_v22 = vpack.c.b16 %v3728_v55, %v3727_v61  ;;  %v3311_v33 = vadd.f32 %v3292_v43, %v3155_v41  ;;  %v3735_v13 = vpack.c.b16 %v3728_v55, %v3728_v55 }
 0x390   : > { %v4156_v41 = vrot.slane %v4154_v57, 3 }
 0x391   : > { %v3675_v53 = vmul.f32 %v3641_v42, %v3609_v5  ;;  %v3447_v15 = vadd.f32 %v3428_v11, %v3311_v33  ;;  %v4290_v61 = vrot.slane %v8652_v22, 3  ;;  %v3937_v47 = vrot.slane %v3735_v13, 1 }
 0x392   : > { %v3784_v34 = vshll.u32 %v3735_v13, 16  ;;  %v4181_v39 = vshll.u32 %v8652_v22, 16  ;;  %v4178_v50 = vshrl.u32 %v8652_v22, 16  ;;  %v4034_v5 = vrot.slane %v8434_v63, 2 }
 0x393   : > { %v3691_v3 = vpack.c.bf16 %v3675_v53, %v3675_v53  ;;  %v3574_v60 = vadd.f32 %v3555_v26, %v3447_v15  ;;  %v4291_v23 = vsel %vm2763_vm2, %v4288_v27, %v4290_v61  ;;  %v3938_v58 = vsel %vm2472_vm8, %v3935_v56, %v3937_v47  ;;  %v8707_v13 = vpop.f32.mrf.mxu3 }
 0x394   : > { %6192 = vmatmul.msk.bf16.gmra.mxu1 %vm3800_vm10, %v4291_v23  ;;  %v3786_v24 = vrot.slane %v3784_v34, 1  ;;  %v4478_v17 = vrot.slane %v4181_v39, 1  ;;  %v4149_v27 = vsel %vm1718_vm5, %v4140_v0, %v4148_v29  ;;  %v4036_v57 = vsel %vm1586_vm4, %v4034_v5, %v4035_v54  ;;  %v8729_v47 = vpop.f32.mrf.mxu2 }
 0x395   : > { %v3594_v16 = vadd.f32 %v8392_v30, %v3574_v60  ;;  %v4026_v2 = vunpack.c.l.b16 %v3691_v3  ;;  %v9435_v30 = vld [vmem:[#allocation12_spill] sm:$0xff]  ;;  %v4165_v33 = vrot.slane %v4163_v21, 3  ;;  %v4037_v63 = vrot.slane %v8506_v51, 2 }
 0x396   : > { %v3787_v45 = vsel %vm1261_vm7, %v3782_v8, %v3786_v24  ;;  %v8676_v56 = vsel %vm1261_vm7, %v8628_v6, %v4478_v17  ;;  %v8678_v32 = vor.u32 %v4478_v17, %v4178_v50  ;;  %v4153_v6 = vrot.slane %v4151_v18, 2  ;;  %v6448_v21 = vld [vmem:[%s9161_s9 + $0x70] sm:$0xff] }
 0x397   : > { %v3610_v25 = vmax.f32 %v3594_v16, 0.0  ;;  %v8682_v1 = vpack.c.b16 %v4026_v2, %v4026_v2  ;;  %v4162_v18 = vrot.slane %v4160_v10, 2  ;;  %v4038_v11 = vsel %vm1586_vm4, %v4035_v54, %v4037_v63  ;;  %v6450_v10 = vld [vmem:[%s9161_s9 + $0x80] sm:$0xff]  ;;  %4530 = vmatpush.bf16.msra.mxu2 %v6448_v21 }
 0x398   : > { %v4157_v40 = vor.u32 %v4156_v41, %v4153_v6  ;;  %4629 = vmatpush.bf16.msra.mxu3 %v6450_v10  ;;  %v4175_v15 = vor.u32 %v4174_v36, %v4171_v19  ;;  %v4040_v59 = vsel %vm1586_vm4, %v4037_v63, %v4039_v62  ;;  %v4180_v4 = vrot.slane %v4178_v50, 2 }
 0x399   : > { %6170 = vmatmul.msk.bf16.vlgmr.msrb.gmra.mxu3 %vm3800_vm10, %v4149_v27  ;;  %v3676_v35 = vmul.f32 %v9435_v30, %v3610_v25  ;;  %v4292_v31 = vrot.slane %v8682_v1, 3  ;;  %v4166_v12 = vor.u32 %v4165_v33, %v4162_v18  ;;  %v4183_v34 = vrot.slane %v4181_v39, 3 }
 0x39a   : > { %v4158_v49 = vsel %vm1718_vm5, %v4148_v29, %v4157_v40  ;;  %v4187_v39 = vshrl.u32 %v8682_v1, 16  ;;  %v4043_v54 = vrot.slane %v8652_v22, 2  ;;  %v4579_v21 = vrot.slane %v8464_v9, 1 }
 0x39b   : > { %v3692_v48 = vpack.c.bf16 %v3676_v35, %v3676_v35  ;;  %v4293_v43 = vsel %vm2763_vm2, %v4290_v61, %v4292_v31  ;;  %v4167_v14 = vsel %vm1718_vm5, %v4157_v40, %v4166_v12  ;;  %v4176_v61 = vsel %vm1718_vm5, %v4166_v12, %v4175_v15 }
 0x39c   : > { %6139 = vmatmul.msk.bf16.gmra.mxu0 %vm3800_vm10, %v3938_v58  ;;  %v4184_v29 = vor.u32 %v4183_v34, %v4180_v4  ;;  %v4189_v27 = vrot.slane %v4187_v39, 2  ;;  %v4045_v36 = vrot.slane %v8682_v1, 2 }
 0x39d   : > { %v4381_v55 = vunpack.c.l.b16 %v3692_v48 }
 0x39e   : > { %6107 = vmatmul.msk.bf16.gmra.mxu2 %vm3800_vm10, %v3787_v45  ;;  %v4185_v24 = vsel %vm1718_vm5, %v4175_v15, %v4184_v29  ;;  %v4041_v45 = vrot.slane %v8602_v38, 2 }
 0x39f   : > { %v8691_v28 = vpack.c.b16 %v4381_v55, %v4026_v2  ;;  %v4190_v2 = vshll.u32 %v8682_v1, 16 }
 0x3a0   : > { %v4042_v25 = vsel %vm1586_vm4, %v4039_v62, %v4041_v45  ;;  %v4044_v18 = vsel %vm1586_vm4, %v4041_v45, %v4043_v54 }
 0x3a1   : > { %v4192_v30 = vrot.slane %v4190_v2, 3  ;;  %v4584_v2 = vrot.slane %v8602_v38, 1 }
 0x3a3   : > { %v4193_v6 = vor.u32 %v4192_v30, %v4189_v27  ;;  %v9439_v27 = vld [vmem:[#allocation40_spill] sm:$0xff] }
 0x3a4   : > { %6193 = vmatmul.msk.bf16.gmra.mxu1 %vm3800_vm10, %v4293_v43 }
 0x3a5   : > { %v4194_v43 = vsel %vm1718_vm5, %v4184_v29, %v4193_v6  ;;  %v9437_v29 = vld [vmem:[#allocation17_spill] sm:$0xff] }
 0x3a9   : > { %6171 = vmatmul.msk.bf16.gmra.mxu3 %vm3800_vm10, %v4158_v49 }
 0x3ac   : > { %6206 = vmatmul.msk.bf16.vlgmr.msra.gmra.mxu0 %vm3800_vm10, %v8464_v9 }
 0x3ae   : > { %6152 = vmatmul.msk.bf16.vlgmr.msrb.gmra.mxu2 %vm3800_vm10, %v4036_v57 }
 0x3b9   : > { %6172 = vmatmul.msk.bf16.gmra.mxu3 %vm3800_vm10, %v4167_v14 }
 0x3bc   : > { %v3891_v42 = vpop.f32.mrf.mxu3  ;;  %6207 = vmatmul.msk.bf16.gmra.mxu0 %vm3800_vm10, %v8506_v51 }
 0x3be   : > { %6153 = vmatmul.msk.bf16.gmra.mxu2 %vm3800_vm10, %v4038_v11 }
 0x3c4   : > { %v3893_v53 = vpop.f32.mrf.mxu3 }
 0x3c9   : > { %v3978_v26 = vpop.f32.mrf.mxu0  ;;  %6173 = vmatmul.msk.bf16.gmra.mxu3 %vm3800_vm10, %v4176_v61 }
 0x3cc   : > { %v3896_v7 = vpop.f32.mrf.mxu3  ;;  %6208 = vmatmul.msk.bf16.gmra.mxu0 %vm3800_vm10, %v8557_v52 }
 0x3ce   : > { %6154 = vmatmul.msk.bf16.gmra.mxu2 %vm3800_vm10, %v4040_v59 }
 0x3d1   : > { %v3828_v3 = vpop.f32.mrf.mxu2  ;;  %v8739_v60 = vpop.f32.mrf.mxu0 }
 0x3d2   : > { %v3892_v23 = vadd.f32 %v3891_v42, %v3828_v3  ;;  %v4580_v42 = vrot.slane %v8506_v51, 1  ;;  %v4046_v51 = vsel %vm1586_vm4, %v4043_v54, %v4045_v36 }
 0x3d4   : > { %v3898_v58 = vpop.f32.mrf.mxu3  ;;  %v8741_v8 = vadd.f32 %v3978_v26, %v3892_v23  ;;  %v4581_v10 = vsel %vm2472_vm8, %v4579_v21, %v4580_v42  ;;  %v3557_v21 = vpop.f32.mrf.mxu1 }
 0x3d9   : > { %v3830_v16 = vpop.f32.mrf.mxu2  ;;  %v3983_v0 = vpop.f32.mrf.mxu0  ;;  %6174 = vmatmul.msk.bf16.gmra.mxu3 %vm3800_vm10, %v4185_v24 }
 0x3da   : > { %v8746_v50 = vadd.f32 %v3893_v53, %v3830_v16 }
 0x3dc   : > { %v3901_v17 = vpop.f32.mrf.mxu3  ;;  %6209 = vmatmul.msk.bf16.gmra.mxu0 %vm3800_vm10, %v8602_v38 }
 0x3de   : > { %6155 = vmatmul.msk.bf16.gmra.mxu2 %vm3800_vm10, %v4042_v25 }
 0x3e1   : > { %v3833_v35 = vpop.f32.mrf.mxu2  ;;  %v8754_v48 = vpop.f32.mrf.mxu0 }
 0x3e2   : > { %v3897_v55 = vadd.f32 %v3896_v7, %v3833_v35  ;;  %v4582_v7 = vrot.slane %v8557_v52, 1 }
 0x3e4   : > { %v3903_v31 = vpop.f32.mrf.mxu3  ;;  %v8756_v41 = vadd.f32 %v3983_v0, %v3897_v55  ;;  %v4583_v1 = vsel %vm2472_vm8, %v4580_v42, %v4582_v7  ;;  %v9438_v0 = vld [vmem:[#allocation62_spill] sm:$0xff]  ;;  %v4585_v35 = vsel %vm2472_vm8, %v4582_v7, %v4584_v2 }
 0x3e9   : > { %v3835_v40 = vpop.f32.mrf.mxu2  ;;  %v3988_v49 = vpop.f32.mrf.mxu0  ;;  %6175 = vmatmul.msk.bf16.gmra.mxu3 %vm3800_vm10, %v4194_v43 }
 0x3ea   : > { %v8761_v5 = vadd.f32 %v3898_v58, %v3835_v40  ;;  %v9436_v58 = vld [vmem:[#allocation43_spill] sm:$0xff] }
 0x3eb   : > { %v2595_v24 = vadd.f32 %v9437_v29, %v9436_v58 }
 0x3ec   : > { %v3906_v57 = vpop.f32.mrf.mxu3  ;;  %6210 = vmatmul.msk.bf16.gmra.mxu0 %vm3800_vm10, %v8652_v22 }
 0x3ed   : > { %v2749_v45 = vadd.f32 %v9438_v0, %v2595_v24  ;;  %v6292_v0 = vld [vmem:[%s9163_s11 + $0x58] sm:$0xf0] }
 0x3ee   : > { %6156 = vmatmul.msk.bf16.gmra.mxu2 %vm3800_vm10, %v4044_v18 }
 0x3ef   : > { %v2903_v30 = vadd.f32 %v9439_v27, %v2749_v45 }
 0x3f1   : > { %v3838_v33 = vpop.f32.mrf.mxu2  ;;  %v8767_v12 = vpop.f32.mrf.mxu0 }
 0x3f2   : > { %v3902_v14 = vadd.f32 %v3901_v17, %v3838_v33 }
 0x3f4   : > { %v3908_v63 = vpop.f32.mrf.mxu3  ;;  %v8770_v11 = vadd.f32 %v3988_v49, %v3902_v14 }
 0x3f9   : > { %v3840_v19 = vpop.f32.mrf.mxu2  ;;  %6242 = vmatmul.msk.bf16.vlgmr.msra.gmra.mxu3 %vm3800_vm10, %v4581_v10  ;;  %v3993_v15 = vpop.f32.mrf.mxu0 }
 0x3fa   : > { %v8776_v53 = vadd.f32 %v3903_v31, %v3840_v19 }
 0x3fc   : > { %v3911_v61 = vpop.f32.mrf.mxu3  ;;  %6211 = vmatmul.msk.bf16.gmra.mxu0 %vm3800_vm10, %v8691_v28 }
 0x3fe   : > { %6157 = vmatmul.msk.bf16.gmra.mxu2 %vm3800_vm10, %v4046_v51 }
 0x401   : > { %v3843_v26 = vpop.f32.mrf.mxu2  ;;  %v8785_v4 = vpop.f32.mrf.mxu0 }
 0x402   : > { %v3907_v9 = vadd.f32 %v3906_v57, %v3843_v26 }
 0x404   : > { %v3913_v62 = vpop.f32.mrf.mxu3  ;;  %v8783_v59 = vadd.f32 %v3993_v15, %v3907_v9  ;;  %v4588_v9 = vrot.slane %v8691_v28, 1 }
 0x409   : > { %v3845_v34 = vpop.f32.mrf.mxu2  ;;  %6243 = vmatmul.msk.bf16.gmra.mxu3 %vm3800_vm10, %v4583_v1  ;;  %v3998_v16 = vpop.f32.mrf.mxu0  ;;  %v4009_v1 = vadd.f32 %v8739_v60, %v8746_v50  ;;  %v6462_v60 = vld [vmem:[%s9163_s11 + $0x54] sm:$0xf] }
 0x40a   : > { %v8789_v3 = vadd.f32 %v3908_v63, %v3845_v34  ;;  %v4586_v63 = vrot.slane %v8652_v22, 1  ;;  %v6295_v45 = vor.u32 %v6462_v60, %v6292_v0  ;;  %v6266_v60 = vld [vmem:[%s9163_s11 + $0x20] sm:$0xf] }
 0x40c   : > { %v3916_v23 = vpop.f32.mrf.mxu3  ;;  %v4589_v34 = vsel %vm2472_vm8, %v4586_v63, %v4588_v9  ;;  %5005 = vmatpush.bf16.msrb.mxu0 %v6295_v45 }
 0x40e   : > { %6224 = vmatmul.msk.bf16.vlgmr.msra.gmra.mxu2 %vm3800_vm10, %v8527_v37  ;;  %v9440_v37 = vld [vmem:[#allocation24_spill] sm:$0xff] }
 0x40f   : > { %v3036_v6 = vadd.f32 %v9440_v37, %v2903_v30  ;;  %v4011_v37 = vadd.f32 %v8754_v48, %v8761_v5  ;;  %v6460_v48 = vld [vmem:[%s9163_s11 + $0x44] sm:$0xf] }
 0x411   : > { %v3848_v52 = vpop.f32.mrf.mxu2  ;;  %v8801_v55 = vpop.f32.mrf.mxu0  ;;  %v3156_v40 = vadd.f32 %v8729_v47, %v3036_v6  ;;  %v4587_v47 = vsel %vm2472_vm8, %v4584_v2, %v4586_v63 }
 0x412   : > { %v3912_v17 = vadd.f32 %v3911_v61, %v3848_v52  ;;  %v6463_v52 = vld [vmem:[%s9163_s11 + $0x54] sm:$0xf0] }
 0x413   : > { %v3312_v38 = vadd.f32 %v8707_v13, %v3156_v40  ;;  %v6495_v13 = vld [vmem:[%s9160_s8] ss:$0 sm:$0xff] }
 0x414   : > { %v3918_v39 = vpop.f32.mrf.mxu3  ;;  %v8797_v25 = vadd.f32 %v3998_v16, %v3912_v17  ;;  %v6290_v16 = vld [vmem:[%s9163_s11 + $0x50] sm:$0xf] }
 0x415   : > { %v3448_v33 = vadd.f32 %v8726_v44, %v3312_v38  ;;  %v6291_v50 = vor.u32 %v6463_v52, %v6290_v16 }
 0x417   : > { %v3575_v10 = vadd.f32 %v3557_v21, %v3448_v33  ;;  %4966 = vmatpush.bf16.msra.mxu1 %v6291_v50  ;;  %v6284_v33 = vld [vmem:[%s9163_s11 + $0x48] sm:$0xf0]  ;;  %v6457_v50 = vld [vmem:[%s9163_s11 + $0x24] sm:$0xf0] }
 0x418   : > { %v6267_v0 = vor.u32 %v6457_v50, %v6266_v60  ;;  %v9442_v50 = vld [vmem:[#allocation35_spill] sm:$0xff] }
 0x419   : > { %v3850_v31 = vpop.f32.mrf.mxu2  ;;  %6244 = vmatmul.msk.bf16.gmra.mxu3 %vm3800_vm10, %v4585_v35  ;;  %v4003_v18 = vpop.f32.mrf.mxu0  ;;  %v3595_v36 = vadd.f32 %v6495_v13, %v3575_v10 }
 0x41a   : > { %v8805_v43 = vadd.f32 %v3913_v62, %v3850_v31  ;;  %v9441_v62 = vld [vmem:[#allocation13_spill] sm:$0xff]  ;;  %v4481_v31 = vshll.u32 %v8691_v28, 16 }
 0x41b   : > { %v3611_v22 = vmax.f32 %v3595_v36, 0.0  ;;  %v4485_v36 = vshrl.u32 %v8691_v28, 16 }
 0x41c   : > { %v4234_v49 = vpop.f32.mrf.mxu3 }
 0x41d   : > { %v3677_v7 = vmul.f32 %v9441_v62, %v3611_v22  ;;  %v6276_v62 = vld [vmem:[%s9163_s11 + $0x38] sm:$0xf0] }
 0x41e   : > { %6225 = vmatmul.msk.bf16.gmra.mxu2 %vm3800_vm10, %v8578_v46 }
 0x421   : > { %v3853_v54 = vpop.f32.mrf.mxu2  ;;  %v4005_v45 = vpop.f32.mrf.mxu0 }
 0x422   : > { %v3917_v57 = vadd.f32 %v3916_v23, %v3853_v54  ;;  %v3693_v23 = vpack.c.bf16 %v3677_v7, %v3677_v7 }
 0x424   : > { %v4236_v14 = vpop.f32.mrf.mxu3  ;;  %v8813_v42 = vadd.f32 %v4003_v18, %v3917_v57  ;;  %v4465_v24 = vunpack.c.l.b16 %v3693_v23  ;;  %v6461_v57 = vld [vmem:[%s9163_s11 + $0x44] sm:$0xf0] }
 0x426   : > { %v4466_v17 = vpack.c.b16 %v4465_v24, %v4465_v24 }
 0x428   : > { %v4590_v35 = vrot.slane %v4466_v17, 1 }
 0x429   : > { %v3855_v19 = vpop.f32.mrf.mxu2  ;;  %6245 = vmatmul.msk.bf16.gmra.mxu3 %vm3800_vm10, %v4587_v47 }
 0x42a   : > { %v8817_v46 = vadd.f32 %v3918_v39, %v3855_v19  ;;  %v4591_v6 = vsel %vm2472_vm8, %v4588_v9, %v4590_v35  ;;  %v4489_v19 = vshll.u32 %v4466_v17, 16  ;;  %v6459_v9 = vld [vmem:[%s9163_s11 + $0x34] sm:$0xf0]  ;;  %v4333_v35 = vpop.f32.mrf.mxu1 }
 0x42c   : > { %v4239_v44 = vpop.f32.mrf.mxu3 }
 0x42e   : > { %6226 = vmatmul.msk.bf16.gmra.mxu2 %vm3800_vm10, %v8624_v20 }
 0x431   : > { %v4086_v15 = vpop.f32.mrf.mxu2 }
 0x432   : > { %v4116_v61 = vadd.f32 %v4086_v15, %v8741_v8 }
 0x434   : > { %v8825_v51 = vadd.f32 %v4234_v49, %v4116_v61  ;;  %v4241_v26 = vpop.f32.mrf.mxu3 }
 0x439   : > { %v4088_v58 = vpop.f32.mrf.mxu2  ;;  %6246 = vmatmul.msk.bf16.gmra.mxu3 %vm3800_vm10, %v4589_v34 }
 0x43a   : > { %v4117_v20 = vadd.f32 %v4088_v58, %v4009_v1 }
 0x43c   : > { %v8833_v29 = vadd.f32 %v4236_v14, %v4117_v20  ;;  %v4244_v8 = vpop.f32.mrf.mxu3  ;;  %v6287_v14 = vor.u32 %v6460_v48, %v6284_v33  ;;  %v4015_v20 = vadd.f32 %v8785_v4, %v8789_v3  ;;  %v6268_v4 = vld [vmem:[%s9163_s11 + $0x28] sm:$0xf0]  ;;  %v4019_v33 = vadd.f32 %v4005_v45, %v8817_v46 }
 0x43e   : > { %6227 = vmatmul.msk.bf16.gmra.mxu2 %vm3800_vm10, %v8676_v56  ;;  %v4483_v56 = vrot.slane %v4481_v31, 1  ;;  %5006 = vmatpush.bf16.msrb.mxu0 %v6287_v14  ;;  %v4017_v31 = vadd.f32 %v8801_v55, %v8805_v43  ;;  %v6455_v55 = vld [vmem:[%s9163_s11 + $0x14] sm:$0xf0]  ;;  %v6454_v43 = vld [vmem:[%s9163_s11 + $0x14] sm:$0xf] }
 0x440   : > { %v4484_v5 = vsel %vm1261_vm7, %v8678_v32, %v4483_v56  ;;  %v4013_v32 = vadd.f32 %v8767_v12, %v8776_v53  ;;  %v4487_v15 = vor.u32 %v4485_v36, %v4483_v56  ;;  %v6458_v12 = vld [vmem:[%s9163_s11 + $0x34] sm:$0xf] }
 0x441   : > { %v4091_v39 = vpop.f32.mrf.mxu2  ;;  %v6279_v7 = vor.u32 %v6458_v12, %v6276_v62  ;;  %v6453_v62 = vld [vmem:[%s9163_s11 + $0x4] sm:$0xf0] }
 0x442   : > { %v4118_v2 = vadd.f32 %v4091_v39, %v8756_v41  ;;  %v6282_v41 = vld [vmem:[%s9163_s11 + $0x40] sm:$0xf] }
 0x443   : > { %v6283_v18 = vor.u32 %v6461_v57, %v6282_v41  ;;  %5007 = vmatpush.bf16.msrb.mxu0 %v6279_v7  ;;  %v6452_v7 = vld [vmem:[%s9163_s11 + $0x4] sm:$0xf] }
 0x444   : > { %v8850_v27 = vadd.f32 %v4239_v44, %v4118_v2  ;;  %v4246_v30 = vpop.f32.mrf.mxu3  ;;  %v4491_v44 = vrot.slane %v4489_v19, 1 }
 0x445   : > { %4967 = vmatpush.bf16.msra.mxu1 %v6283_v18  ;;  %v6258_v18 = vld [vmem:[%s9163_s11 + $0x10] sm:$0xf] }
 0x446   : > { %v4492_v28 = vsel %vm1261_vm7, %v4487_v15, %v4491_v44  ;;  %v6259_v14 = vor.u32 %v6455_v55, %v6258_v18 }
 0x449   : > { %v4093_v40 = vpop.f32.mrf.mxu2  ;;  %6247 = vmatmul.msk.bf16.gmra.mxu3 %vm3800_vm10, %v4591_v6 }
 0x44a   : > { %v4119_v49 = vadd.f32 %v4093_v40, %v4011_v37  ;;  %v4417_v37 = vpop.f32.mrf.mxu0 }
 0x44c   : > { %v8857_v38 = vadd.f32 %v4241_v26, %v4119_v49  ;;  %v4249_v54 = vpop.f32.mrf.mxu3 }
 0x44e   : > { %6228 = vmatmul.msk.bf16.gmra.mxu2 %vm3800_vm10, %v4484_v5 }
 0x451   : > { %v4096_v63 = vpop.f32.mrf.mxu2 }
 0x452   : > { %v4120_v21 = vadd.f32 %v4096_v63, %v8770_v11  ;;  %v6274_v11 = vld [vmem:[%s9163_s11 + $0x30] sm:$0xf]  ;;  %v4419_v48 = vpop.f32.mrf.mxu0 }
 0x453   : > { %v6275_v53 = vor.u32 %v6459_v9, %v6274_v11 }
 0x454   : > { %v8875_v10 = vadd.f32 %v4244_v8, %v4120_v21  ;;  %v4251_v47 = vpop.f32.mrf.mxu3 }
 0x455   : > { %4968 = vmatpush.bf16.msra.mxu1 %v6275_v53 }
 0x459   : > { %v4098_v13 = vpop.f32.mrf.mxu2  ;;  %4969 = vmatpush.bf16.msra.mxu1 %v6267_v0 }
 0x45a   : > { %v4121_v22 = vadd.f32 %v4098_v13, %v4013_v32  ;;  %v4363_v13 = vadd.f32 %v4333_v35, %v8825_v51  ;;  %v4422_v36 = vpop.f32.mrf.mxu0  ;;  %v6250_v51 = vld [vmem:[%s9163_s11] sm:$0xf] }
 0x45c   : > { %v8880_v61 = vadd.f32 %v4246_v30, %v4121_v22  ;;  %v4254_v26 = vpop.f32.mrf.mxu3  ;;  %v4447_v44 = vadd.f32 %v4417_v37, %v4363_v13 }
 0x45d   : > { %4970 = vmatpush.bf16.msra.mxu1 %v6259_v14 }
 0x45e   : > { %6229 = vmatmul.msk.bf16.gmra.mxu2 %vm3800_vm10, %v4492_v28 }
 0x461   : > { %v4101_v1 = vpop.f32.mrf.mxu2 }
 0x462   : > { %v4122_v34 = vadd.f32 %v4101_v1, %v8783_v59  ;;  %v6456_v59 = vld [vmem:[%s9163_s11 + $0x24] sm:$0xf]  ;;  %v4424_v53 = vpop.f32.mrf.mxu0 }
 0x463   : > { %v6271_v3 = vor.u32 %v6456_v59, %v6268_v4 }
 0x464   : > { %v8897_v23 = vadd.f32 %v4249_v54, %v4122_v34  ;;  %v4256_v58 = vpop.f32.mrf.mxu3  ;;  %v4335_v54 = vpop.f32.mrf.mxu1 }
 0x465   : > { %5008 = vmatpush.bf16.msrb.mxu0 %v6271_v3  ;;  %v4364_v12 = vadd.f32 %v4335_v54, %v8833_v29  ;;  %v6252_v29 = vld [vmem:[%s9163_s11 + $0x8] sm:$0xf0]  ;;  %v9443_v54 = vld [vmem:[#allocation16_spill] sm:$0xff] }
 0x467   : > { %v4448_v34 = vadd.f32 %v4419_v48, %v4364_v12 }
 0x469   : > { %v4103_v8 = vpop.f32.mrf.mxu2 }
 0x46a   : > { %v4123_v24 = vadd.f32 %v4103_v8, %v4015_v20  ;;  %v6255_v8 = vor.u32 %v6452_v7, %v6252_v29 }
 0x46c   : > { %v8901_v16 = vadd.f32 %v4251_v47, %v4123_v24  ;;  %v4259_v52 = vpop.f32.mrf.mxu3  ;;  %v4338_v63 = vpop.f32.mrf.mxu1 }
 0x46d   : > { %v4365_v4 = vadd.f32 %v4338_v63, %v8850_v27 }
 0x471   : > { %v4106_v17 = vpop.f32.mrf.mxu2 }
 0x472   : > { %v4124_v39 = vadd.f32 %v4106_v17, %v8797_v25 }
 0x474   : > { %v8916_v2 = vadd.f32 %v4254_v26, %v4124_v39  ;;  %v4261_v30 = vpop.f32.mrf.mxu3  ;;  %v8944_v26 = vld [vmem:[%s9162_s10] ss:$0 sm:$0xff]  ;;  %v4340_v11 = vpop.f32.mrf.mxu1  ;;  %v4449_v39 = vadd.f32 %v4422_v36, %v4365_v4 }
 0x479   : > { %v4108_v6 = vpop.f32.mrf.mxu2 }
 0x47a   : > { %v4125_v40 = vadd.f32 %v4108_v6, %v4017_v31 }
 0x47c   : > { %v8920_v56 = vadd.f32 %v4256_v58, %v4125_v40  ;;  %v4631_v49 = vpop.f32.mrf.mxu3  ;;  %v6251_v58 = vor.u32 %v6453_v62, %v6250_v51  ;;  %v4343_v3 = vpop.f32.mrf.mxu1  ;;  %v9445_v62 = vld [vmem:[#allocation20_spill] sm:$0xff] }
 0x47e   : > { %4971 = vmatpush.bf16.msra.mxu1 %v6251_v58 }
 0x481   : > { %v4111_v41 = vpop.f32.mrf.mxu2 }
 0x482   : > { %v4126_v57 = vadd.f32 %v4111_v41, %v8813_v42  ;;  %v6260_v42 = vld [vmem:[%s9163_s11 + $0x18] sm:$0xf0] }
 0x483   : > { %v6263_v47 = vor.u32 %v6454_v43, %v6260_v42 }
 0x484   : > { %v8923_v5 = vadd.f32 %v4259_v52, %v4126_v57  ;;  %v4633_v25 = vpop.f32.mrf.mxu3  ;;  %v4345_v27 = vpop.f32.mrf.mxu1 }
 0x485   : > { %5009 = vmatpush.bf16.msrb.mxu0 %v6263_v47  ;;  %v4367_v47 = vadd.f32 %v4343_v3, %v8875_v10  ;;  %v9446_v3 = vld [vmem:[#allocation27_spill] sm:$0xff] }
 0x489   : > { %v4113_v21 = vpop.f32.mrf.mxu2  ;;  %5010 = vmatpush.bf16.msrb.mxu0 %v6255_v8 }
 0x48a   : > { %v4127_v19 = vadd.f32 %v4113_v21, %v4019_v33 }
 0x48c   : > { %v8938_v32 = vadd.f32 %v4261_v30, %v4127_v19  ;;  %v4636_v22 = vpop.f32.mrf.mxu3  ;;  %v4427_v30 = vpop.f32.mrf.mxu0  ;;  %v9444_v19 = vld [vmem:[#allocation18_spill] sm:$0xff] }
 0x491   : > { %v4532_v15 = vpop.f32.mrf.mxu2 }
 0x492   : > { %v4562_v46 = vadd.f32 %v4532_v15, %v4447_v44  ;;  %v4348_v15 = vpop.f32.mrf.mxu1 }
 0x493   : > { %v4369_v4 = vadd.f32 %v4348_v15, %v8897_v23 }
 0x494   : > { %v4661_v9 = vadd.f32 %v4631_v49, %v4562_v46  ;;  %v4638_v60 = vpop.f32.mrf.mxu3  ;;  %v4366_v49 = vadd.f32 %v4340_v11, %v8857_v38  ;;  %v4429_v42 = vpop.f32.mrf.mxu0 }
 0x496   : > { %v4677_v28 = vadd.f32 %v8944_v26, %v4661_v9  ;;  %v4450_v55 = vadd.f32 %v4424_v53, %v4366_v49  ;;  %v4368_v53 = vadd.f32 %v4345_v27, %v8880_v61 }
 0x498   : > { %v4689_v1 = vmax.f32 %v4677_v28, 0.0  ;;  %v4452_v58 = vadd.f32 %v4429_v42, %v4368_v53 }
 0x499   : > { %v4534_v20 = vpop.f32.mrf.mxu2 }
 0x49a   : > { %v4792_v24 = vrot.slane %v4689_v1, 4  ;;  %v4563_v52 = vadd.f32 %v4534_v20, %v4448_v34 }
 0x49c   : > { %v4828_v59 = vadd.f32 %v4792_v24, %v9442_v50  ;;  %v4662_v0 = vadd.f32 %v4633_v25, %v4563_v52  ;;  %v4641_v57 = vpop.f32.mrf.mxu3  ;;  %v4432_v51 = vpop.f32.mrf.mxu0 }
 0x49d   : > { %v4350_v50 = vpop.f32.mrf.mxu1 }
 0x49e   : > { %v4678_v45 = vadd.f32 %v8944_v26, %v4662_v0 }
 0x4a0   : > { %v4690_v17 = vmax.f32 %v4678_v45, 0.0 }
 0x4a1   : > { %v4537_v35 = vpop.f32.mrf.mxu2 }
 0x4a2   : > { %v4793_v31 = vrot.slane %v4690_v17, 4  ;;  %v4564_v37 = vadd.f32 %v4537_v35, %v4449_v39  ;;  %v4453_v35 = vadd.f32 %v4432_v51, %v4369_v4  ;;  %v9450_v4 = vld [vmem:[#allocation34_spill] sm:$0xff] }
 0x4a4   : > { %v4794_v6 = vsel %vm4730_vm9, %v4792_v24, %v4793_v31  ;;  %v4663_v40 = vadd.f32 %v4636_v22, %v4564_v37  ;;  %v4643_v36 = vpop.f32.mrf.mxu3  ;;  %v4451_v22 = vadd.f32 %v4427_v30, %v4367_v47  ;;  %v4434_v39 = vpop.f32.mrf.mxu0 }
 0x4a5   : > { %v4829_v41 = vadd.f32 %v4794_v6, %v9443_v54 }
 0x4a6   : > { %v4679_v48 = vadd.f32 %v8944_v26, %v4663_v40 }
 0x4a7   : > { %v4841_v25 = vpack.c.bf16 %v4829_v41, %v4828_v59  ;;  %v4370_v41 = vadd.f32 %v4350_v50, %v8901_v16 }
 0x4a8   : > { %v4691_v18 = vmax.f32 %v4679_v48, 0.0  ;;  %v9447_v48 = vld [vmem:[#allocation23_spill] sm:$0xff] }
 0x4a9   : > { %v4539_v43 = vpop.f32.mrf.mxu2  ;;  %v4873_v8 = vrot.slane %v4841_v25, 2 }
 0x4aa   : > { %v4795_v33 = vrot.slane %v4691_v18, 4  ;;  %v4565_v14 = vadd.f32 %v4539_v43, %v4450_v55  ;;  %v4454_v55 = vadd.f32 %v4434_v39, %v4370_v41  ;;  %v9451_v41 = vld [vmem:[#allocation30_spill] sm:$0xff] }
 0x4ac   : > { %v4796_v63 = vsel %vm4730_vm9, %v4793_v31, %v4795_v33  ;;  %v4664_v21 = vadd.f32 %v4638_v60, %v4565_v14  ;;  %v4646_v29 = vpop.f32.mrf.mxu3  ;;  %v4437_v43 = vpop.f32.mrf.mxu0 }
 0x4ad   : > { %v4830_v38 = vadd.f32 %v4796_v63, %v9444_v19 }
 0x4ae   : > { %v4680_v13 = vadd.f32 %v8944_v26, %v4664_v21 }
 0x4b0   : > { %v4692_v44 = vmax.f32 %v4680_v13, 0.0  ;;  %v9448_v13 = vld [vmem:[#allocation50_spill] sm:$0xff] }
 0x4b1   : > { %v4542_v46 = vpop.f32.mrf.mxu2 }
 0x4b2   : > { %v4797_v11 = vrot.slane %v4692_v44, 4  ;;  %v4566_v9 = vadd.f32 %v4542_v46, %v4451_v22 }
 0x4b4   : > { %v4798_v12 = vsel %vm4730_vm9, %v4795_v33, %v4797_v11  ;;  %v4665_v28 = vadd.f32 %v4641_v57, %v4566_v9  ;;  %v4648_v40 = vpop.f32.mrf.mxu3  ;;  %v4353_v57 = vpop.f32.mrf.mxu1 }
 0x4b5   : > { %v4831_v7 = vadd.f32 %v4798_v12, %v9445_v62  ;;  %v4371_v16 = vadd.f32 %v4353_v57, %v8916_v2 }
 0x4b6   : > { %v4681_v10 = vadd.f32 %v8944_v26, %v4665_v28  ;;  %v4439_v28 = vpop.f32.mrf.mxu0 }
 0x4b7   : > { %v4842_v1 = vpack.c.bf16 %v4831_v7, %v4830_v38  ;;  %v4455_v46 = vadd.f32 %v4437_v43, %v4371_v16  ;;  %v9449_v7 = vld [vmem:[#allocation26_spill] sm:$0xff] }
 0x4b8   : > { %v4693_v34 = vmax.f32 %v4681_v10, 0.0 }
 0x4b9   : > { %v4544_v20 = vpop.f32.mrf.mxu2  ;;  %v4874_v24 = vrot.slane %v4842_v1, 2 }
 0x4ba   : > { %v4799_v52 = vrot.slane %v4693_v34, 4  ;;  %v4567_v60 = vadd.f32 %v4544_v20, %v4452_v58 }
 0x4bb   : > { %v4875_v59 = vsel %vm1586_vm4, %v4873_v8, %v4874_v24 }
 0x4bc   : > { %v4800_v0 = vsel %vm4730_vm9, %v4797_v11, %v4799_v52  ;;  %v4666_v61 = vadd.f32 %v4643_v36, %v4567_v60  ;;  %6296 = vmatmul.msk.bf16.vlgmr.msra.gmra.mxu1 %vm1022_vm1, %v4875_v59  ;;  %6302 = vmatmul.msk.bf16.vlgmr.msrb.gmra.mxu0 %vm1022_vm1, %v4875_v59  ;;  %v4651_v38 = vpop.f32.mrf.mxu3  ;;  %v4355_v22 = vpop.f32.mrf.mxu1 }
 0x4bd   : > { %v4832_v45 = vadd.f32 %v4800_v0, %v9446_v3  ;;  %v4372_v62 = vadd.f32 %v4355_v22, %v8920_v56  ;;  %v9454_v22 = vld [vmem:[#allocation38_spill] sm:$0xff] }
 0x4be   : > { %v4682_v17 = vadd.f32 %v8944_v26, %v4666_v61  ;;  %v4442_v61 = vpop.f32.mrf.mxu0 }
 0x4c0   : > { %v4694_v30 = vmax.f32 %v4682_v17, 0.0 }
 0x4c1   : > { %v4547_v31 = vpop.f32.mrf.mxu2 }
 0x4c2   : > { %v4801_v37 = vrot.slane %v4694_v30, 4  ;;  %v4568_v6 = vadd.f32 %v4547_v31, %v4453_v35 }
 0x4c4   : > { %v4802_v49 = vsel %vm4730_vm9, %v4799_v52, %v4801_v37  ;;  %v4667_v54 = vadd.f32 %v4646_v29, %v4568_v6  ;;  %v4653_v1 = vpop.f32.mrf.mxu3  ;;  %v4456_v29 = vadd.f32 %v4439_v28, %v4372_v62  ;;  %v4358_v20 = vpop.f32.mrf.mxu1  ;;  %v6497_v62 = vld [vmem:[%s6676_s21 + $0x50] sm:$0xff] }
 0x4c5   : > { %v4833_v27 = vadd.f32 %v4802_v49, %v9447_v48  ;;  %v4373_v56 = vadd.f32 %v4358_v20, %v8923_v5 }
 0x4c6   : > { %v4683_v23 = vadd.f32 %v8944_v26, %v4667_v54  ;;  %v4444_v48 = vpop.f32.mrf.mxu0 }
 0x4c7   : > { %v4843_v25 = vpack.c.bf16 %v4833_v27, %v4832_v45  ;;  %v4457_v39 = vadd.f32 %v4442_v61, %v4373_v56  ;;  %v6503_v61 = vld [vmem:[%s6676_s21 + $0x78] sm:$0xff] }
 0x4c8   : > { %v4695_v18 = vmax.f32 %v4683_v23, 0.0 }
 0x4c9   : > { %v4549_v33 = vpop.f32.mrf.mxu2  ;;  %v4876_v14 = vrot.slane %v4843_v25, 2 }
 0x4ca   : > { %v4803_v42 = vrot.slane %v4695_v18, 4  ;;  %v4569_v63 = vadd.f32 %v4549_v33, %v4454_v55 }
 0x4cb   : > { %v4877_v21 = vsel %vm1586_vm4, %v4874_v24, %v4876_v14 }
 0x4cc   : > { %v4804_v47 = vsel %vm4730_vm9, %v4801_v37, %v4803_v42  ;;  %v4668_v19 = vadd.f32 %v4648_v40, %v4569_v63  ;;  %6297 = vmatmul.msk.bf16.gmra.mxu1 %vm1022_vm1, %v4877_v21  ;;  %6303 = vmatmul.msk.bf16.gmra.mxu0 %vm1022_vm1, %v4877_v21  ;;  %v4656_v30 = vpop.f32.mrf.mxu3  ;;  %v4360_v6 = vpop.f32.mrf.mxu1 }
 0x4cd   : > { %v4834_v36 = vadd.f32 %v4804_v47, %v9448_v13  ;;  %v4374_v54 = vadd.f32 %v4360_v6, %v8938_v32  ;;  %v9452_v32 = vld [vmem:[#allocation33_spill] sm:$0xff] }
 0x4ce   : > { %v4684_v44 = vadd.f32 %v8944_v26, %v4668_v19 }
 0x4cf   : > { %v4458_v25 = vadd.f32 %v4444_v48, %v4374_v54 }
 0x4d0   : > { %v4696_v15 = vmax.f32 %v4684_v44, 0.0 }
 0x4d1   : > { %v4552_v11 = vpop.f32.mrf.mxu2 }
 0x4d2   : > { %v4805_v9 = vrot.slane %v4696_v15, 4  ;;  %v4570_v12 = vadd.f32 %v4552_v11, %v4455_v46 }
 0x4d4   : > { %v4806_v53 = vsel %vm4730_vm9, %v4803_v42, %v4805_v9  ;;  %v4669_v51 = vadd.f32 %v4651_v38, %v4570_v12 }
 0x4d5   : > { %v4835_v10 = vadd.f32 %v4806_v53, %v9449_v7  ;;  %v6496_v53 = vld [vmem:[%s6676_s21 + $0x40] sm:$0xff]  ;;  %v5069_v7 = vrot.slane %v6497_v62, 4  ;;  %v6511_v62 = vld [vmem:[%s6676_s21 + $0xb8] sm:$0xff] }
 0x4d6   : > { %v4685_v2 = vadd.f32 %v8944_v26, %v4669_v51  ;;  %v5068_v51 = vrot.slane %v6496_v53, 4 }
 0x4d7   : > { %v4844_v34 = vpack.c.bf16 %v4835_v10, %v4834_v36  ;;  %v9453_v36 = vld [vmem:[#allocation42_spill] sm:$0xff] }
 0x4d8   : > { %v4697_v58 = vmax.f32 %v4685_v2, 0.0  ;;  %v5070_v10 = vsel %vm4730_vm9, %v5068_v51, %v5069_v7  ;;  %v6498_v2 = vld [vmem:[%s6676_s21 + $0x48] sm:$0xff] }
 0x4d9   : > { %v4554_v8 = vpop.f32.mrf.mxu2  ;;  %v4878_v24 = vrot.slane %v4844_v34, 2  ;;  %v6499_v34 = vld [vmem:[%s6676_s21 + $0x58] sm:$0xff] }
 0x4da   : > { %v4807_v52 = vrot.slane %v4697_v58, 4  ;;  %v4571_v60 = vadd.f32 %v4554_v8, %v4456_v29  ;;  %v5072_v58 = vrot.slane %v6499_v34, 4  ;;  %v6500_v29 = vld [vmem:[%s6676_s21 + $0x60] sm:$0xff] }
 0x4db   : > { %v4879_v50 = vsel %vm1586_vm4, %v4876_v14, %v4878_v24  ;;  %v4658_v14 = vpop.f32.mrf.mxu3  ;;  %v5074_v20 = vrot.slane %v6500_v29, 4 }
 0x4dc   : > { %v4808_v59 = vsel %vm4730_vm9, %v4805_v9, %v4807_v52  ;;  %v4670_v0 = vadd.f32 %v4653_v1, %v4571_v60  ;;  %6298 = vmatmul.msk.bf16.gmra.mxu1 %vm1022_vm1, %v4879_v50  ;;  %6304 = vmatmul.msk.bf16.gmra.mxu0 %vm1022_vm1, %v4879_v50  ;;  %v5071_v1 = vrot.slane %v6498_v2, 4  ;;  %v6502_v50 = vld [vmem:[%s6676_s21 + $0x70] sm:$0xff] }
 0x4dd   : > { %v4836_v3 = vadd.f32 %v4808_v59, %v9450_v4  ;;  %v5078_v59 = vrot.slane %v6502_v50, 4  ;;  %v5080_v4 = vrot.slane %v6503_v61, 4 }
 0x4de   : > { %v4686_v45 = vadd.f32 %v8944_v26, %v4670_v0  ;;  %v5073_v8 = vsel %vm4730_vm9, %v5071_v1, %v5072_v58  ;;  %v6512_v1 = vld [vmem:[%s6676_s21 + $0xc0] sm:$0xff] }
 0x4df   : > { %v5079_v56 = vsel %vm4730_vm9, %v5074_v20, %v5078_v59  ;;  %v5098_v34 = vrot.slane %v6512_v1, 4 }
 0x4e0   : > { %v4698_v17 = vmax.f32 %v4686_v45, 0.0 }
 0x4e1   : > { %v4557_v35 = vpop.f32.mrf.mxu2 }
 0x4e2   : > { %v4809_v31 = vrot.slane %v4698_v17, 4  ;;  %v4572_v37 = vadd.f32 %v4557_v35, %v4457_v39  ;;  %v6505_v35 = vld [vmem:[%s6676_s21 + $0x88] sm:$0xff] }
 0x4e4   : > { %v4810_v40 = vsel %vm4730_vm9, %v4807_v52, %v4809_v31  ;;  %v4671_v49 = vadd.f32 %v4656_v30, %v4572_v37  ;;  %v6501_v52 = vld [vmem:[%s6676_s21 + $0x68] sm:$0xff]  ;;  %v4860_v30 = vld [vmem:[%s9164_s12] sm:$0x3]  ;;  %v6506_v37 = vld [vmem:[%s6676_s21 + $0x90] sm:$0xff] }
 0x4e5   : > { %v4837_v57 = vadd.f32 %v4810_v40, %v9451_v41  ;;  %v5076_v60 = vrot.slane %v6501_v52, 4  ;;  %v5086_v6 = vrot.slane %v6506_v37, 4  ;;  %v9046_v40 = vperm.slane %v4860_v30, 0 }
 0x4e6   : > { %v4687_v5 = vadd.f32 %v8944_v26, %v4671_v49  ;;  %v9048_v49 = vperm.slane %v4860_v30, 1 }
 0x4e7   : > { %v4845_v27 = vpack.c.bf16 %v4837_v57, %v4836_v3  ;;  %v5077_v0 = vsel %vm4730_vm9, %v5072_v58, %v5076_v60  ;;  %v6504_v3 = vld [vmem:[%s6676_s21 + $0x80] sm:$0xff]  ;;  %v5081_v17 = vsel %vm4730_vm9, %v5076_v60, %v5080_v4 }
 0x4e8   : > { %v4699_v23 = vmax.f32 %v4687_v5, 0.0  ;;  %v5082_v45 = vrot.slane %v6504_v3, 4 }
 0x4e9   : > { %v4559_v18 = vpop.f32.mrf.mxu2  ;;  %v4880_v55 = vrot.slane %v4845_v27, 2 }
 0x4ea   : > { %v4811_v43 = vrot.slane %v4699_v23, 4  ;;  %v4573_v33 = vadd.f32 %v4559_v18, %v4458_v25  ;;  %v9039_v39 = vsel %vm4730_vm9, %v5078_v59, %v5082_v45  ;;  %v9055_v27 = vsel %vm4730_vm9, %v5082_v45, %v5086_v6  ;;  %v6507_v23 = vld [vmem:[%s6676_s21 + $0x98] sm:$0xff]  ;;  %v6513_v59 = vld [vmem:[%s6676_s21 + $0xc8] sm:$0xff] }
 0x4eb   : > { %v4881_v42 = vsel %vm1586_vm4, %v4878_v24, %v4880_v55  ;;  %v5075_v24 = vsel %vm4730_vm9, %v5069_v7, %v5074_v20  ;;  %v5088_v25 = vrot.slane %v6507_v23, 4  ;;  %v5096_v7 = vrot.slane %v6511_v62, 4 }
 0x4ec   : > { %v4812_v63 = vsel %vm4730_vm9, %v4809_v31, %v4811_v43  ;;  %v4672_v21 = vadd.f32 %v4658_v14, %v4573_v33  ;;  %6299 = vmatmul.msk.bf16.gmra.mxu1 %vm1022_vm1, %v4881_v42  ;;  %6305 = vmatmul.msk.bf16.gmra.mxu0 %vm1022_vm1, %v4881_v42  ;;  %v5084_v31 = vrot.slane %v6505_v35, 4 }
 0x4ed   : > { %v4838_v47 = vadd.f32 %v4812_v63, %v9452_v32 }
 0x4ee   : > { %v4688_v19 = vadd.f32 %v8944_v26, %v4672_v21  ;;  %v5085_v54 = vsel %vm4730_vm9, %v5080_v4, %v5084_v31  ;;  %v5089_v63 = vsel %vm4730_vm9, %v5084_v31, %v5088_v25  ;;  %v6514_v4 = vld [vmem:[%s6676_s21 + $0xd0] sm:$0xff] }
 0x4ef   : > { %v5102_v3 = vrot.slane %v6514_v4, 4 }
 0x4f0   : > { %v4700_v16 = vmax.f32 %v4688_v19, 0.0 }
 0x4f2   : > { %v4813_v38 = vrot.slane %v4700_v16, 4 }
 0x4f4   : > { %v4814_v13 = vsel %vm4730_vm9, %v4811_v43, %v4813_v38  ;;  %v4840_v44 = vadd.f32 %v4813_v38, %v9453_v36  ;;  %v6508_v43 = vld [vmem:[%s6676_s21 + $0xa0] sm:$0xff]  ;;  %v6509_v38 = vld [vmem:[%s6676_s21 + $0xa8] sm:$0xff] }
 0x4f5   : > { %v4839_v15 = vadd.f32 %v4814_v13, %v9454_v22  ;;  %v5090_v33 = vrot.slane %v6508_v43, 4  ;;  %v5092_v13 = vrot.slane %v6509_v38, 4  ;;  %v6510_v22 = vld [vmem:[%s6676_s21 + $0xb0] sm:$0xff] }
 0x4f6   : > { %v4847_v46 = vpack.c.bf16 %v4840_v44, %v4840_v44 }
 0x4f7   : > { %v4846_v11 = vpack.c.bf16 %v4839_v15, %v4838_v47  ;;  %v9070_v16 = vsel %vm4730_vm9, %v5086_v6, %v5090_v33  ;;  %v5094_v15 = vrot.slane %v6510_v22, 4  ;;  %v5097_v20 = vsel %vm4730_vm9, %v5092_v13, %v5096_v7 }
 0x4f8   : > { %v4884_v9 = vrot.slane %v4847_v46, 2 }
 0x4f9   : > { %v4882_v12 = vrot.slane %v4846_v11, 2  ;;  %v9080_v51 = vsel %vm4730_vm9, %v5090_v33, %v5094_v15  ;;  %v9090_v50 = vsel %vm4730_vm9, %v5094_v15, %v5098_v34 }
 0x4fb   : > { %v4883_v28 = vsel %vm1586_vm4, %v4880_v55, %v4882_v12  ;;  %v4885_v26 = vsel %vm1586_vm4, %v4882_v12, %v4884_v9  ;;  %v5093_v9 = vsel %vm4730_vm9, %v5088_v25, %v5092_v13 }
 0x4fc   : > { %6300 = vmatmul.msk.bf16.gmra.mxu1 %vm1022_vm1, %v4883_v28  ;;  %6306 = vmatmul.msk.bf16.gmra.mxu0 %vm1022_vm1, %v4883_v28 }
 0x50c   : > { %6301 = vmatmul.msk.bf16.gmra.mxu1 %vm1022_vm1, %v4885_v26  ;;  %6307 = vmatmul.msk.bf16.gmra.mxu0 %vm1022_vm1, %v4885_v26 }
 0x539   : > { %v4973_v41 = vpop.f32.mrf.mxu1  ;;  %v5012_v57 = vpop.f32.mrf.mxu0 }
 0x53a   : > { %v4974_v5 = vadd.f32 %v4973_v41, %v9046_v40  ;;  %v5013_v48 = vadd.f32 %v5012_v57, %v9048_v49 }
 0x53c   : > { %v5142_v18 = vadd.f32 %v5070_v10, %v4974_v5  ;;  %v5143_v55 = vadd.f32 %v5073_v8, %v5013_v48  ;;  %v6516_v48 = vld [vmem:[%s6676_s21 + $0xe0] sm:$0xff] }
 0x53d   : > { %v5106_v23 = vrot.slane %v6516_v48, 4 }
 0x53e   : > { %v5166_v14 = vmax.f32 %v5142_v18, 0.0  ;;  %v5167_v42 = vmax.f32 %v5143_v55, 0.0 }
 0x540   : > { %5190 = vst [vmem:[%s9061_s20] sm:$0xff] %v5166_v14 }
 0x541   : > { %5191 = vst [vmem:[%s9061_s20 + $0x8] sm:$0xff] %v5167_v42  ;;  %v4975_v21 = vpop.f32.mrf.mxu1  ;;  %v5014_v32 = vpop.f32.mrf.mxu0 }
 0x542   : > { %v4976_v47 = vadd.f32 %v4975_v21, %v9046_v40  ;;  %v5015_v19 = vadd.f32 %v5014_v32, %v9048_v49 }
 0x544   : > { %v5144_v36 = vadd.f32 %v5075_v24, %v4976_v47  ;;  %v5145_v44 = vadd.f32 %v5077_v0, %v5015_v19  ;;  %v5100_v0 = vrot.slane %v6513_v59, 4  ;;  %v6518_v19 = vld [vmem:[%s6676_s21 + $0xf0] sm:$0xff] }
 0x545   : > { %v5110_v38 = vrot.slane %v6518_v19, 4 }
 0x546   : > { %v5168_v46 = vmax.f32 %v5144_v36, 0.0  ;;  %v5169_v11 = vmax.f32 %v5145_v44, 0.0  ;;  %v5101_v30 = vsel %vm4730_vm9, %v5096_v7, %v5100_v0 }
 0x548   : > { %5192 = vst [vmem:[%s9061_s20 + $0x10] sm:$0xff] %v5168_v46 }
 0x549   : > { %5193 = vst [vmem:[%s9061_s20 + $0x18] sm:$0xff] %v5169_v11  ;;  %v4978_v12 = vpop.f32.mrf.mxu1  ;;  %v5017_v28 = vpop.f32.mrf.mxu0 }
 0x54a   : > { %v4979_v26 = vadd.f32 %v4978_v12, %v9046_v40  ;;  %v5018_v53 = vadd.f32 %v5017_v28, %v9048_v49 }
 0x54c   : > { %v5146_v10 = vadd.f32 %v5079_v56, %v4979_v26  ;;  %v5147_v2 = vadd.f32 %v5081_v17, %v5018_v53  ;;  %v6520_v53 = vld [vmem:[%s6676_s21 + $0x100] sm:$0xff] }
 0x54d   : > { %v5114_v62 = vrot.slane %v6520_v53, 4 }
 0x54e   : > { %v5170_v58 = vmax.f32 %v5146_v10, 0.0  ;;  %v5171_v29 = vmax.f32 %v5147_v2, 0.0 }
 0x550   : > { %5194 = vst [vmem:[%s9061_s20 + $0x20] sm:$0xff] %v5170_v58 }
 0x551   : > { %5195 = vst [vmem:[%s9061_s20 + $0x28] sm:$0xff] %v5171_v29  ;;  %v4980_v8 = vpop.f32.mrf.mxu1  ;;  %v5019_v24 = vpop.f32.mrf.mxu0 }
 0x552   : > { %v4981_v52 = vadd.f32 %v4980_v8, %v9046_v40  ;;  %v5020_v60 = vadd.f32 %v5019_v24, %v9048_v49  ;;  %v5115_v8 = vsel %vm4730_vm9, %v5110_v38, %v5114_v62 }
 0x554   : > { %v5148_v56 = vadd.f32 %v9039_v39, %v4981_v52  ;;  %v5149_v61 = vadd.f32 %v5085_v54, %v5020_v60  ;;  %v5103_v39 = vsel %vm4730_vm9, %v5098_v34, %v5102_v3  ;;  %v6515_v54 = vld [vmem:[%s6676_s21 + $0xd8] sm:$0xff] }
 0x555   : > { %v5104_v41 = vrot.slane %v6515_v54, 4 }
 0x556   : > { %v5172_v45 = vmax.f32 %v5148_v56, 0.0  ;;  %v5173_v17 = vmax.f32 %v5149_v61, 0.0 }
 0x557   : > { %v5105_v55 = vsel %vm4730_vm9, %v5100_v0, %v5104_v41 }
 0x558   : > { %5196 = vst [vmem:[%s9061_s20 + $0x30] sm:$0xff] %v5172_v45 }
 0x559   : > { %5197 = vst [vmem:[%s9061_s20 + $0x38] sm:$0xff] %v5173_v17  ;;  %v4983_v35 = vpop.f32.mrf.mxu1  ;;  %v5022_v31 = vpop.f32.mrf.mxu0 }
 0x55a   : > { %v4984_v37 = vadd.f32 %v4983_v35, %v9046_v40  ;;  %v5023_v6 = vadd.f32 %v5022_v31, %v9048_v49 }
 0x55c   : > { %v5150_v57 = vadd.f32 %v9055_v27, %v4984_v37  ;;  %v5151_v5 = vadd.f32 %v5089_v63, %v5023_v6  ;;  %v5107_v27 = vsel %vm4730_vm9, %v5102_v3, %v5106_v23  ;;  %v6517_v63 = vld [vmem:[%s6676_s21 + $0xe8] sm:$0xff] }
 0x55d   : > { %v5108_v21 = vrot.slane %v6517_v63, 4 }
 0x55e   : > { %v5174_v25 = vmax.f32 %v5150_v57, 0.0  ;;  %v5175_v18 = vmax.f32 %v5151_v5, 0.0 }
 0x55f   : > { %v5109_v44 = vsel %vm4730_vm9, %v5104_v41, %v5108_v21 }
 0x560   : > { %5198 = vst [vmem:[%s9061_s20 + $0x40] sm:$0xff] %v5174_v25 }
 0x561   : > { %5199 = vst [vmem:[%s9061_s20 + $0x48] sm:$0xff] %v5175_v18  ;;  %v4985_v43 = vpop.f32.mrf.mxu1  ;;  %v5024_v33 = vpop.f32.mrf.mxu0 }
 0x562   : > { %v4986_v14 = vadd.f32 %v4985_v43, %v9046_v40  ;;  %v5025_v42 = vadd.f32 %v5024_v33, %v9048_v49 }
 0x564   : > { %v5152_v32 = vadd.f32 %v9070_v16, %v4986_v14  ;;  %v5153_v47 = vadd.f32 %v5093_v9, %v5025_v42  ;;  %v5111_v16 = vsel %vm4730_vm9, %v5106_v23, %v5110_v38  ;;  %v6519_v9 = vld [vmem:[%s6676_s21 + $0xf8] sm:$0xff] }
 0x565   : > { %v5112_v12 = vrot.slane %v6519_v9, 4 }
 0x566   : > { %v5176_v13 = vmax.f32 %v5152_v32, 0.0  ;;  %v5177_v36 = vmax.f32 %v5153_v47, 0.0 }
 0x567   : > { %v5113_v2 = vsel %vm4730_vm9, %v5108_v21, %v5112_v12 }
 0x568   : > { %5200 = vst [vmem:[%s9061_s20 + $0x50] sm:$0xff] %v5176_v13 }
 0x569   : > { %5201 = vst [vmem:[%s9061_s20 + $0x58] sm:$0xff] %v5177_v36  ;;  %v4988_v22 = vpop.f32.mrf.mxu1  ;;  %v5027_v15 = vpop.f32.mrf.mxu0 }
 0x56a   : > { %v4989_v46 = vadd.f32 %v4988_v22, %v9046_v40  ;;  %v5028_v11 = vadd.f32 %v5027_v15, %v9048_v49 }
 0x56c   : > { %v5154_v28 = vadd.f32 %v9080_v51, %v4989_v46  ;;  %v5155_v26 = vadd.f32 %v5097_v20, %v5028_v11  ;;  %v6521_v51 = vld [vmem:[%s6676_s21 + $0x108] sm:$0xff] }
 0x56d   : > { %v5116_v20 = vrot.slane %v6521_v51, 4 }
 0x56e   : > { %v5178_v7 = vmax.f32 %v5154_v28, 0.0  ;;  %v5179_v10 = vmax.f32 %v5155_v26, 0.0 }
 0x56f   : > { %v5117_v0 = vsel %vm4730_vm9, %v5112_v12, %v5116_v20 }
 0x570   : > { %5202 = vst [vmem:[%s9061_s20 + $0x60] sm:$0xff] %v5178_v7 }
 0x571   : > { %5203 = vst [vmem:[%s9061_s20 + $0x68] sm:$0xff] %v5179_v10  ;;  %v4990_v1 = vpop.f32.mrf.mxu1  ;;  %v5029_v34 = vpop.f32.mrf.mxu0 }
 0x572   : > { %v4991_v58 = vadd.f32 %v4990_v1, %v9046_v40  ;;  %v5030_v29 = vadd.f32 %v5029_v34, %v9048_v49 }
 0x574   : > { %v5156_v24 = vadd.f32 %v9090_v50, %v4991_v58  ;;  %v5157_v52 = vadd.f32 %v5101_v30, %v5030_v29 }
 0x576   : > { %v5180_v60 = vmax.f32 %v5156_v24, 0.0  ;;  %v5181_v59 = vmax.f32 %v5157_v52, 0.0 }
 0x578   : > { %5204 = vst [vmem:[%s9061_s20 + $0x70] sm:$0xff] %v5180_v60 }
 0x579   : > { %5205 = vst [vmem:[%s9061_s20 + $0x78] sm:$0xff] %v5181_v59  ;;  %v4993_v56 = vpop.f32.mrf.mxu1  ;;  %v5032_v61 = vpop.f32.mrf.mxu0 }
 0x57a   : > { %v4994_v4 = vadd.f32 %v4993_v56, %v9046_v40  ;;  %v5033_v3 = vadd.f32 %v5032_v61, %v9048_v49 }
 0x57c   : > { %v5158_v45 = vadd.f32 %v5103_v39, %v4994_v4  ;;  %v5159_v17 = vadd.f32 %v5105_v55, %v5033_v3 }
 0x57e   : > { %v5182_v35 = vmax.f32 %v5158_v45, 0.0  ;;  %v5183_v50 = vmax.f32 %v5159_v17, 0.0 }
 0x580   : > { %5206 = vst [vmem:[%s9061_s20 + $0x80] sm:$0xff] %v5182_v35 }
 0x581   : > { %5207 = vst [vmem:[%s9061_s20 + $0x88] sm:$0xff] %v5183_v50  ;;  %v4995_v30 = vpop.f32.mrf.mxu1  ;;  %v5034_v31 = vpop.f32.mrf.mxu0 }
 0x582   : > { %v4996_v37 = vadd.f32 %v4995_v30, %v9046_v40  ;;  %v5035_v6 = vadd.f32 %v5034_v31, %v9048_v49 }
 0x584   : > { %v5160_v54 = vadd.f32 %v5107_v27, %v4996_v37  ;;  %v5161_v41 = vadd.f32 %v5109_v44, %v5035_v6 }
 0x586   : > { %v5184_v57 = vmax.f32 %v5160_v54, 0.0  ;;  %v5185_v5 = vmax.f32 %v5161_v41, 0.0 }
 0x588   : > { %5208 = vst [vmem:[%s9061_s20 + $0x90] sm:$0xff] %v5184_v57 }
 0x589   : > { %5209 = vst [vmem:[%s9061_s20 + $0x98] sm:$0xff] %v5185_v5  ;;  %v4998_v39 = vpop.f32.mrf.mxu1  ;;  %v5037_v48 = vpop.f32.mrf.mxu0 }
 0x58a   : > { %v4999_v23 = vadd.f32 %v4998_v39, %v9046_v40  ;;  %v5038_v25 = vadd.f32 %v5037_v48, %v9048_v49 }
 0x58c   : > { %v5162_v18 = vadd.f32 %v5111_v16, %v4999_v23  ;;  %v5163_v55 = vadd.f32 %v5113_v2, %v5038_v25 }
 0x58e   : > { %v5186_v43 = vmax.f32 %v5162_v18, 0.0  ;;  %v5187_v33 = vmax.f32 %v5163_v55, 0.0 }
 0x590   : > { %5210 = vst [vmem:[%s9061_s20 + $0xa0] sm:$0xff] %v5186_v43 }
 0x591   : > { %5211 = vst [vmem:[%s9061_s20 + $0xa8] sm:$0xff] %v5187_v33  ;;  %v5000_v14 = vpop.f32.mrf.mxu1  ;;  %v5039_v42 = vpop.f32.mrf.mxu0 }
 0x592   : > { %v5001_v27 = vadd.f32 %v5000_v14, %v9046_v40  ;;  %v5040_v63 = vadd.f32 %v5039_v42, %v9048_v49 }
 0x594   : > { %v5164_v21 = vadd.f32 %v5115_v8, %v5001_v27  ;;  %v5165_v32 = vadd.f32 %v5117_v0, %v5040_v63 }
 0x596   : > { %v5188_v47 = vmax.f32 %v5164_v21, 0.0  ;;  %v5189_v19 = vmax.f32 %v5165_v32, 0.0 }
 0x598   : > { %5212 = vst [vmem:[%s9061_s20 + $0xb0] sm:$0xff] %v5188_v47 }
 0x599   : > { %5213 = vst [vmem:[%s9061_s20 + $0xb8] sm:$0xff] %v5189_v19 }
 0x59a PF: > { %s23_s25 = sadd.s32 1, %s6528_s25  }
 0x59b   : > { %p20_p4 = scmp.ge.s32.totalorder %s23_s25, 4  }
 0x59d   :  { %22 = sbr.rel (!%p20_p4) target bundleno = 1 (0x1), region = 126 }

</bundles_post_ra>
